<compile_context>
chip_gen: v5e
topology: v5e:2x2
jax: 0.10.0
libtpu: 0.0.40
codegen_flags: <defaults>
</compile_context>

<pallas_src>
import functools

import jax
import jax.numpy as jnp
from jax.experimental import pallas as pl
from jax.experimental.pallas import tpu as pltpu

EPS = 1e-5
_F32_BYTES = 4
_VMEM_LIMIT_BYTES = 32 * 1024 * 1024


def _sum_over_batch(x):
    """Sum a (N, TC, HW) array over the (static) leading batch dim."""
    acc = x[0]
    for i in range(1, x.shape[0]):
        acc = acc + x[i]
    return acc


def _bn_relu_resident_kernel(x_ref, gamma_ref, beta_ref, o_ref, *, inv_count, eps):
    """Single-pass BN+ReLU: the whole (N, TC, HW) slab is VMEM-resident."""
    x = x_ref[...].astype(jnp.float32)                          # (N, TC, HW)
    s = jnp.sum(_sum_over_batch(x), axis=-1, keepdims=True)     # (TC, 1)
    mean = s * inv_count
    centered = x - mean                                         # bcast (TC,1)
    sq = jnp.sum(_sum_over_batch(centered * centered), axis=-1, keepdims=True)
    var = sq * inv_count                                        # centered -> stable
    scale = gamma_ref[...].astype(jnp.float32) * jax.lax.rsqrt(var + eps)
    y = centered * scale + beta_ref[...].astype(jnp.float32)
    o_ref[...] = jnp.maximum(y, 0.0).astype(o_ref.dtype)


def _bn_relu_streaming_kernel(x_ref, gamma_ref, beta_ref, o_ref,
                              s1_ref, s2_ref, shift_ref, scale_ref, bias_ref,
                              *, inv_count, eps):
    """Two-pass streaming BN+ReLU (fallback when the slab does not fit VMEM)."""
    p = pl.program_id(1)              # 0 = statistics pass, 1 = normalize pass
    n = pl.program_id(2)              # batch index
    n_last = pl.num_programs(2) - 1

    @pl.when(jnp.logical_and(p == 0, n == 0))
    def _init():
        # Per-channel shift (mean of the first tile) keeps the shifted
        # E[(x-k)^2] - (E[x-k])^2 variance numerically well conditioned.
        shift_ref[...] = jnp.mean(x_ref[...].astype(jnp.float32),
                                  axis=-1, keepdims=True)
        s1_ref[...] = jnp.zeros_like(s1_ref)
        s2_ref[...] = jnp.zeros_like(s2_ref)

    @pl.when(p == 0)
    def _accumulate():
        # Per-tile XLU reduce into tiny (TC,1) accumulators; the streamed loop
        # stays DMA-bound with no full-tile accumulator vld/vst traffic.
        xc = x_ref[...].astype(jnp.float32) - shift_ref[...]
        s1_ref[...] += jnp.sum(xc, axis=-1, keepdims=True)
        s2_ref[...] += jnp.sum(xc * xc, axis=-1, keepdims=True)

    @pl.when(jnp.logical_and(p == 0, n == n_last))
    def _finalize():
        m1 = s1_ref[...] * inv_count
        var = jnp.maximum(s2_ref[...] * inv_count - m1 * m1, 0.0)
        mean = shift_ref[...] + m1
        scale = gamma_ref[...].astype(jnp.float32) * jax.lax.rsqrt(var + eps)
        scale_ref[...] = scale
        bias_ref[...] = beta_ref[...].astype(jnp.float32) - mean * scale

    @pl.when(p == 1)
    def _normalize():
        x = x_ref[...].astype(jnp.float32)
        y = x * scale_ref[...] + bias_ref[...]
        o_ref[...] = jnp.maximum(y, 0.0).astype(o_ref.dtype)


def _channel_tile_candidates(C):
    return [d for d in range(8, C + 1, 8) if C % d == 0]


def batchnorm_relu(x_nchw, gamma, beta, *, eps=EPS,
                   slab_budget_bytes=2 * 1024 * 1024,
                   min_channel_blocks=1,
                   force_streaming=False):
    """x_nchw: (N, C, H, W); gamma, beta: (C,). Training-mode BN + ReLU."""
    N, C, H, W = x_nchw.shape
    HW = H * W
    assert C % 8 == 0, "channel count must be a multiple of 8"
    # TODO(synk): bf16/int8 inputs would additionally need TILE_C to be a
    # multiple of 16/32 (sublane packing); inputs here are f32.

    divisors = _channel_tile_candidates(C)
    inv_count = 1.0 / float(N * HW)
    gamma_c1 = gamma.reshape(C, 1).astype(jnp.float32)
    beta_c1 = beta.reshape(C, 1).astype(jnp.float32)

    # ---- Fast path: whole per-channel-block slab resident in VMEM ----------
    resident = [d for d in divisors
                if N * d * HW * _F32_BYTES <= slab_budget_bytes
                and C // d >= min_channel_blocks]
    if resident and not force_streaming:
        tc = max(resident)                       # fewest grid steps that fit
        cb = C // tc
        x3d = x_nchw.reshape(N, C, HW)           # free reshape, no transpose
        kernel = functools.partial(_bn_relu_resident_kernel,
                                   inv_count=inv_count, eps=eps)
        out = pl.pallas_call(
            kernel,
            out_shape=jax.ShapeDtypeStruct((N, C, HW), x_nchw.dtype),
            grid_spec=pltpu.PrefetchScalarGridSpec(
                num_scalar_prefetch=0,
                grid=(cb,),
                in_specs=[
                    pl.BlockSpec((N, tc, HW), lambda c: (0, c, 0)),   # x slab
                    pl.BlockSpec((tc, 1), lambda c: (c, 0)),          # gamma
                    pl.BlockSpec((tc, 1), lambda c: (c, 0)),          # beta
                ],
                out_specs=pl.BlockSpec((N, tc, HW), lambda c: (0, c, 0)),
            ),
            compiler_params=pltpu.CompilerParams(
                dimension_semantics=("parallel",),
                vmem_limit_bytes=_VMEM_LIMIT_BYTES,
            ),
        )(x3d, gamma_c1, beta_c1)
        return out.reshape(N, C, H, W)

    # ---- Fallback: two-pass streaming over (channel_block, pass, batch) ----
    stream = [d for d in divisors if d * HW * _F32_BYTES <= slab_budget_bytes]
    tc = max(stream) if stream else 8
    cb = C // tc
    x2d = x_nchw.reshape(N * C, HW)              # free reshape, no transpose
    kernel = functools.partial(_bn_relu_streaming_kernel,
                               inv_count=inv_count, eps=eps)
    out2d = pl.pallas_call(
        kernel,
        out_shape=jax.ShapeDtypeStruct((N * C, HW), x_nchw.dtype),
        grid_spec=pltpu.PrefetchScalarGridSpec(
            num_scalar_prefetch=0,
            grid=(cb, 2, N),
            in_specs=[
                pl.BlockSpec((tc, HW), lambda c, p, n: (n * cb + c, 0)),  # x
                pl.BlockSpec((tc, 1), lambda c, p, n: (c, 0)),            # gamma
                pl.BlockSpec((tc, 1), lambda c, p, n: (c, 0)),            # beta
            ],
            # Pass 0 parks the output view on the block pass 1 writes first,
            # so no garbage writeback ever happens; pass 1 walks real blocks.
            out_specs=pl.BlockSpec((tc, HW),
                                   lambda c, p, n: (p * n * cb + c, 0)),
            scratch_shapes=[
                pltpu.VMEM((tc, 1), jnp.float32),   # sum(x - shift)
                pltpu.VMEM((tc, 1), jnp.float32),   # sum((x - shift)^2)
                pltpu.VMEM((tc, 1), jnp.float32),   # per-channel shift
                pltpu.VMEM((tc, 1), jnp.float32),   # scale = gamma * inv_std
                pltpu.VMEM((tc, 1), jnp.float32),   # bias  = beta - mean*scale
            ],
        ),
        compiler_params=pltpu.CompilerParams(
            dimension_semantics=("parallel", "arbitrary", "arbitrary"),
            vmem_limit_bytes=_VMEM_LIMIT_BYTES,
        ),
    )(x2d, gamma_c1, beta_c1)
    return out2d.reshape(N, C, H, W)


if __name__ == "__main__":
    def reference(x, gamma, beta, eps=EPS):
        mean = jnp.mean(x, axis=(0, 2, 3), keepdims=True)
        var = jnp.var(x, axis=(0, 2, 3), keepdims=True)
        y = (x - mean) * jax.lax.rsqrt(var + eps)
        y = y * gamma.reshape(1, -1, 1, 1) + beta.reshape(1, -1, 1, 1)
        return jnp.maximum(y, 0.0)

    key = jax.random.PRNGKey(0)
    cases = [
        # (shape, mean_offset, kwargs)
        ((1, 256, 28, 28), 0.0, {}),                               # module shape: single-pass, cb=1
        ((1, 256, 28, 28), 0.0, dict(slab_budget_bytes=512 * 1024)),  # single-pass, cb=2
        ((2, 256, 16, 16), 3.0, {}),                               # N>1 resident single-pass
        ((2, 64, 8, 8), 3.0, dict(force_streaming=True)),          # two-pass streaming fallback
    ]
    for shape, offset, kwargs in cases:
        n, c, h, w = shape
        kx, kg, kb, key = jax.random.split(key, 4)
        x = offset + jax.random.normal(kx, shape, dtype=jnp.float32)
        gamma = 1.0 + 0.1 * jax.random.normal(kg, (c,), dtype=jnp.float32)
        beta = 0.1 * jax.random.normal(kb, (c,), dtype=jnp.float32)

        out = jax.block_until_ready(batchnorm_relu(x, gamma, beta, **kwargs))
        ref = reference(x, gamma, beta)
        assert out.shape == ref.shape
        assert jnp.allclose(out, ref, atol=1e-4, rtol=1e-4), (
            f"mismatch for shape {shape} kwargs {kwargs}")

    print("KERNEL_OK")
</pallas_src>

<mosaic_0001>
module attributes {stable_mosaic.version = 11 : i64} {
  func.func @_bn_relu_resident_kernel(%arg0: i32, %arg1: memref<1x256x784xf32, #tpu.memory_space<vmem>>, %arg2: memref<256x1xf32, #tpu.memory_space<vmem>>, %arg3: memref<256x1xf32, #tpu.memory_space<vmem>>, %arg4: memref<1x256x784xf32, #tpu.memory_space<vmem>>) attributes {dimension_semantics = [#tpu.dimension_semantics<parallel>], iteration_bounds = array<i64: 1>, scalar_prefetch = 0 : i64, scratch_operands = 0 : i64, tpu.core_type = #tpu.core_type<tc>, window_params = [{transform_indices = @transform_0, window_bounds = array<i64: 1, 256, 784>}, {transform_indices = @transform_1, window_bounds = array<i64: 256, 1>}, {transform_indices = @transform_2, window_bounds = array<i64: 256, 1>}, {transform_indices = @transform_3, window_bounds = array<i64: 1, 256, 784>}]} {
    %c0 = arith.constant 0 : index
    %c0_0 = arith.constant 0 : index
    %c0_1 = arith.constant 0 : index
    %0 = vector.load %arg1[%c0, %c0_0, %c0_1] : memref<1x256x784xf32, #tpu.memory_space<vmem>>, vector<1x256x784xf32>
    %1 = vector.shape_cast %0 : vector<1x256x784xf32> to vector<256x784xf32>
    %cst = arith.constant dense<0.000000e+00> : vector<256xf32>
    %2 = vector.multi_reduction <add>, %1, %cst [1] : vector<256x784xf32> to vector<256xf32>
    %3 = vector.shape_cast %2 : vector<256xf32> to vector<256x1xf32>
    %cst_2 = arith.constant 0.00127551018 : f32
    %4 = vector.broadcast %cst_2 : f32 to vector<256x1xf32>
    %5 = arith.mulf %3, %4 : vector<256x1xf32>
    %6 = vector.shape_cast %5 : vector<256x1xf32> to vector<1x256x1xf32>
    %7 = vector.broadcast %6 : vector<1x256x1xf32> to vector<1x256x784xf32>
    %8 = arith.subf %0, %7 : vector<1x256x784xf32>
    %9 = arith.mulf %8, %8 : vector<1x256x784xf32>
    %10 = vector.shape_cast %9 : vector<1x256x784xf32> to vector<256x784xf32>
    %cst_3 = arith.constant dense<0.000000e+00> : vector<256xf32>
    %11 = vector.multi_reduction <add>, %10, %cst_3 [1] : vector<256x784xf32> to vector<256xf32>
    %12 = vector.shape_cast %11 : vector<256xf32> to vector<256x1xf32>
    %cst_4 = arith.constant 0.00127551018 : f32
    %13 = vector.broadcast %cst_4 : f32 to vector<256x1xf32>
    %14 = arith.mulf %12, %13 : vector<256x1xf32>
    %c0_5 = arith.constant 0 : index
    %c0_6 = arith.constant 0 : index
    %15 = vector.load %arg2[%c0_5, %c0_6] : memref<256x1xf32, #tpu.memory_space<vmem>>, vector<256x1xf32>
    %cst_7 = arith.constant 9.99999974E-6 : f32
    %16 = vector.broadcast %cst_7 : f32 to vector<256x1xf32>
    %17 = arith.addf %14, %16 : vector<256x1xf32>
    %18 = math.rsqrt %17 : vector<256x1xf32>
    %19 = arith.mulf %15, %18 : vector<256x1xf32>
    %20 = vector.shape_cast %19 : vector<256x1xf32> to vector<1x256x1xf32>
    %21 = vector.broadcast %20 : vector<1x256x1xf32> to vector<1x256x784xf32>
    %22 = arith.mulf %8, %21 : vector<1x256x784xf32>
    %c0_8 = arith.constant 0 : index
    %c0_9 = arith.constant 0 : index
    %23 = vector.load %arg3[%c0_8, %c0_9] : memref<256x1xf32, #tpu.memory_space<vmem>>, vector<256x1xf32>
    %24 = vector.shape_cast %23 : vector<256x1xf32> to vector<1x256x1xf32>
    %25 = vector.broadcast %24 : vector<1x256x1xf32> to vector<1x256x784xf32>
    %26 = arith.addf %22, %25 : vector<1x256x784xf32>
    %cst_10 = arith.constant 0.000000e+00 : f32
    %27 = vector.broadcast %cst_10 : f32 to vector<1x256x784xf32>
    %28 = arith.maximumf %26, %27 : vector<1x256x784xf32>
    %c0_11 = arith.constant 0 : index
    %c0_12 = arith.constant 0 : index
    %c0_13 = arith.constant 0 : index
    %29 = vector.load %arg4[%c0_11, %c0_12, %c0_13] : memref<1x256x784xf32, #tpu.memory_space<vmem>>, vector<1x256x784xf32>
    tpu.vector_store %arg4[%c0_11, %c0_12, %c0_13], %28 {strides = array<i32>} : memref<1x256x784xf32, #tpu.memory_space<vmem>>, vector<1x256x784xf32>,
    return
  }
  func.func @transform_0(%arg0: i32) -> (i32, i32, i32) {
    %c0_i32 = arith.constant 0 : i32
    %c0_i32_0 = arith.constant 0 : i32
    %c0_i32_1 = arith.constant 0 : i32
    return %c0_i32, %arg0, %c0_i32_0 : i32, i32, i32
  }
  func.func @transform_1(%arg0: i32) -> (i32, i32) {
    %c0_i32 = arith.constant 0 : i32
    %c0_i32_0 = arith.constant 0 : i32
    return %arg0, %c0_i32 : i32, i32
  }
  func.func @transform_2(%arg0: i32) -> (i32, i32) {
    %c0_i32 = arith.constant 0 : i32
    %c0_i32_0 = arith.constant 0 : i32
    return %arg0, %c0_i32 : i32, i32
  }
  func.func @transform_3(%arg0: i32) -> (i32, i32, i32) {
    %c0_i32 = arith.constant 0 : i32
    %c0_i32_0 = arith.constant 0 : i32
    %c0_i32_1 = arith.constant 0 : i32
    return %c0_i32, %arg0, %c0_i32_0 : i32, i32, i32
  }
}

</mosaic_0001>

<bundles_post_ra>
// kernel: tpu_custom_call.1
= control target key start
LH: loop header
LB: loop body
LE: loop exit
PB: predicated region body
PF: predicated region fallthrough
CT: control target
= control target key end

     0   :  { %vm243_vm0 = vcmask 130048   ;;  %s7681_s0 = inlined_call_operand.vmem [shape: f32[1,256,784], index: 0, kind: input, shape index: {}]   ;;  %s7682_s2 = inlined_call_operand.vmem [shape: f32[256,1], index: 2, kind: input, shape index: {}]   ;;  %s7683_s1 = inlined_call_operand.vmem [shape: f32[256,1], index: 1, kind: input, shape index: {}]   ;;  %s7684_s3 = inlined_call_operand.vmem [shape: f32[1,256,784], index: 3, kind: output, shape index: {}]  }
   0x1   :  { %v3277_v0 = vld [vmem:[%s7681_s0 + $0xe0] sm:$0xff]  ;;  %v3282_v1 = vld [vmem:[%s7681_s0 + $0xe8] sm:$0xff]  ;;  %v3287_v2 = vld [vmem:[%s7681_s0 + $0xf0] sm:$0xff] }
   0x2   :  { %v275_v3 = vadd.f32 %v3282_v1, %v3277_v0  ;;  %v3294_v4 = vld [vmem:[%s7681_s0 + $0xf8] sm:$0xff]  ;;  %v3299_v5 = vld [vmem:[%s7681_s0 + $0x70] sm:$0xff]  ;;  %v3309_v7 = vld [vmem:[%s7681_s0 + $0x100] sm:$0xff] }
   0x3   :  { %v3304_v6 = vld [vmem:[%s7681_s0 + $0x78] sm:$0xff]  ;;  %v3315_v9 = vld [vmem:[%s7681_s0 + $0x80] sm:$0xff]  ;;  %v3322_v11 = vld [vmem:[%s7681_s0 + $0x108] sm:$0xff] }
   0x4   :  { %v276_v8 = vadd.f32 %v275_v3, %v3287_v2  ;;  %v257_v10 = vadd.f32 %v3304_v6, %v3299_v5  ;;  %v3327_v12 = vld [vmem:[%s7681_s0 + $0x88] sm:$0xff]  ;;  %v3332_v13 = vld [vmem:[%s7681_s0] sm:$0xff]  ;;  %v3337_v14 = vld [vmem:[%s7681_s0 + $0x110] sm:$0xff] }
   0x5   :  { %v3344_v17 = vld [vmem:[%s7681_s0 + $0x8] sm:$0xff]  ;;  %v3349_v18 = vld [vmem:[%s7681_s0 + $0x10] sm:$0xff]  ;;  %v3359_v20 = vld [vmem:[%s7681_s0 + $0xa0] sm:$0xff]  ;;  %v280_v28 = vsel %vm243_vm0, %v3337_v14, 0.0 }
   0x6   :  { %v277_v15 = vadd.f32 %v276_v8, %v3294_v4  ;;  %v258_v16 = vadd.f32 %v257_v10, %v3315_v9  ;;  %v3354_v19 = vld [vmem:[%s7681_s0 + $0x90] sm:$0xff]  ;;  %v3364_v21 = vld [vmem:[%s7681_s0 + $0x18] sm:$0xff]  ;;  %v238_v22 = vadd.f32 %v3344_v17, %v3332_v13  ;;  %v3378_v26 = vld [vmem:[%s7681_s0 + $0x120] sm:$0xff]  ;;  %v262_v39 = vsel %vm243_vm0, %v3359_v20, 0.0 }
   0x7   :  { %v3373_v25 = vld [vmem:[%s7681_s0 + $0x118] sm:$0xff]  ;;  %v3383_v27 = vld [vmem:[%s7681_s0 + $0x128] sm:$0xff]  ;;  %v3395_v30 = vld [vmem:[%s7681_s0 + $0x20] sm:$0xff] }
   0x8   :  { %v278_v23 = vadd.f32 %v277_v15, %v3309_v7  ;;  %v259_v24 = vadd.f32 %v258_v16, %v3327_v12  ;;  %v3390_v29 = vld [vmem:[%s7681_s0 + $0x98] sm:$0xff]  ;;  %v239_v31 = vadd.f32 %v238_v22, %v3349_v18  ;;  %v284_v32 = vadd.f32 %v3378_v26, %v3373_v25  ;;  %v3405_v35 = vld [vmem:[%s7681_s0 + $0x28] sm:$0xff]  ;;  %v3410_v36 = vld [vmem:[%s7681_s0 + $0x130] sm:$0xff] }
   0x9   :  { %v35_v37 = vld [vmem:[%s7681_s0 + $0xa8] sm:$0xff]  ;;  %v36_v38 = vld [vmem:[%s7681_s0 + $0xb0] sm:$0xff]  ;;  %v3429_v42 = vld [vmem:[%s7681_s0 + $0x138] sm:$0xff] }
   0xa   :  { %v279_v33 = vadd.f32 %v278_v23, %v3322_v11  ;;  %v260_v34 = vadd.f32 %v259_v24, %v3354_v19  ;;  %v3423_v40 = vld [vmem:[%s7681_s0 + $0x30] sm:$0xff]  ;;  %v240_v41 = vadd.f32 %v239_v31, %v3364_v21  ;;  %v285_v43 = vadd.f32 %v284_v32, %v3383_v27  ;;  %v3435_v44 = vld [vmem:[%s7681_s0 + $0xb8] sm:$0xff]  ;;  %v3441_v48 = vld [vmem:[%s7681_s0 + $0x140] sm:$0xff] }
   0xb   :  { %v266_v45 = vadd.f32 %v36_v38, %v35_v37  ;;  %v3446_v49 = vld [vmem:[%s7681_s0 + $0xc0] sm:$0xff]  ;;  %v21_v50 = vld [vmem:[%s7681_s0 + $0x38] sm:$0xff]  ;;  %v3455_v52 = vld [vmem:[%s7681_s0 + $0x148] sm:$0xff]  ;;  %v244_v58 = vsel %vm243_vm0, %v3423_v40, 0.0 }
   0xc   :  { %v281_v46 = vadd.f32 %v280_v28, %v279_v33  ;;  %v261_v47 = vadd.f32 %v260_v34, %v3390_v29  ;;  %v241_v51 = vadd.f32 %v240_v41, %v3395_v30  ;;  %v286_v53 = vadd.f32 %v285_v43, %v3410_v36  ;;  %v22_v55 = vld [vmem:[%s7681_s0 + $0x40] sm:$0xff]  ;;  %v23_v56 = vld [vmem:[%s7681_s0 + $0x48] sm:$0xff]  ;;  %v3475_v60 = vld [vmem:[%s7681_s0 + $0xd8] sm:$0xff] }
   0xd   :  { %v267_v54 = vadd.f32 %v266_v45, %v3435_v44  ;;  %v3470_v59 = vld [vmem:[%s7681_s0 + $0xc8] sm:$0xff]  ;;  %v24_v61 = vld [vmem:[%s7681_s0 + $0x50] sm:$0xff]  ;;  %v248_v62 = vadd.f32 %v22_v55, %v21_v50  ;;  %v70_v10 = vld [vmem:[%s7681_s0 + $0x1c0] sm:$0xff]  ;;  %v289_v22 = vsel %vm243_vm0, %v3455_v52, 0.0  ;;  %v271_v41 = vsel %vm243_vm0, %v3475_v60, 0.0 }
   0xe   :  { %282 = vadd.xlane.f32.xlu2 %v281_v46  ;;  %v263_v57 = vadd.f32 %v262_v39, %v261_v47  ;;  %v242_v63 = vadd.f32 %v241_v51, %v3405_v35  ;;  %v287_v3 = vadd.f32 %v286_v53, %v3429_v42  ;;  %v71_v15 = vld [vmem:[%s7681_s0 + $0x1c8] sm:$0xff]  ;;  %v72_v16 = vld [vmem:[%s7681_s0 + $0x1d0] sm:$0xff]  ;;  %v25_v24 = vld [vmem:[%s7681_s0 + $0x58] sm:$0xff] }
   0xf   :  { %v268_v8 = vadd.f32 %v267_v54, %v3446_v49  ;;  %v3497_v23 = vld [vmem:[%s7681_s0 + $0xd0] sm:$0xff]  ;;  %v249_v28 = vadd.f32 %v248_v62, %v23_v56  ;;  %v311_v31 = vadd.f32 %v71_v15, %v70_v10  ;;  %v73_v37 = vld [vmem:[%s7681_s0 + $0x1d8] sm:$0xff]  ;;  %v26_v43 = vld [vmem:[%s7681_s0 + $0x60] sm:$0xff] }
  0x10   :  { %264 = vadd.xlane.f32.xlu1 %v263_v57  ;;  %v245_v32 = vadd.f32 %v244_v58, %v242_v63  ;;  %v288_v33 = vadd.f32 %v287_v3, %v3441_v48  ;;  %v56_v38 = vld [vmem:[%s7681_s0 + $0x150] sm:$0xff]  ;;  %v57_v39 = vld [vmem:[%s7681_s0 + $0x158] sm:$0xff]  ;;  %v3521_v45 = vld [vmem:[%s7681_s0 + $0x68] sm:$0xff] }
  0x11   :  { %v269_v34 = vadd.f32 %v268_v8, %v3470_v59  ;;  %v250_v46 = vadd.f32 %v249_v28, %v24_v61  ;;  %v312_v47 = vadd.f32 %v311_v31, %v72_v16  ;;  %v58_v50 = vld [vmem:[%s7681_s0 + $0x160] sm:$0xff]  ;;  %v293_v51 = vadd.f32 %v57_v39, %v56_v38  ;;  %v59_v56 = vld [vmem:[%s7681_s0 + $0x168] sm:$0xff]  ;;  %v76_v61 = vld [vmem:[%s7681_s0 + $0x1f0] sm:$0xff] }
  0x12   :  { %246 = vadd.xlane.f32.xlu0 %v245_v32  ;;  %v290_v53 = vadd.f32 %v289_v22, %v288_v33  ;;  %v74_v55 = vld [vmem:[%s7681_s0 + $0x1e0] sm:$0xff]  ;;  %v91_v57 = vld [vmem:[%s7681_s0 + $0x268] sm:$0xff]  ;;  %v92_v3 = vld [vmem:[%s7681_s0 + $0x270] sm:$0xff]  ;;  %v253_v15 = vsel %vm243_vm0, %v3521_v45, 0.0  ;;  %v316_v39 = vsel %vm243_vm0, %v76_v61, 0.0 }
  0x13   :  { %v270_v54 = vadd.f32 %v269_v34, %v3497_v23  ;;  %v251_v58 = vadd.f32 %v250_v46, %v25_v24  ;;  %v313_v62 = vadd.f32 %v312_v47, %v73_v37  ;;  %v294_v63 = vadd.f32 %v293_v51, %v58_v50  ;;  %v93_v8 = vld [vmem:[%s7681_s0 + $0x278] sm:$0xff]  ;;  %v75_v16 = vld [vmem:[%s7681_s0 + $0x1e8] sm:$0xff]  ;;  %v60_v22 = vld [vmem:[%s7681_s0 + $0x170] sm:$0xff] }
  0x14   :  { %v94_v24 = vld [vmem:[%s7681_s0 + $0x280] sm:$0xff]  ;;  %v338_v28 = vadd.f32 %v92_v3, %v91_v57  ;;  %v77_v34 = vld [vmem:[%s7681_s0 + $0x1f8] sm:$0xff]  ;;  %v79_v38 = vld [vmem:[%s7681_s0 + $0x208] sm:$0xff] }
  0x15   :  { %v272_v10 = vadd.f32 %v271_v41, %v270_v54  ;;  %v252_v31 = vadd.f32 %v251_v58, %v26_v43  ;;  %v314_v32 = vadd.f32 %v313_v62, %v74_v55  ;;  %v295_v33 = vadd.f32 %v294_v63, %v59_v56  ;;  %v78_v37 = vld [vmem:[%s7681_s0 + $0x200] sm:$0xff]  ;;  %v61_v41 = vld [vmem:[%s7681_s0 + $0x178] sm:$0xff]  ;;  %v95_v43 = vld [vmem:[%s7681_s0 + $0x288] sm:$0xff] }
  0x16   :  { %291 = vadd.xlane.f32.xlu2 %v290_v53  ;;  %v339_v46 = vadd.f32 %v338_v28, %v93_v8  ;;  %v320_v47 = vadd.f32 %v78_v37, %v77_v34  ;;  %v80_v54 = vld [vmem:[%s7681_s0 + $0x210] sm:$0xff]  ;;  %v113_v56 = vld [vmem:[%s7681_s0 + $0x318] sm:$0xff]  ;;  %v62_v57 = vld [vmem:[%s7681_s0 + $0x180] sm:$0xff] }
  0x17   :  { %v254_v50 = vadd.f32 %v253_v15, %v252_v31  ;;  %v315_v51 = vadd.f32 %v314_v32, %v75_v16  ;;  %v296_v53 = vadd.f32 %v295_v33, %v60_v22  ;;  %v112_v55 = vld [vmem:[%s7681_s0 + $0x310] sm:$0xff]  ;;  %v114_v62 = vld [vmem:[%s7681_s0 + $0x320] sm:$0xff]  ;;  %v63_v15 = vld [vmem:[%s7681_s0 + $0x188] sm:$0xff]  ;;  %v298_v34 = vsel %vm243_vm0, %v62_v57, 0.0 }
  0x18   :  { %273 = vadd.xlane.f32.xlu1 %v272_v10  ;;  %v340_v58 = vadd.f32 %v339_v46, %v94_v24  ;;  %v321_v61 = vadd.f32 %v320_v47, %v79_v38  ;;  %v365_v63 = vadd.f32 %v113_v56, %v112_v55  ;;  %v96_v8 = vld [vmem:[%s7681_s0 + $0x290] sm:$0xff]  ;;  %v115_v10 = vld [vmem:[%s7681_s0 + $0x328] sm:$0xff]  ;;  %v81_v24 = vld [vmem:[%s7681_s0 + $0x218] sm:$0xff] }
  0x19   :  { %v317_v3 = vadd.f32 %v316_v39, %v315_v51  ;;  %v297_v16 = vadd.f32 %v296_v53, %v61_v41  ;;  %v64_v32 = vld [vmem:[%s7681_s0 + $0x190] sm:$0xff]  ;;  %v65_v33 = vld [vmem:[%s7681_s0 + $0x198] sm:$0xff]  ;;  %v66_v38 = vld [vmem:[%s7681_s0 + $0x1a0] sm:$0xff] }
  0x1a   :  { %255 = vadd.xlane.f32.xlu0 %v254_v50  ;;  %v341_v22 = vadd.f32 %v340_v58, %v95_v43  ;;  %v322_v28 = vadd.f32 %v321_v61, %v80_v54  ;;  %v366_v31 = vadd.f32 %v365_v63, %v114_v62  ;;  %v97_v37 = vld [vmem:[%s7681_s0 + $0x298] sm:$0xff]  ;;  %v302_v39 = vadd.f32 %v64_v32, %v63_v15  ;;  %v98_v43 = vld [vmem:[%s7681_s0 + $0x2a0] sm:$0xff]  ;;  %v99_v46 = vld [vmem:[%s7681_s0 + $0x2a8] sm:$0xff] }
  0x1b   :  { %v100_v47 = vld [vmem:[%s7681_s0 + $0x2b0] sm:$0xff]  ;;  %v82_v51 = vld [vmem:[%s7681_s0 + $0x220] sm:$0xff]  ;;  %v83_v53 = vld [vmem:[%s7681_s0 + $0x228] sm:$0xff]  ;;  %v347_v57 = vadd.f32 %v99_v46, %v98_v43  ;;  %v299_v58 = vadd.f32 %v298_v34, %v297_v16  ;;  %v343_v61 = vsel %vm243_vm0, %v97_v37, 0.0 }
  0x1c   :  { %v367_v41 = vadd.f32 %v366_v31, %v115_v10  ;;  %v342_v50 = vadd.f32 %v341_v22, %v96_v8  ;;  %v323_v54 = vadd.f32 %v322_v28, %v81_v24  ;;  %v116_v55 = vld [vmem:[%s7681_s0 + $0x330] sm:$0xff]  ;;  %v303_v56 = vadd.f32 %v302_v39, %v65_v33  ;;  %v67_v62 = vld [vmem:[%s7681_s0 + $0x1a8] sm:$0xff]  ;;  %v133_v63 = vld [vmem:[%s7681_s0 + $0x3b8] sm:$0xff] }
  0x1d   :  { %v69_v8 = vld [vmem:[%s7681_s0 + $0x1b8] sm:$0xff]  ;;  %v348_v16 = vadd.f32 %v347_v57, %v100_v47  ;;  %v135_v22 = vld [vmem:[%s7681_s0 + $0x3c8] sm:$0xff]  ;;  %v68_v32 = vld [vmem:[%s7681_s0 + $0x1b0] sm:$0xff]  ;;  %v325_v47 = vsel %vm243_vm0, %v83_v53, 0.0 }
  0x1e   :  { %318 = vadd.xlane.f32.xlu2 %v317_v3  ;;  %v134_v3 = vld [vmem:[%s7681_s0 + $0x3c0] sm:$0xff]  ;;  %v304_v10 = vadd.f32 %v303_v56, %v66_v38  ;;  %v101_v15 = vld [vmem:[%s7681_s0 + $0x2b8] sm:$0xff]  ;;  %v368_v31 = vadd.f32 %v367_v41, %v116_v55  ;;  %v84_v33 = vld [vmem:[%s7681_s0 + $0x230] sm:$0xff]  ;;  %v344_v34 = vadd.f32 %v343_v61, %v342_v50  ;;  %v324_v37 = vadd.f32 %v323_v54, %v82_v51 }
  0x1f   :  { %v392_v24 = vadd.f32 %v134_v3, %v133_v63  ;;  %v117_v28 = vld [vmem:[%s7681_s0 + $0x338] sm:$0xff]  ;;  %v118_v38 = vld [vmem:[%s7681_s0 + $0x340] sm:$0xff]  ;;  %v307_v50 = vsel %vm243_vm0, %v69_v8, 0.0  ;;  %v349_v54 = vadd.f32 %v348_v16, %v101_v15  ;;  %v136_v55 = vld [vmem:[%s7681_s0 + $0x3d0] sm:$0xff] }
  0x20   :  { %v305_v39 = vadd.f32 %v304_v10, %v67_v62  ;;  %v85_v41 = vld [vmem:[%s7681_s0 + $0x238] sm:$0xff]  ;;  %v86_v46 = vld [vmem:[%s7681_s0 + $0x240] sm:$0xff]  ;;  %v87_v56 = vld [vmem:[%s7681_s0 + $0x248] sm:$0xff]  ;;  %v369_v63 = vadd.f32 %v368_v31, %v117_v28  ;;  %v326_v10 = vadd.f32 %v325_v47, %v324_v37  ;;  %v370_v15 = vsel %vm243_vm0, %v118_v38, 0.0 }
  0x21   :  { %v393_v43 = vadd.f32 %v392_v24, %v135_v22  ;;  %v102_v51 = vld [vmem:[%s7681_s0 + $0x2c0] sm:$0xff]  ;;  %v329_v57 = vadd.f32 %v85_v41, %v84_v33  ;;  %v119_v53 = vld [vmem:[%s7681_s0 + $0x348] sm:$0xff]  ;;  %v121_v62 = vld [vmem:[%s7681_s0 + $0x358] sm:$0xff] }
  0x22   :  { %300 = vadd.xlane.f32.xlu0 %v299_v58  ;;  %v306_v61 = vadd.f32 %v305_v39, %v68_v32  ;;  %v120_v58 = vld [vmem:[%s7681_s0 + $0x350] sm:$0xff]  ;;  %v103_v22 = vld [vmem:[%s7681_s0 + $0x2c8] sm:$0xff]  ;;  %v154_v28 = vld [vmem:[%s7681_s0 + $0x460] sm:$0xff]  ;;  %v350_v33 = vadd.f32 %v349_v54, %v102_v51  ;;  %v371_v51 = vadd.f32 %v370_v15, %v369_v63 }
  0x23   :  { %v330_v3 = vadd.f32 %v329_v57, %v86_v46  ;;  %v374_v8 = vadd.f32 %v120_v58, %v119_v53  ;;  %v394_v24 = vadd.f32 %v393_v43, %v136_v55  ;;  %v88_v32 = vld [vmem:[%s7681_s0 + $0x250] sm:$0xff]  ;;  %v155_v31 = vld [vmem:[%s7681_s0 + $0x468] sm:$0xff]  ;;  %v90_v37 = vld [vmem:[%s7681_s0 + $0x260] sm:$0xff] }
  0x24   :  { %v308_v16 = vadd.f32 %v307_v50, %v306_v61  ;;  %v156_v43 = vld [vmem:[%s7681_s0 + $0x470] sm:$0xff]  ;;  %v419_v41 = vadd.f32 %v155_v31, %v154_v28  ;;  %v89_v46 = vld [vmem:[%s7681_s0 + $0x258] sm:$0xff]  ;;  %v122_v47 = vld [vmem:[%s7681_s0 + $0x360] sm:$0xff]  ;;  %v334_v58 = vsel %vm243_vm0, %v90_v37, 0.0 }
  0x25   :  { %v331_v38 = vadd.f32 %v330_v3, %v87_v56  ;;  %v375_v39 = vadd.f32 %v374_v8, %v121_v62  ;;  %v105_v50 = vld [vmem:[%s7681_s0 + $0x2d8] sm:$0xff]  ;;  %v104_v54 = vld [vmem:[%s7681_s0 + $0x2d0] sm:$0xff]  ;;  %v106_v56 = vld [vmem:[%s7681_s0 + $0x2e0] sm:$0xff]  ;;  %v351_v8 = vadd.f32 %v350_v33, %v103_v22 }
  0x26   :  { %345 = vadd.xlane.f32.xlu2 %v344_v34  ;;  %v137_v34 = vld [vmem:[%s7681_s0 + $0x3d8] sm:$0xff]  ;;  %309 = vadd.xlane.f32.xlu1 %v308_v16  ;;  %v107_v57 = vld [vmem:[%s7681_s0 + $0x2e8] sm:$0xff]  ;;  %v138_v61 = vld [vmem:[%s7681_s0 + $0x3e0] sm:$0xff]  ;;  %v420_v63 = vadd.f32 %v419_v41, %v156_v43  ;;  %v356_v3 = vadd.f32 %v106_v56, %v105_v50  ;;  %v352_v31 = vsel %vm243_vm0, %v104_v54, 0.0 }
  0x27   :  { %v332_v55 = vadd.f32 %v331_v38, %v88_v32  ;;  %v395_v53 = vadd.f32 %v394_v24, %v137_v34  ;;  %v157_v62 = vld [vmem:[%s7681_s0 + $0x478] sm:$0xff]  ;;  %v376_v16 = vadd.f32 %v375_v39, %v122_v47  ;;  %v108_v32 = vld [vmem:[%s7681_s0 + $0x2f0] sm:$0xff]  ;;  %v123_v22 = vld [vmem:[%s7681_s0 + $0x368] sm:$0xff] }
  0x28   :  { %v140_v24 = vld [vmem:[%s7681_s0 + $0x3f0] sm:$0xff]  ;;  %v141_v28 = vld [vmem:[%s7681_s0 + $0x3f8] sm:$0xff]  ;;  %v357_v33 = vadd.f32 %v356_v3, %v107_v57  ;;  %v142_v34 = vld [vmem:[%s7681_s0 + $0x400] sm:$0xff]  ;;  %v421_v50 = vadd.f32 %v420_v63, %v157_v62 }
  0x29   :  { %v333_v15 = vadd.f32 %v332_v55, %v89_v46  ;;  %v401_v37 = vadd.f32 %v141_v28, %v140_v24  ;;  %v109_v39 = vld [vmem:[%s7681_s0 + $0x2f8] sm:$0xff]  ;;  %v175_v43 = vld [vmem:[%s7681_s0 + $0x508] sm:$0xff]  ;;  %v176_v41 = vld [vmem:[%s7681_s0 + $0x510] sm:$0xff]  ;;  %v396_v46 = vadd.f32 %v395_v53, %v138_v61 }
  0x2a   :  { %327 = vadd.xlane.f32.xlu0 %v326_v10  ;;  %v139_v10 = vld [vmem:[%s7681_s0 + $0x3e8] sm:$0xff]  ;;  %v124_v47 = vld [vmem:[%s7681_s0 + $0x370] sm:$0xff]  ;;  %v358_v55 = vadd.f32 %v357_v33, %v108_v32  ;;  %v177_v56 = vld [vmem:[%s7681_s0 + $0x518] sm:$0xff]  ;;  %v446_v57 = vadd.f32 %v176_v41, %v175_v43 }
  0x2b   :  { %v335_v38 = vadd.f32 %v334_v58, %v333_v15  ;;  %v111_v54 = vld [vmem:[%s7681_s0 + $0x308] sm:$0xff]  ;;  %v353_v58 = vadd.f32 %v352_v31, %v351_v8  ;;  %v397_v3 = vsel %vm243_vm0, %v139_v10, 0.0  ;;  %v158_v61 = vld [vmem:[%s7681_s0 + $0x480] sm:$0xff]  ;;  %v402_v62 = vadd.f32 %v401_v37, %v142_v34  ;;  %v128_v32 = vld [vmem:[%s7681_s0 + $0x390] sm:$0xff] }
  0x2c   :  { %v110_v53 = vld [vmem:[%s7681_s0 + $0x300] sm:$0xff]  ;;  %v359_v15 = vadd.f32 %v358_v55, %v109_v39  ;;  %v143_v8 = vld [vmem:[%s7681_s0 + $0x408] sm:$0xff]  ;;  %v125_v24 = vld [vmem:[%s7681_s0 + $0x378] sm:$0xff]  ;;  %v361_v31 = vsel %vm243_vm0, %v111_v54, 0.0  ;;  %v398_v34 = vadd.f32 %v397_v3, %v396_v46  ;;  %v422_v37 = vadd.f32 %v421_v50, %v158_v61 }
  0x2d   :  { %v126_v63 = vld [vmem:[%s7681_s0 + $0x380] sm:$0xff]  ;;  %v159_v28 = vld [vmem:[%s7681_s0 + $0x488] sm:$0xff]  ;;  %v129_v39 = vld [vmem:[%s7681_s0 + $0x398] sm:$0xff]  ;;  %v403_v55 = vadd.f32 %v402_v62, %v143_v8  ;;  %v379_v61 = vsel %vm243_vm0, %v125_v24, 0.0 }
  0x2e   :  { %372 = vadd.xlane.f32.xlu2 %v371_v51  ;;  %v377_v51 = vadd.f32 %v376_v16, %v123_v22  ;;  %336 = vadd.xlane.f32.xlu1 %v335_v38  ;;  %v127_v16 = vld [vmem:[%s7681_s0 + $0x388] sm:$0xff]  ;;  %v178_v10 = vld [vmem:[%s7681_s0 + $0x520] sm:$0xff]  ;;  %v447_v22 = vadd.f32 %v446_v57, %v177_v56  ;;  %v360_v38 = vadd.f32 %v359_v15, %v110_v53  ;;  %v161_v43 = vld [vmem:[%s7681_s0 + $0x498] sm:$0xff] }
  0x2f   :  { %v383_v33 = vadd.f32 %v127_v16, %v126_v63  ;;  %v162_v41 = vld [vmem:[%s7681_s0 + $0x4a0] sm:$0xff]  ;;  %v160_v46 = vld [vmem:[%s7681_s0 + $0x490] sm:$0xff]  ;;  %v163_v57 = vld [vmem:[%s7681_s0 + $0x4a8] sm:$0xff]  ;;  %v423_v16 = vadd.f32 %v422_v37, %v159_v28 }
  0x30   :  { %v378_v54 = vadd.f32 %v377_v51, %v124_v47  ;;  %v144_v50 = vld [vmem:[%s7681_s0 + $0x410] sm:$0xff]  ;;  %v428_v3 = vadd.f32 %v162_v41, %v161_v43  ;;  %v362_v53 = vadd.f32 %v361_v31, %v360_v38  ;;  %v130_v47 = vld [vmem:[%s7681_s0 + $0x3a0] sm:$0xff]  ;;  %v197_v51 = vld [vmem:[%s7681_s0 + $0x5b8] sm:$0xff]  ;;  %v448_v63 = vadd.f32 %v447_v22, %v178_v10 }
  0x31   :  { %v384_v56 = vadd.f32 %v383_v33, %v128_v32  ;;  %v179_v62 = vld [vmem:[%s7681_s0 + $0x528] sm:$0xff]  ;;  %v132_v32 = vld [vmem:[%s7681_s0 + $0x3b0] sm:$0xff]  ;;  %v424_v38 = vsel %vm243_vm0, %v160_v46, 0.0  ;;  %v198_v28 = vld [vmem:[%s7681_s0 + $0x5c0] sm:$0xff] }
  0x32   :  { %354 = vadd.xlane.f32.xlu0 %v353_v58  ;;  %v196_v58 = vld [vmem:[%s7681_s0 + $0x5b0] sm:$0xff]  ;;  %v131_v15 = vld [vmem:[%s7681_s0 + $0x3a8] sm:$0xff]  ;;  %v429_v31 = vadd.f32 %v428_v3, %v163_v57  ;;  %v380_v22 = vadd.f32 %v379_v61, %v378_v54  ;;  %v149_v43 = vld [vmem:[%s7681_s0 + $0x438] sm:$0xff] }
  0x33   :  { %v385_v8 = vadd.f32 %v384_v56, %v129_v39  ;;  %v164_v24 = vld [vmem:[%s7681_s0 + $0x4b0] sm:$0xff]  ;;  %v473_v33 = vadd.f32 %v197_v51, %v196_v58  ;;  %v147_v10 = vld [vmem:[%s7681_s0 + $0x428] sm:$0xff]  ;;  %v404_v39 = vadd.f32 %v403_v55, %v144_v50  ;;  %v145_v41 = vld [vmem:[%s7681_s0 + $0x418] sm:$0xff]  ;;  %v449_v50 = vadd.f32 %v448_v63, %v179_v62 }
  0x34   :  { %v148_v37 = vld [vmem:[%s7681_s0 + $0x430] sm:$0xff]  ;;  %v146_v54 = vld [vmem:[%s7681_s0 + $0x420] sm:$0xff]  ;;  %v388_v56 = vsel %vm243_vm0, %v132_v32, 0.0  ;;  %v183_v61 = vld [vmem:[%s7681_s0 + $0x548] sm:$0xff]  ;;  %v430_v51 = vadd.f32 %v429_v31, %v164_v24 }
  0x35   :  { %v410_v46 = vadd.f32 %v148_v37, %v147_v10  ;;  %v150_v57 = vld [vmem:[%s7681_s0 + $0x440] sm:$0xff]  ;;  %v165_v58 = vld [vmem:[%s7681_s0 + $0x4b8] sm:$0xff]  ;;  %v199_v62 = vld [vmem:[%s7681_s0 + $0x5c8] sm:$0xff]  ;;  %v474_v63 = vadd.f32 %v473_v33, %v198_v28  ;;  %v406_v31 = vsel %vm243_vm0, %v146_v54, 0.0 }
  0x36   :  { %399 = vadd.xlane.f32.xlu2 %v398_v34  ;;  %v386_v34 = vadd.f32 %v385_v8, %v130_v47  ;;  %363 = vadd.xlane.f32.xlu1 %v362_v53  ;;  %v182_v3 = vld [vmem:[%s7681_s0 + $0x540] sm:$0xff]  ;;  %v425_v53 = vadd.f32 %v424_v38, %v423_v16  ;;  %v180_v47 = vld [vmem:[%s7681_s0 + $0x530] sm:$0xff]  ;;  %v405_v8 = vadd.f32 %v404_v39, %v145_v41  ;;  %v151_v16 = vld [vmem:[%s7681_s0 + $0x448] sm:$0xff] }
  0x37   :  { %v455_v32 = vadd.f32 %v183_v61, %v182_v3  ;;  %v217_v10 = vld [vmem:[%s7681_s0 + $0x658] sm:$0xff]  ;;  %v218_v24 = vld [vmem:[%s7681_s0 + $0x660] sm:$0xff]  ;;  %v184_v39 = vld [vmem:[%s7681_s0 + $0x550] sm:$0xff]  ;;  %v431_v41 = vadd.f32 %v430_v51, %v165_v58  ;;  %v475_v54 = vadd.f32 %v474_v63, %v199_v62 }
  0x38   :  { %v387_v55 = vadd.f32 %v386_v34, %v131_v15  ;;  %v411_v15 = vadd.f32 %v410_v46, %v149_v43  ;;  %v181_v33 = vld [vmem:[%s7681_s0 + $0x538] sm:$0xff]  ;;  %v450_v34 = vadd.f32 %v449_v50, %v180_v47  ;;  %v166_v28 = vld [vmem:[%s7681_s0 + $0x4c0] sm:$0xff]  ;;  %v152_v37 = vld [vmem:[%s7681_s0 + $0x450] sm:$0xff]  ;;  %v407_v3 = vadd.f32 %v406_v31, %v405_v8 }
  0x39   :  { %v168_v43 = vld [vmem:[%s7681_s0 + $0x4d0] sm:$0xff]  ;;  %v153_v46 = vld [vmem:[%s7681_s0 + $0x458] sm:$0xff]  ;;  %v451_v61 = vsel %vm243_vm0, %v181_v33, 0.0  ;;  %v456_v58 = vadd.f32 %v455_v32, %v184_v39  ;;  %v219_v51 = vld [vmem:[%s7681_s0 + $0x668] sm:$0xff]  ;;  %v432_v33 = vadd.f32 %v431_v41, %v166_v28 }
  0x3a   :  { %381 = vadd.xlane.f32.xlu0 %v380_v22  ;;  %v389_v22 = vadd.f32 %v388_v56, %v387_v55  ;;  %v412_v38 = vadd.f32 %v411_v15, %v150_v57  ;;  %v500_v55 = vadd.f32 %v218_v24, %v217_v10  ;;  %v169_v56 = vld [vmem:[%s7681_s0 + $0x4d8] sm:$0xff]  ;;  %v170_v57 = vld [vmem:[%s7681_s0 + $0x4e0] sm:$0xff]  ;;  %v171_v15 = vld [vmem:[%s7681_s0 + $0x4e8] sm:$0xff]  ;;  %v415_v10 = vsel %vm243_vm0, %v153_v46, 0.0 }
  0x3b   :  { %v185_v47 = vld [vmem:[%s7681_s0 + $0x558] sm:$0xff]  ;;  %v437_v62 = vadd.f32 %v169_v56, %v168_v43  ;;  %v203_v8 = vld [vmem:[%s7681_s0 + $0x5e8] sm:$0xff]  ;;  %v452_v31 = vadd.f32 %v451_v61, %v450_v34  ;;  %v172_v39 = vld [vmem:[%s7681_s0 + $0x4f0] sm:$0xff] }
  0x3c   :  { %v413_v50 = vadd.f32 %v412_v38, %v151_v16  ;;  %v204_v16 = vld [vmem:[%s7681_s0 + $0x5f0] sm:$0xff]  ;;  %v167_v32 = vld [vmem:[%s7681_s0 + $0x4c8] sm:$0xff]  ;;  %v501_v38 = vadd.f32 %v500_v55, %v219_v51  ;;  %v190_v43 = vld [vmem:[%s7681_s0 + $0x580] sm:$0xff]  ;;  %v457_v28 = vadd.f32 %v456_v58, %v185_v47 }
  0x3d   :  { %v438_v24 = vadd.f32 %v437_v62, %v170_v57  ;;  %v201_v34 = vld [vmem:[%s7681_s0 + $0x5d8] sm:$0xff]  ;;  %v220_v41 = vld [vmem:[%s7681_s0 + $0x670] sm:$0xff]  ;;  %v482_v46 = vadd.f32 %v204_v16, %v203_v8  ;;  %v433_v56 = vsel %vm243_vm0, %v167_v32, 0.0  ;;  %v202_v57 = vld [vmem:[%s7681_s0 + $0x5e0] sm:$0xff] }
  0x3e   :  { %426 = vadd.xlane.f32.xlu2 %v425_v53  ;;  %v200_v53 = vld [vmem:[%s7681_s0 + $0x5d0] sm:$0xff]  ;;  %390 = vadd.xlane.f32.xlu1 %v389_v22  ;;  %v414_v63 = vadd.f32 %v413_v50, %v152_v37  ;;  %v189_v37 = vld [vmem:[%s7681_s0 + $0x578] sm:$0xff]  ;;  %v191_v50 = vld [vmem:[%s7681_s0 + $0x588] sm:$0xff]  ;;  %v502_v8 = vadd.f32 %v501_v38, %v220_v41  ;;  %v434_v32 = vadd.f32 %v433_v56, %v432_v33 }
  0x3f   :  { %v476_v22 = vadd.f32 %v475_v54, %v200_v53  ;;  %v439_v54 = vadd.f32 %v438_v24, %v171_v15  ;;  %v464_v55 = vadd.f32 %v190_v43, %v189_v37  ;;  %v186_v61 = vld [vmem:[%s7681_s0 + $0x560] sm:$0xff]  ;;  %v205_v53 = vld [vmem:[%s7681_s0 + $0x5f8] sm:$0xff]  ;;  %v192_v51 = vld [vmem:[%s7681_s0 + $0x590] sm:$0xff] }
  0x40   :  { %v173_v47 = vld [vmem:[%s7681_s0 + $0x4f8] sm:$0xff]  ;;  %v187_v15 = vld [vmem:[%s7681_s0 + $0x568] sm:$0xff]  ;;  %v174_v16 = vld [vmem:[%s7681_s0 + $0x500] sm:$0xff]  ;;  %v458_v24 = vadd.f32 %v457_v28, %v186_v61  ;;  %v483_v37 = vadd.f32 %v482_v46, %v205_v53 }
  0x41   :  { %v440_v58 = vadd.f32 %v439_v54, %v172_v39  ;;  %v465_v62 = vadd.f32 %v464_v55, %v191_v50  ;;  %v221_v39 = vld [vmem:[%s7681_s0 + $0x678] sm:$0xff]  ;;  %v206_v33 = vld [vmem:[%s7681_s0 + $0x600] sm:$0xff]  ;;  %v188_v54 = vld [vmem:[%s7681_s0 + $0x570] sm:$0xff]  ;;  %v442_v46 = vsel %vm243_vm0, %v174_v16, 0.0 }
  0x42   :  { %408 = vadd.xlane.f32.xlu0 %v407_v3  ;;  %v416_v3 = vadd.f32 %v415_v10, %v414_v63  ;;  %v477_v63 = vadd.f32 %v476_v22, %v201_v34  ;;  %v478_v10 = vsel %vm243_vm0, %v202_v57, 0.0  ;;  %v211_v22 = vld [vmem:[%s7681_s0 + $0x628] sm:$0xff]  ;;  %v224_v34 = vld [vmem:[%s7681_s0 + $0x690] sm:$0xff]  ;;  %v225_v28 = vld [vmem:[%s7681_s0 + $0x698] sm:$0xff]  ;;  %v503_v57 = vadd.f32 %v502_v8, %v221_v39 }
  0x43   :  { %v441_v38 = vadd.f32 %v440_v58, %v173_v47  ;;  %v466_v43 = vadd.f32 %v465_v62, %v192_v51  ;;  %v193_v50 = vld [vmem:[%s7681_s0 + $0x598] sm:$0xff]  ;;  %v212_v55 = vld [vmem:[%s7681_s0 + $0x630] sm:$0xff]  ;;  %v222_v61 = vld [vmem:[%s7681_s0 + $0x680] sm:$0xff]  ;;  %v484_v47 = vadd.f32 %v483_v37, %v206_v33  ;;  %v509_v58 = vadd.f32 %v225_v28, %v224_v34 }
  0x44   :  { %v479_v56 = vadd.f32 %v478_v10, %v477_v63  ;;  %v223_v53 = vld [vmem:[%s7681_s0 + $0x688] sm:$0xff]  ;;  %v460_v51 = vsel %vm243_vm0, %v188_v54, 0.0  ;;  %v226_v16 = vld [vmem:[%s7681_s0 + $0x6a0] sm:$0xff]  ;;  %v213_v10 = vld [vmem:[%s7681_s0 + $0x638] sm:$0xff]  ;;  %v504_v37 = vadd.f32 %v503_v57, %v222_v61 }
  0x45   :  { %v443_v62 = vadd.f32 %v442_v46, %v441_v38  ;;  %v207_v63 = vld [vmem:[%s7681_s0 + $0x608] sm:$0xff]  ;;  %v467_v8 = vadd.f32 %v466_v43, %v193_v50  ;;  %v232_v39 = vld [vmem:[%s7681_s0 + $0x6d0] sm:$0xff]  ;;  %v505_v38 = vsel %vm243_vm0, %v223_v53, 0.0  ;;  %v510_v43 = vadd.f32 %v509_v58, %v226_v16  ;;  %v209_v50 = vld [vmem:[%s7681_s0 + $0x618] sm:$0xff] }
  0x46   :  { %453 = vadd.xlane.f32.xlu2 %v452_v31  ;;  %v210_v31 = vld [vmem:[%s7681_s0 + $0x620] sm:$0xff]  ;;  %417 = vadd.xlane.f32.xlu1 %v416_v3  ;;  %v459_v3 = vadd.f32 %v458_v24, %v187_v15  ;;  %v231_v24 = vld [vmem:[%s7681_s0 + $0x6c8] sm:$0xff]  ;;  %v485_v33 = vadd.f32 %v484_v47, %v207_v63  ;;  %v208_v34 = vld [vmem:[%s7681_s0 + $0x610] sm:$0xff]  ;;  %v487_v47 = vsel %vm243_vm0, %v209_v50, 0.0 }
  0x47   :  { %v491_v41 = vadd.f32 %v211_v22, %v210_v31  ;;  %v194_v15 = vld [vmem:[%s7681_s0 + $0x5a0] sm:$0xff]  ;;  %v195_v31 = vld [vmem:[%s7681_s0 + $0x5a8] sm:$0xff]  ;;  %v518_v46 = vadd.f32 %v232_v39, %v231_v24  ;;  %v233_v57 = vld [vmem:[%s7681_s0 + $0x6d8] sm:$0xff] }
  0x48   :  { %v461_v22 = vadd.f32 %v460_v51, %v459_v3  ;;  %v468_v28 = vadd.f32 %v467_v8, %v194_v15  ;;  %v506_v3 = vadd.f32 %v505_v38, %v504_v37  ;;  %v486_v61 = vadd.f32 %v485_v33, %v208_v34  ;;  %v228_v51 = vld [vmem:[%s7681_s0 + $0x6b0] sm:$0xff]  ;;  %v215_v15 = vld [vmem:[%s7681_s0 + $0x648] sm:$0xff]  ;;  %v234_v8 = vld [vmem:[%s7681_s0 + $0x6e0] sm:$0xff] }
  0x49   :  { %v519_v63 = vadd.f32 %v518_v46, %v233_v57  ;;  %v216_v16 = vld [vmem:[%s7681_s0 + $0x650] sm:$0xff]  ;;  %v229_v24 = vld [vmem:[%s7681_s0 + $0x6b8] sm:$0xff]  ;;  %v235_v38 = vld [vmem:[%s7681_s0 + $0x6e8] sm:$0xff] }
  0x4a   :  { %435 = vadd.xlane.f32.xlu0 %v434_v32  ;;  %v492_v32 = vadd.f32 %v491_v41, %v212_v55  ;;  %v227_v41 = vld [vmem:[%s7681_s0 + $0x6a8] sm:$0xff]  ;;  %v469_v55 = vsel %vm243_vm0, %v195_v31, 0.0  ;;  %v230_v31 = vld [vmem:[%s7681_s0 + $0x6c0] sm:$0xff] }
  0x4b   :  { %v511_v53 = vadd.f32 %v510_v43, %v227_v41  ;;  %v470_v58 = vadd.f32 %v469_v55, %v468_v28  ;;  %v520_v37 = vadd.f32 %v519_v63, %v234_v8  ;;  %v514_v43 = vsel %vm243_vm0, %v230_v31, 0.0  ;;  %v236_v41 = vld [vmem:[%s7681_s0 + $0x6f0] sm:$0xff] }
  0x4c   :  { %v493_v54 = vadd.f32 %v492_v32, %v213_v10  ;;  %v488_v32 = vadd.f32 %v487_v47, %v486_v61 }
  0x4d   :  { %v512_v10 = vadd.f32 %v511_v53, %v228_v51  ;;  %v521_v28 = vadd.f32 %v520_v37, %v235_v38 }
  0x4e   :  { %480 = vadd.xlane.f32.xlu2 %v479_v56  ;;  %444 = vadd.xlane.f32.xlu1 %v443_v62  ;;  %v214_v56 = vld [vmem:[%s7681_s0 + $0x640] sm:$0xff] }
  0x4f   :  { %v494_v62 = vadd.f32 %v493_v54, %v214_v56  ;;  %v513_v33 = vadd.f32 %v512_v10, %v229_v24  ;;  %v237_v54 = vld [vmem:[%s7681_s0 + $0x6f8] sm:$0xff]  ;;  %v522_v50 = vadd.f32 %v521_v28, %v236_v41 }
  0x50   :  { %v523_v55 = vsel %vm243_vm0, %v237_v54, 0.0 }
  0x51   :  { %v495_v39 = vadd.f32 %v494_v62, %v215_v15  ;;  %v515_v46 = vadd.f32 %v514_v43, %v513_v33  ;;  %v524_v56 = vadd.f32 %v523_v55, %v522_v50 }
  0x52   :  { %462 = vadd.xlane.f32.xlu0 %v461_v22  ;;  %v496_v22 = vsel %vm243_vm0, %v216_v16, 0.0 }
  0x53   :  { %v497_v34 = vadd.f32 %v496_v22, %v495_v39 }
  0x56   :  { %507 = vadd.xlane.f32.xlu2 %v506_v3  ;;  %471 = vadd.xlane.f32.xlu1 %v470_v58 }
  0x5a   :  { %489 = vadd.xlane.f32.xlu0 %v488_v32 }
  0x5e   :  { %498 = vadd.xlane.f32.xlu1 %v497_v34 }
  0x62   :  { %516 = vadd.xlane.f32.xlu0 %v515_v46 }
  0x66   :  { %525 = vadd.xlane.f32.xlu1 %v524_v56 }
  0x81   :  { %v283_v57 = vpop.xlane.xlu2 %282 }
  0x82   :  { %v531_v3 = vmul.f32 0.0012755102, %v283_v57 }
  0x83   :  { %v265_v61 = vpop.xlane.xlu1 %264 }
  0x84   :  { %v529_v53 = vmul.f32 0.0012755102, %v265_v61  ;;  %v4081_v47 = vsub.f32 %v3277_v0, %v531_v3  ;;  %v4084_v58 = vsub.f32 %v3282_v1, %v531_v3  ;;  %v4087_v51 = vsub.f32 %v3287_v2, %v531_v3 }
  0x85   :  { %v4090_v62 = vsub.f32 %v3294_v4, %v531_v3  ;;  %v247_v63 = vpop.xlane.xlu0 %246  ;;  %v4111_v32 = vsub.f32 %v3309_v7, %v531_v3 }
  0x86   :  { %7885 = vst [vmem:[#allocation2_spill] sm:$0xff] %v4081_v47  ;;  %v4093_v15 = vsub.f32 %v3299_v5, %v529_v53  ;;  %v4096_v8 = vsub.f32 %v3304_v6, %v529_v53  ;;  %v4099_v16 = vsub.f32 %v3315_v9, %v529_v53  ;;  %v4102_v0 = vsub.f32 %v3327_v12, %v529_v53 }
  0x87   :  { %7886 = vst [vmem:[#allocation3_spill] sm:$0xff] %v4084_v58  ;;  %v527_v1 = vmul.f32 0.0012755102, %v247_v63  ;;  %v4105_v2 = vsub.f32 %v3354_v19, %v529_v53  ;;  %v4108_v4 = vsub.f32 %v3359_v20, %v529_v53  ;;  %v4120_v12 = vsub.f32 %v3322_v11, %v531_v3 }
  0x88   :  { %7887 = vst [vmem:[#allocation4_spill] sm:$0xff] %v4087_v51  ;;  %v797_v5 = vmul.f32 %v4093_v15, %v4093_v15  ;;  %v798_v6 = vmul.f32 %v4096_v8, %v4096_v8  ;;  %v799_v9 = vmul.f32 %v4099_v16, %v4099_v16  ;;  %v4123_v10 = vsub.f32 %v3390_v29, %v529_v53 }
  0x89   :  { %7888 = vst [vmem:[#allocation5_spill] sm:$0xff] %v4090_v62  ;;  %v292_v19 = vpop.xlane.xlu2 %291  ;;  %v800_v7 = vmul.f32 %v4102_v0, %v4102_v0  ;;  %v803_v20 = vmul.f32 %v4108_v4, %v4108_v4  ;;  %v4130_v24 = vsub.f32 %v3332_v13, %v527_v1  ;;  %v4133_v31 = vsub.f32 %v3344_v17, %v527_v1 }
  0x8a   :  { %7889 = vst [vmem:[#allocation6_spill] sm:$0xff] %v4093_v15  ;;  %v532_v39 = vmul.f32 0.0012755102, %v292_v19  ;;  %v1025_v37 = vadd.f32 %v798_v6, %v797_v5  ;;  %v4136_v11 = vsub.f32 %v3349_v18, %v527_v1  ;;  %v801_v29 = vmul.f32 %v4105_v2, %v4105_v2 }
  0x8b   :  { %7890 = vst [vmem:[#allocation7_spill] sm:$0xff] %v4096_v8  ;;  %v274_v22 = vpop.xlane.xlu1 %273  ;;  %v4141_v38 = vsub.f32 %v3364_v21, %v527_v1  ;;  %v4144_v33 = vsub.f32 %v3395_v30, %v527_v1  ;;  %v4147_v13 = vsub.f32 %v3337_v14, %v531_v3  ;;  %v4150_v17 = vsub.f32 %v3405_v35, %v527_v1 }
  0x8c   :  { %7891 = vst [vmem:[#allocation8_spill] sm:$0xff] %v4099_v16  ;;  %v1026_v43 = vadd.f32 %v1025_v37, %v799_v9  ;;  %v4153_v18 = vsub.f32 %v3423_v40, %v527_v1  ;;  %v783_v34 = vmul.f32 %v4130_v24, %v4130_v24  ;;  %v530_v28 = vmul.f32 0.0012755102, %v274_v22 }
  0x8d   :  { %7892 = vst [vmem:[#allocation9_spill] sm:$0xff] %v4102_v0  ;;  %v802_v21 = vmul.f32 %v4123_v10, %v4123_v10  ;;  %v1030_v30 = vsel %vm243_vm0, %v803_v20, 0.0  ;;  %v784_v14 = vmul.f32 %v4133_v31, %v4133_v31  ;;  %v256_v41 = vpop.xlane.xlu0 %255  ;;  %v785_v35 = vmul.f32 %v4136_v11, %v4136_v11 }
  0x8e   :  { %7893 = vst [vmem:[#allocation10_spill] sm:$0xff] %v4105_v2  ;;  %v1027_v54 = vadd.f32 %v1026_v43, %v800_v7  ;;  %v786_v40 = vmul.f32 %v4141_v38, %v4141_v38  ;;  %v4167_v46 = vsub.f32 %v3373_v25, %v532_v39  ;;  %v789_v50 = vmul.f32 %v4153_v18, %v4153_v18 }
  0x8f   :  { %7894 = vst [vmem:[#allocation11_spill] sm:$0xff] %v4108_v4  ;;  %v1007_v55 = vadd.f32 %v784_v14, %v783_v34  ;;  %v4172_v56 = vsub.f32 %v3378_v26, %v532_v39  ;;  %v4175_v57 = vsub.f32 %v3383_v27, %v532_v39  ;;  %v787_v61 = vmul.f32 %v4144_v33, %v4144_v33  ;;  %v3064_v34 = vld [vmem:[%s7681_s0 + $0xb0] sm:$0xff] }
  0x90   :  { %7895 = vst [vmem:[#allocation12_spill] sm:$0xff] %v4111_v32  ;;  %v1028_v3 = vadd.f32 %v1027_v54, %v801_v29  ;;  %v788_v53 = vmul.f32 %v4150_v17, %v4150_v17  ;;  %v4182_v25 = vsub.f32 %v3410_v36, %v532_v39  ;;  %v4185_v5 = vsub.f32 %v3429_v42, %v532_v39 }
  0x91   :  { %7896 = vst [vmem:[#allocation13_spill] sm:$0xff] %v4120_v12  ;;  %v319_v63 = vpop.xlane.xlu2 %318  ;;  %v1008_v1 = vadd.f32 %v1007_v55, %v785_v35  ;;  %v4188_v26 = vsub.f32 %v3455_v52, %v532_v39  ;;  %v818_v27 = vmul.f32 %v4167_v46, %v4167_v46  ;;  %v4193_v9 = vsub.f32 %v3441_v48, %v532_v39  ;;  %v3063_v48 = vld [vmem:[%s7681_s0 + $0xa8] sm:$0xff] }
  0x92   :  { %7897 = vst [vmem:[#allocation14_spill] sm:$0xff] %v4123_v10  ;;  %v1029_v6 = vadd.f32 %v1028_v3, %v802_v21  ;;  %v819_v19 = vmul.f32 %v4172_v56, %v4172_v56  ;;  %v820_v36 = vmul.f32 %v4175_v57, %v4175_v57  ;;  %v528_v7 = vmul.f32 0.0012755102, %v256_v41 }
  0x93   :  { %7898 = vst [vmem:[#allocation15_spill] sm:$0xff] %v4147_v13  ;;  %v1009_v20 = vadd.f32 %v1008_v1, %v786_v40  ;;  %v1012_v42 = vsel %vm243_vm0, %v789_v50, 0.0  ;;  %v821_v52 = vmul.f32 %v4182_v25, %v4182_v25  ;;  %v824_v22 = vmul.f32 %v4188_v26, %v4188_v26 }
  0x94   :  { %7899 = vst [vmem:[#allocation16_spill] sm:$0xff] %v4182_v25  ;;  %v1031_v37 = vadd.f32 %v1030_v30, %v1029_v6  ;;  %v1052_v29 = vadd.f32 %v819_v19, %v818_v27  ;;  %v4207_v39 = vsub.f32 %v3063_v48, %v530_v28  ;;  %v4212_v21 = vsub.f32 %v3064_v34, %v530_v28 }
  0x95   :  { %7900 = vst [vmem:[#allocation17_spill] sm:$0xff] %v4185_v5  ;;  %v1010_v43 = vadd.f32 %v1009_v20, %v787_v61  ;;  %v4215_v14 = vsub.f32 %v3435_v44, %v530_v28  ;;  %v4218_v30 = vsub.f32 %v3446_v49, %v530_v28  ;;  %v4220_v41 = vmul.f32 0.0012755102, %v319_v63  ;;  %v301_v54 = vpop.xlane.xlu0 %300  ;;  %v3065_v20 = vld [vmem:[%s7681_s0 + $0x38] sm:$0xff] }
  0x96   :  { %7901 = vst [vmem:[#allocation18_spill] sm:$0xff] %v4188_v26  ;;  %1032 = vadd.xlane.f32.xlu1 %v1031_v37  ;;  %v822_v35 = vmul.f32 %v4185_v5, %v4185_v5  ;;  %v823_v40 = vmul.f32 %v4193_v9, %v4193_v9  ;;  %v1053_v50 = vadd.f32 %v1052_v29, %v820_v36  ;;  %v3066_v37 = vld [vmem:[%s7681_s0 + $0x40] sm:$0xff]  ;;  %v3067_v29 = vld [vmem:[%s7681_s0 + $0x48] sm:$0xff] }
  0x97   :  { %7902 = vst [vmem:[#allocation19_spill] sm:$0xff] %v4193_v9  ;;  %v1011_v55 = vadd.f32 %v1010_v43, %v788_v53  ;;  %v4227_v3 = vsub.f32 %v3470_v59, %v530_v28  ;;  %v4230_v44 = vsub.f32 %v3475_v60, %v530_v28  ;;  %v804_v49 = vmul.f32 %v4207_v39, %v4207_v39  ;;  %v3068_v43 = vld [vmem:[%s7681_s0 + $0x50] sm:$0xff] }
  0x98   :  { %v1054_v61 = vadd.f32 %v1053_v50, %v821_v52  ;;  %v4235_v63 = vsub.f32 %v3497_v23, %v530_v28  ;;  %v805_v1 = vmul.f32 %v4212_v21, %v4212_v21  ;;  %v806_v27 = vmul.f32 %v4215_v14, %v4215_v14 }
  0x99   :  { %v4241_v53 = vmul.f32 0.0012755102, %v301_v54  ;;  %v1013_v59 = vadd.f32 %v1012_v42, %v1011_v55  ;;  %v346_v6 = vpop.xlane.xlu2 %345  ;;  %v1057_v60 = vsel %vm243_vm0, %v824_v22, 0.0  ;;  %v807_v19 = vmul.f32 %v4218_v30, %v4218_v30  ;;  %v3069_v55 = vld [vmem:[%s7681_s0 + $0x58] sm:$0xff] }
  0x9a   :  { %v1055_v36 = vadd.f32 %v1054_v61, %v822_v35  ;;  %v810_v23 = vmul.f32 %v4230_v44, %v4230_v44  ;;  %v1034_v28 = vadd.f32 %v805_v1, %v804_v49  ;;  %v4251_v52 = vsub.f32 %v3065_v20, %v528_v7 }
  0x9b   :  { %1014 = vadd.xlane.f32.xlu2 %v1013_v59  ;;  %v808_v42 = vmul.f32 %v4227_v3, %v4227_v3  ;;  %v4258_v22 = vsub.f32 %v3066_v37, %v528_v7  ;;  %v4263_v48 = vsub.f32 %v3067_v29, %v528_v7  ;;  %v4268_v34 = vsub.f32 %v3068_v43, %v528_v7  ;;  %v3070_v37 = vld [vmem:[%s7681_s0 + $0x60] sm:$0xff] }
  0x9c   :  { %v1056_v54 = vadd.f32 %v1055_v36, %v823_v40  ;;  %v809_v35 = vmul.f32 %v4235_v63, %v4235_v63  ;;  %v1035_v50 = vadd.f32 %v1034_v28, %v806_v27  ;;  %v4275_v49 = vsub.f32 %v3069_v55, %v528_v7 }
  0x9d   :  { %v4277_v61 = vmul.f32 0.0012755102, %v346_v6  ;;  %v4280_v1 = vsub.f32 %v3521_v45, %v528_v7  ;;  %v790_v59 = vmul.f32 %v4251_v52, %v4251_v52  ;;  %v791_v40 = vmul.f32 %v4258_v22, %v4258_v22  ;;  %v328_v36 = vpop.xlane.xlu0 %327 }
  0x9e   :  { %v1058_v20 = vadd.f32 %v1057_v60, %v1056_v54  ;;  %v1036_v27 = vadd.f32 %v1035_v50, %v807_v19  ;;  %v1039_v28 = vsel %vm243_vm0, %v810_v23, 0.0  ;;  %v4290_v6 = vsub.f32 %v3070_v37, %v528_v7  ;;  %v3071_v7 = vld [vmem:[%s7681_s0 + $0x1c0] sm:$0xff]  ;;  %v3072_v54 = vld [vmem:[%s7681_s0 + $0x1c8] sm:$0xff]  ;;  %v3074_v37 = vld [vmem:[%s7681_s0 + $0x1d8] sm:$0xff] }
  0x9f   :  { %v792_v45 = vmul.f32 %v4263_v48, %v4263_v48  ;;  %v793_v29 = vmul.f32 %v4268_v34, %v4268_v34  ;;  %v794_v43 = vmul.f32 %v4275_v49, %v4275_v49  ;;  %v1016_v55 = vadd.f32 %v791_v40, %v790_v59  ;;  %v310_v40 = vpop.xlane.xlu1 %309 }
  0xa0   :  { %1059 = vadd.xlane.f32.xlu1 %v1058_v20  ;;  %v1037_v60 = vadd.f32 %v1036_v27, %v808_v42  ;;  %v796_v19 = vmul.f32 %v4280_v1, %v4280_v1  ;;  %v4304_v23 = vsub.f32 %v3071_v7, %v4220_v41  ;;  %v4310_v50 = vsub.f32 %v3072_v54, %v4220_v41  ;;  %v3073_v20 = vld [vmem:[%s7681_s0 + $0x1d0] sm:$0xff] }
  0xa1   :  { %v4312_v59 = vmul.f32 0.0012755102, %v328_v36  ;;  %v1017_v42 = vadd.f32 %v1016_v55, %v792_v45  ;;  %v4318_v27 = vsub.f32 %v3073_v20, %v4220_v41  ;;  %v4324_v7 = vsub.f32 %v3074_v37, %v4220_v41  ;;  %v3075_v45 = vld [vmem:[%s7681_s0 + $0x1e0] sm:$0xff]  ;;  %v3076_v20 = vld [vmem:[%s7681_s0 + $0x1e8] sm:$0xff]  ;;  %v373_v10 = vpop.xlane.xlu2 %372 }
  0xa2   :  { %7903 = vst [vmem:[#allocation20_spill] sm:$0xff] %v4304_v23  ;;  %v1038_v54 = vadd.f32 %v1037_v60, %v809_v35  ;;  %v795_v36 = vmul.f32 %v4290_v6, %v4290_v6  ;;  %v4332_v55 = vsub.f32 %v3075_v45, %v4220_v41  ;;  %v4338_v4 = vsub.f32 %v3076_v20, %v4220_v41  ;;  %v3077_v35 = vld [vmem:[%s7681_s0 + $0x1f0] sm:$0xff] }
  0xa3   :  { %7904 = vst [vmem:[#allocation21_spill] sm:$0xff] %v4310_v50  ;;  %v1018_v37 = vadd.f32 %v1017_v42, %v793_v29  ;;  %v4344_v60 = vsub.f32 %v3077_v35, %v4220_v41  ;;  %v839_v45 = vmul.f32 %v4304_v23, %v4304_v23  ;;  %v840_v2 = vmul.f32 %v4310_v50, %v4310_v50 }
  0xa4   :  { %7905 = vst [vmem:[#allocation22_spill] sm:$0xff] %v4318_v27  ;;  %v1040_v0 = vadd.f32 %v1039_v28, %v1038_v54  ;;  %v1021_v16 = vsel %vm243_vm0, %v796_v19, 0.0  ;;  %v4351_v20 = vmul.f32 0.0012755102, %v310_v40  ;;  %v841_v29 = vmul.f32 %v4318_v27, %v4318_v27 }
  0xa5   :  { %7906 = vst [vmem:[#allocation23_spill] sm:$0xff] %v4324_v7  ;;  %v1019_v42 = vadd.f32 %v1018_v37, %v794_v43  ;;  %v842_v8 = vmul.f32 %v4324_v7, %v4324_v7  ;;  %v845_v41 = vmul.f32 %v4344_v60, %v4344_v60  ;;  %v1079_v35 = vadd.f32 %v840_v2, %v839_v45 }
  0xa6   :  { %7907 = vst [vmem:[#allocation24_spill] sm:$0xff] %v4332_v55  ;;  %1041 = vadd.xlane.f32.xlu2 %v1040_v0  ;;  %v843_v50 = vmul.f32 %v4332_v55, %v4332_v55  ;;  %v811_v28 = vmul.f32 %v4081_v47, %v4081_v47  ;;  %v812_v19 = vmul.f32 %v4084_v58, %v4084_v58  ;;  %v4426_v23 = vmul.f32 0.0012755102, %v373_v10 }
  0xa7   :  { %7908 = vst [vmem:[#allocation25_spill] sm:$0xff] %v4338_v4  ;;  %v813_v43 = vmul.f32 %v4087_v51, %v4087_v51  ;;  %v1020_v40 = vadd.f32 %v1019_v42, %v795_v36  ;;  %v844_v54 = vmul.f32 %v4338_v4, %v4338_v4  ;;  %v1080_v37 = vadd.f32 %v1079_v35, %v841_v29  ;;  %v3078_v36 = vld [vmem:[%s7681_s0 + $0x150] sm:$0xff]  ;;  %v3079_v42 = vld [vmem:[%s7681_s0 + $0x158] sm:$0xff]  ;;  %v355_v35 = vpop.xlane.xlu0 %354 }
  0xa8   :  { %7909 = vst [vmem:[#allocation26_spill] sm:$0xff] %v4344_v60  ;;  %v814_v0 = vmul.f32 %v4090_v62, %v4090_v62  ;;  %v1084_v2 = vsel %vm243_vm0, %v845_v41, 0.0  ;;  %v815_v45 = vmul.f32 %v4111_v32, %v4111_v32  ;;  %v817_v60 = vmul.f32 %v4147_v13, %v4147_v13 }
  0xa9   :  { %v1043_v55 = vadd.f32 %v812_v19, %v811_v28  ;;  %v1022_v7 = vadd.f32 %v1021_v16, %v1020_v40  ;;  %v1081_v27 = vadd.f32 %v1080_v37, %v842_v8  ;;  %v4380_v29 = vsub.f32 %v3078_v36, %v4241_v53  ;;  %v3080_v8 = vld [vmem:[%s7681_s0 + $0x160] sm:$0xff]  ;;  %v3081_v40 = vld [vmem:[%s7681_s0 + $0x168] sm:$0xff]  ;;  %v400_v32 = vpop.xlane.xlu2 %399 }
  0xaa   :  { %v4386_v41 = vsub.f32 %v3079_v42, %v4241_v53  ;;  %v816_v28 = vmul.f32 %v4120_v12, %v4120_v12  ;;  %v4394_v19 = vsub.f32 %v3080_v8, %v4241_v53  ;;  %v4400_v37 = vsub.f32 %v3081_v40, %v4241_v53  ;;  %v3083_v42 = vld [vmem:[%s7681_s0 + $0x178] sm:$0xff]  ;;  %v3084_v40 = vld [vmem:[%s7681_s0 + $0x180] sm:$0xff] }
  0xab   :  { %7910 = vst [vmem:[#allocation27_spill] sm:$0xff] %v4380_v29  ;;  %v1044_v16 = vadd.f32 %v1043_v55, %v813_v43  ;;  %1023 = vadd.xlane.f32.xlu0 %v1022_v7  ;;  %v1082_v36 = vadd.f32 %v1081_v27, %v843_v50  ;;  %v3082_v55 = vld [vmem:[%s7681_s0 + $0x170] sm:$0xff]  ;;  %v4412_v8 = vsub.f32 %v3083_v42, %v4241_v53  ;;  %v4428_v42 = vmul.f32 0.0012755102, %v355_v35 }
  0xac   :  { %7911 = vst [vmem:[#allocation28_spill] sm:$0xff] %v4386_v41  ;;  %v4406_v43 = vsub.f32 %v3082_v55, %v4241_v53  ;;  %v4418_v50 = vsub.f32 %v3084_v40, %v4241_v53  ;;  %v825_v7 = vmul.f32 %v4380_v29, %v4380_v29  ;;  %v826_v55 = vmul.f32 %v4386_v41, %v4386_v41  ;;  %v337_v41 = vpop.xlane.xlu1 %336 }
  0xad   :  { %7912 = vst [vmem:[#allocation29_spill] sm:$0xff] %v4394_v19  ;;  %v1045_v27 = vadd.f32 %v1044_v16, %v814_v0  ;;  %v827_v4 = vmul.f32 %v4394_v19, %v4394_v19  ;;  %v1083_v13 = vadd.f32 %v1082_v36, %v844_v54  ;;  %v1048_v12 = vsel %vm243_vm0, %v817_v60, 0.0  ;;  %v3085_v60 = vld [vmem:[%s7681_s0 + $0x268] sm:$0xff] }
  0xae   :  { %7913 = vst [vmem:[#allocation30_spill] sm:$0xff] %v4400_v37  ;;  %v828_v0 = vmul.f32 %v4400_v37, %v4400_v37  ;;  %v829_v16 = vmul.f32 %v4406_v43, %v4406_v43  ;;  %v1061_v40 = vadd.f32 %v826_v55, %v825_v7  ;;  %v830_v10 = vmul.f32 %v4412_v8, %v4412_v8  ;;  %v3087_v55 = vld [vmem:[%s7681_s0 + $0x278] sm:$0xff] }
  0xaf   :  { %7914 = vst [vmem:[#allocation31_spill] sm:$0xff] %v4406_v43  ;;  %v1046_v53 = vadd.f32 %v1045_v27, %v815_v45  ;;  %v1085_v29 = vadd.f32 %v1084_v2, %v1083_v13  ;;  %v831_v35 = vmul.f32 %v4418_v50, %v4418_v50  ;;  %v4443_v54 = vsub.f32 %v3085_v60, %v4277_v61  ;;  %v3086_v13 = vld [vmem:[%s7681_s0 + $0x270] sm:$0xff] }
  0xb0   :  { %7915 = vst [vmem:[#allocation32_spill] sm:$0xff] %v4412_v8  ;;  %v1062_v36 = vadd.f32 %v1061_v40, %v827_v4  ;;  %v4445_v27 = vmul.f32 0.0012755102, %v400_v32  ;;  %v4451_v2 = vsub.f32 %v3086_v13, %v4277_v61  ;;  %v4453_v7 = vmul.f32 0.0012755102, %v337_v41  ;;  %v3088_v4 = vld [vmem:[%s7681_s0 + $0x280] sm:$0xff] }
  0xb1   :  { %7916 = vst [vmem:[#allocation33_spill] sm:$0xff] %v4418_v50  ;;  %v1047_v45 = vadd.f32 %v1046_v53, %v816_v28  ;;  %1086 = vadd.xlane.f32.xlu1 %v1085_v29  ;;  %v4459_v60 = vsub.f32 %v3087_v55, %v4277_v61  ;;  %v4465_v32 = vsub.f32 %v3088_v4, %v4277_v61  ;;  %v3089_v29 = vld [vmem:[%s7681_s0 + $0x288] sm:$0xff]  ;;  %v3090_v40 = vld [vmem:[%s7681_s0 + $0x298] sm:$0xff]  ;;  %v1066_v4 = vsel %vm243_vm0, %v831_v35, 0.0  ;;  %v3091_v50 = vld [vmem:[%s7681_s0 + $0x290] sm:$0xff] }
  0xb2   :  { %7917 = vst [vmem:[#allocation34_spill] sm:$0xff] %v4443_v54  ;;  %v4471_v41 = vsub.f32 %v3089_v29, %v4277_v61  ;;  %v1063_v53 = vadd.f32 %v1062_v36, %v828_v0  ;;  %v4477_v13 = vsub.f32 %v3090_v40, %v4277_v61  ;;  %v860_v55 = vmul.f32 %v4443_v54, %v4443_v54  ;;  %v3092_v40 = vld [vmem:[%s7681_s0 + $0x1f8] sm:$0xff] }
  0xb3   :  { %7918 = vst [vmem:[#allocation35_spill] sm:$0xff] %v4451_v2  ;;  %v1049_v28 = vadd.f32 %v1048_v12, %v1047_v45  ;;  %v4486_v29 = vsub.f32 %v3091_v50, %v4277_v61  ;;  %v861_v12 = vmul.f32 %v4451_v2, %v4451_v2  ;;  %v862_v0 = vmul.f32 %v4459_v60, %v4459_v60  ;;  %v382_v50 = vpop.xlane.xlu0 %381 }
  0xb4   :  { %7919 = vst [vmem:[#allocation36_spill] sm:$0xff] %v4459_v60  ;;  %v1064_v45 = vadd.f32 %v1063_v53, %v829_v16  ;;  %v863_v36 = vmul.f32 %v4465_v32, %v4465_v32  ;;  %v866_v35 = vmul.f32 %v4477_v13, %v4477_v13  ;;  %v4500_v61 = vsub.f32 %v3092_v40, %v4312_v59  ;;  %v3094_v53 = vld [vmem:[%s7681_s0 + $0x208] sm:$0xff]  ;;  %v3095_v40 = vld [vmem:[%s7681_s0 + $0x210] sm:$0xff] }
  0xb5   :  { %7920 = vst [vmem:[#allocation37_spill] sm:$0xff] %v4465_v32  ;;  %1050 = vadd.xlane.f32.xlu0 %v1049_v28  ;;  %v1106_v2 = vadd.f32 %v861_v12, %v860_v55  ;;  %v3093_v28 = vld [vmem:[%s7681_s0 + $0x200] sm:$0xff]  ;;  %v4518_v55 = vsub.f32 %v3095_v40, %v4312_v59  ;;  %v864_v32 = vmul.f32 %v4471_v41, %v4471_v41  ;;  %v4544_v43 = vmul.f32 0.0012755102, %v382_v50 }
  0xb6   :  { %7921 = vst [vmem:[#allocation38_spill] sm:$0xff] %v4471_v41  ;;  %v4506_v16 = vsub.f32 %v3093_v28, %v4312_v59  ;;  %v1065_v12 = vadd.f32 %v1064_v45, %v830_v10  ;;  %v3096_v28 = vld [vmem:[%s7681_s0 + $0x218] sm:$0xff]  ;;  %v3098_v10 = vld [vmem:[%s7681_s0 + $0x228] sm:$0xff]  ;;  %v846_v41 = vmul.f32 %v4500_v61, %v4500_v61 }
  0xb7   :  { %7922 = vst [vmem:[#allocation39_spill] sm:$0xff] %v4477_v13  ;;  %v4512_v13 = vsub.f32 %v3094_v53, %v4312_v59  ;;  %v4526_v60 = vsub.f32 %v3096_v28, %v4312_v59  ;;  %v3097_v53 = vld [vmem:[%s7681_s0 + $0x220] sm:$0xff]  ;;  %v1107_v40 = vadd.f32 %v1106_v2, %v862_v0  ;;  %v4538_v45 = vsub.f32 %v3098_v10, %v4312_v59  ;;  %v427_v0 = vpop.xlane.xlu2 %426 }
  0xb8   :  { %7923 = vst [vmem:[#allocation40_spill] sm:$0xff] %v4486_v29  ;;  %v4532_v54 = vsub.f32 %v3097_v53, %v4312_v59  ;;  %v847_v28 = vmul.f32 %v4506_v16, %v4506_v16  ;;  %v1067_v8 = vadd.f32 %v1066_v4, %v1065_v12  ;;  %v865_v53 = vmul.f32 %v4486_v29, %v4486_v29 }
  0xb9   :  { %7924 = vst [vmem:[#allocation41_spill] sm:$0xff] %v4500_v61  ;;  %v848_v2 = vmul.f32 %v4512_v13, %v4512_v13  ;;  %v1108_v37 = vadd.f32 %v1107_v40, %v863_v36  ;;  %v1111_v59 = vsel %vm243_vm0, %v866_v35, 0.0  ;;  %v849_v10 = vmul.f32 %v4518_v55, %v4518_v55  ;;  %v3099_v36 = vld [vmem:[%s7681_s0 + $0x310] sm:$0xff] }
  0xba   :  { %7925 = vst [vmem:[#allocation42_spill] sm:$0xff] %v4506_v16  ;;  %v1088_v61 = vadd.f32 %v847_v28, %v846_v41  ;;  %1068 = vadd.xlane.f32.xlu2 %v1067_v8  ;;  %v850_v4 = vmul.f32 %v4526_v60, %v4526_v60  ;;  %v851_v50 = vmul.f32 %v4532_v54, %v4532_v54  ;;  %v4565_v41 = vmul.f32 0.0012755102, %v427_v0  ;;  %v364_v8 = vpop.xlane.xlu1 %363  ;;  %v3100_v28 = vld [vmem:[%s7681_s0 + $0x318] sm:$0xff] }
  0xbb   :  { %7926 = vst [vmem:[#allocation43_spill] sm:$0xff] %v4512_v13  ;;  %v852_v12 = vmul.f32 %v4538_v45, %v4538_v45  ;;  %v4563_v35 = vsub.f32 %v3099_v36, %v4426_v23  ;;  %v1109_v40 = vadd.f32 %v1108_v37, %v864_v32  ;;  %v3102_v37 = vld [vmem:[%s7681_s0 + $0x328] sm:$0xff]  ;;  %v3104_v0 = vld [vmem:[%s7681_s0 + $0x338] sm:$0xff]  ;;  %v4606_v29 = vmul.f32 0.0012755102, %v364_v8 }
  0xbc   :  { %7927 = vst [vmem:[#allocation44_spill] sm:$0xff] %v4518_v55  ;;  %v1089_v55 = vadd.f32 %v1088_v61, %v848_v2  ;;  %v4583_v32 = vsub.f32 %v3102_v37, %v4426_v23  ;;  %v3103_v61 = vld [vmem:[%s7681_s0 + $0x330] sm:$0xff]  ;;  %v3105_v37 = vld [vmem:[%s7681_s0 + $0x340] sm:$0xff] }
  0xbd   :  { %7928 = vst [vmem:[#allocation45_spill] sm:$0xff] %v4526_v60  ;;  %v4589_v2 = vsub.f32 %v3103_v61, %v4426_v23  ;;  %v1110_v36 = vadd.f32 %v1109_v40, %v865_v53  ;;  %v4601_v13 = vsub.f32 %v3105_v37, %v4426_v23  ;;  %v881_v61 = vmul.f32 %v4563_v35, %v4563_v35 }
  0xbe   :  { %7929 = vst [vmem:[#allocation46_spill] sm:$0xff] %v4532_v54  ;;  %v4571_v54 = vsub.f32 %v3100_v28, %v4426_v23  ;;  %v1090_v28 = vadd.f32 %v1089_v55, %v849_v10  ;;  %v1093_v16 = vsel %vm243_vm0, %v852_v12, 0.0  ;;  %v884_v40 = vmul.f32 %v4583_v32, %v4583_v32  ;;  %v3106_v12 = vld [vmem:[%s7681_s0 + $0x188] sm:$0xff] }
  0xbf   :  { %7930 = vst [vmem:[#allocation47_spill] sm:$0xff] %v4538_v45  ;;  %v3101_v45 = vld [vmem:[%s7681_s0 + $0x320] sm:$0xff]  ;;  %v1112_v53 = vadd.f32 %v1111_v59, %v1110_v36  ;;  %v4620_v8 = vsub.f32 %v3106_v12, %v4351_v20 }
  0xc0   :  { %7931 = vst [vmem:[#allocation48_spill] sm:$0xff] %v4563_v35  ;;  %v4577_v60 = vsub.f32 %v3101_v45, %v4426_v23  ;;  %v4595_v45 = vsub.f32 %v3104_v0, %v4426_v23  ;;  %v882_v0 = vmul.f32 %v4571_v54, %v4571_v54  ;;  %v1091_v10 = vadd.f32 %v1090_v28, %v850_v4  ;;  %v3108_v4 = vld [vmem:[%s7681_s0 + $0x198] sm:$0xff] }
  0xc1   :  { %7932 = vst [vmem:[#allocation49_spill] sm:$0xff] %v4571_v54  ;;  %v887_v23 = vmul.f32 %v4601_v13, %v4601_v13  ;;  %v4632_v36 = vsub.f32 %v3108_v4, %v4351_v20  ;;  %1113 = vadd.xlane.f32.xlu1 %v1112_v53  ;;  %v3110_v4 = vld [vmem:[%s7681_s0 + $0x1a8] sm:$0xff]  ;;  %v3111_v53 = vld [vmem:[%s7681_s0 + $0x1b8] sm:$0xff] }
  0xc2   :  { %7933 = vst [vmem:[#allocation50_spill] sm:$0xff] %v4577_v60  ;;  %v883_v55 = vmul.f32 %v4577_v60, %v4577_v60  ;;  %v1133_v37 = vadd.f32 %v882_v0, %v881_v61  ;;  %v3107_v60 = vld [vmem:[%s7681_s0 + $0x190] sm:$0xff]  ;;  %v1092_v28 = vadd.f32 %v1091_v10, %v851_v50  ;;  %v885_v61 = vmul.f32 %v4589_v2, %v4589_v2 }
  0xc3   :  { %7934 = vst [vmem:[#allocation51_spill] sm:$0xff] %v4583_v32  ;;  %v4626_v59 = vsub.f32 %v3107_v60, %v4351_v20  ;;  %v886_v0 = vmul.f32 %v4595_v45, %v4595_v45  ;;  %v3109_v60 = vld [vmem:[%s7681_s0 + $0x1a0] sm:$0xff]  ;;  %v4648_v50 = vsub.f32 %v3110_v4, %v4351_v20  ;;  %v4654_v10 = vsub.f32 %v3111_v53, %v4351_v20  ;;  %v3112_v32 = vld [vmem:[%s7681_s0 + $0x1b0] sm:$0xff] }
  0xc4   :  { %7935 = vst [vmem:[#allocation52_spill] sm:$0xff] %v4589_v2  ;;  %v4642_v12 = vsub.f32 %v3109_v60, %v4351_v20  ;;  %v1094_v60 = vadd.f32 %v1093_v16, %v1092_v28  ;;  %v834_v4 = vmul.f32 %v4632_v36, %v4632_v36  ;;  %v4667_v53 = vsub.f32 %v3112_v32, %v4351_v20  ;;  %v3114_v20 = vld [vmem:[%s7681_s0 + $0x2a8] sm:$0xff] }
  0xc5   :  { %7936 = vst [vmem:[#allocation53_spill] sm:$0xff] %v4595_v45  ;;  %v832_v45 = vmul.f32 %v4620_v8, %v4620_v8  ;;  %v838_v16 = vmul.f32 %v4654_v10, %v4654_v10  ;;  %v4683_v32 = vsub.f32 %v3114_v20, %v4428_v42  ;;  %v836_v35 = vmul.f32 %v4648_v50, %v4648_v50  ;;  %v3117_v20 = vld [vmem:[%s7681_s0 + $0x2c0] sm:$0xff] }
  0xc6   :  { %7937 = vst [vmem:[#allocation54_spill] sm:$0xff] %v4601_v13  ;;  %v1134_v13 = vadd.f32 %v1133_v37, %v883_v55  ;;  %v1138_v55 = vsel %vm243_vm0, %v887_v23, 0.0  ;;  %v833_v37 = vmul.f32 %v4626_v59, %v4626_v59  ;;  %v835_v54 = vmul.f32 %v4642_v12, %v4642_v12  ;;  %1095 = vadd.xlane.f32.xlu2 %v1094_v60  ;;  %v409_v23 = vpop.xlane.xlu0 %408  ;;  %v3115_v60 = vld [vmem:[%s7681_s0 + $0x2b0] sm:$0xff] }
  0xc7   :  { %7938 = vst [vmem:[#allocation55_spill] sm:$0xff] %v4620_v8  ;;  %v837_v8 = vmul.f32 %v4667_v53, %v4667_v53 }
  0xc8   :  { %7939 = vst [vmem:[#allocation56_spill] sm:$0xff] %v4626_v59  ;;  %v1135_v2 = vadd.f32 %v1134_v13, %v884_v40  ;;  %v1070_v28 = vadd.f32 %v833_v37, %v832_v45  ;;  %v3113_v13 = vld [vmem:[%s7681_s0 + $0x2a0] sm:$0xff]  ;;  %v4689_v45 = vsub.f32 %v3115_v60, %v4428_v42  ;;  %v454_v59 = vpop.xlane.xlu2 %453 }
  0xc9   :  { %7940 = vst [vmem:[#allocation57_spill] sm:$0xff] %v4632_v36  ;;  %v4677_v40 = vsub.f32 %v3113_v13, %v4428_v42  ;;  %v3116_v13 = vld [vmem:[%s7681_s0 + $0x2b8] sm:$0xff]  ;;  %v4736_v62 = vmul.f32 0.0012755102, %v454_v59 }
  0xca   :  { %7941 = vst [vmem:[#allocation58_spill] sm:$0xff] %v4642_v12  ;;  %v1136_v37 = vadd.f32 %v1135_v2, %v885_v61  ;;  %v4703_v12 = vsub.f32 %v3117_v20, %v4428_v42  ;;  %v1071_v60 = vadd.f32 %v1070_v28, %v834_v4  ;;  %v3118_v2 = vld [vmem:[%s7681_s0 + $0x2c8] sm:$0xff]  ;;  %v4719_v20 = vmul.f32 0.0012755102, %v409_v23 }
  0xcb   :  { %7942 = vst [vmem:[#allocation59_spill] sm:$0xff] %v4648_v50  ;;  %v4709_v61 = vsub.f32 %v3118_v2, %v4428_v42  ;;  %v867_v36 = vmul.f32 %v4677_v40, %v4677_v40  ;;  %v868_v28 = vmul.f32 %v4683_v32, %v4683_v32  ;;  %v869_v2 = vmul.f32 %v4689_v45, %v4689_v45 }
  0xcc   :  { %7943 = vst [vmem:[#allocation60_spill] sm:$0xff] %v4654_v10  ;;  %v4697_v10 = vsub.f32 %v3116_v13, %v4428_v42  ;;  %v3119_v13 = vld [vmem:[%s7681_s0 + $0x2d0] sm:$0xff]  ;;  %v1137_v4 = vadd.f32 %v1136_v37, %v886_v0  ;;  %v1072_v19 = vadd.f32 %v1071_v60, %v835_v54  ;;  %v871_v0 = vmul.f32 %v4703_v12, %v4703_v12  ;;  %v3120_v54 = vld [vmem:[%s7681_s0 + $0x3b8] sm:$0xff]  ;;  %v391_v60 = vpop.xlane.xlu1 %390 }
  0xcd   :  { %7944 = vst [vmem:[#allocation61_spill] sm:$0xff] %v4667_v53  ;;  %v4715_v50 = vsub.f32 %v3119_v13, %v4428_v42  ;;  %v1075_v42 = vsel %vm243_vm0, %v838_v16, 0.0  ;;  %v872_v23 = vmul.f32 %v4709_v61, %v4709_v61  ;;  %v1115_v37 = vadd.f32 %v868_v28, %v867_v36  ;;  %v3121_v36 = vld [vmem:[%s7681_s0 + $0x3c0] sm:$0xff] }
  0xce   :  { %7945 = vst [vmem:[#allocation62_spill] sm:$0xff] %v4677_v40  ;;  %v870_v13 = vmul.f32 %v4697_v10, %v4697_v10  ;;  %v1139_v40 = vadd.f32 %v1138_v55, %v1137_v4  ;;  %v4742_v16 = vsub.f32 %v3120_v54, %v4445_v27  ;;  %v3125_v54 = vld [vmem:[%s7681_s0 + $0x3e0] sm:$0xff] }
  0xcf   :  { %7946 = vst [vmem:[#allocation63_spill] sm:$0xff] %v4683_v32  ;;  %v1073_v32 = vadd.f32 %v1072_v19, %v836_v35  ;;  %v1116_v55 = vadd.f32 %v1115_v37, %v869_v2  ;;  %v4748_v19 = vsub.f32 %v3121_v36, %v4445_v27  ;;  %v3122_v35 = vld [vmem:[%s7681_s0 + $0x3c8] sm:$0xff]  ;;  %v3124_v2 = vld [vmem:[%s7681_s0 + $0x3d8] sm:$0xff]  ;;  %v4772_v36 = vsub.f32 %v3125_v54, %v4445_v27 }
  0xd0   :  { %7947 = vst [vmem:[#allocation64_spill] sm:$0xff] %v4689_v45  ;;  %v873_v45 = vmul.f32 %v4715_v50, %v4715_v50  ;;  %1140 = vadd.xlane.f32.xlu1 %v1139_v40  ;;  %v4754_v59 = vsub.f32 %v3122_v35, %v4445_v27  ;;  %v3123_v40 = vld [vmem:[%s7681_s0 + $0x3d0] sm:$0xff]  ;;  %v4766_v37 = vsub.f32 %v3124_v2, %v4445_v27  ;;  %v3126_v35 = vld [vmem:[%s7681_s0 + $0x3e8] sm:$0xff] }
  0xd1   :  { %7948 = vst [vmem:[#allocation65_spill] sm:$0xff] %v4697_v10  ;;  %v4760_v4 = vsub.f32 %v3123_v40, %v4445_v27  ;;  %v1074_v28 = vadd.f32 %v1073_v32, %v837_v8  ;;  %v4778_v8 = vsub.f32 %v3126_v35, %v4445_v27  ;;  %v1117_v32 = vadd.f32 %v1116_v55, %v870_v13  ;;  %v3127_v35 = vld [vmem:[%s7681_s0 + $0x230] sm:$0xff] }
  0xd2   :  { %7949 = vst [vmem:[#allocation66_spill] sm:$0xff] %v4703_v12  ;;  %v902_v40 = vmul.f32 %v4742_v16, %v4742_v16  ;;  %v903_v2 = vmul.f32 %v4748_v19, %v4748_v19  ;;  %v1120_v54 = vsel %vm243_vm0, %v873_v45, 0.0  ;;  %v4787_v12 = vmul.f32 0.0012755102, %v391_v60  ;;  %v3129_v60 = vld [vmem:[%s7681_s0 + $0x240] sm:$0xff] }
  0xd3   :  { %7950 = vst [vmem:[#allocation67_spill] sm:$0xff] %v4709_v61  ;;  %v1076_v61 = vadd.f32 %v1075_v42, %v1074_v28  ;;  %v905_v10 = vmul.f32 %v4760_v4, %v4760_v4  ;;  %v1118_v27 = vadd.f32 %v1117_v32, %v871_v0  ;;  %v908_v13 = vmul.f32 %v4778_v8, %v4778_v8  ;;  %v3128_v42 = vld [vmem:[%s7681_s0 + $0x238] sm:$0xff] }
  0xd4   :  { %7951 = vst [vmem:[#allocation68_spill] sm:$0xff] %v4715_v50  ;;  %v904_v50 = vmul.f32 %v4754_v59, %v4754_v59  ;;  %v1160_v55 = vadd.f32 %v903_v2, %v902_v40  ;;  %v906_v45 = vmul.f32 %v4766_v37, %v4766_v37  ;;  %v4805_v0 = vsub.f32 %v3128_v42, %v4453_v7  ;;  %v3131_v42 = vld [vmem:[%s7681_s0 + $0x250] sm:$0xff] }
  0xd5   :  { %7952 = vst [vmem:[#allocation69_spill] sm:$0xff] %v4742_v16  ;;  %1077 = vadd.xlane.f32.xlu0 %v1076_v61  ;;  %v4811_v28 = vsub.f32 %v3129_v60, %v4453_v7  ;;  %v3130_v61 = vld [vmem:[%s7681_s0 + $0x248] sm:$0xff]  ;;  %v1119_v40 = vadd.f32 %v1118_v27, %v872_v23  ;;  %v907_v2 = vmul.f32 %v4772_v36, %v4772_v36  ;;  %v3132_v60 = vld [vmem:[%s7681_s0 + $0x260] sm:$0xff] }
  0xd6   :  { %7953 = vst [vmem:[#allocation70_spill] sm:$0xff] %v4748_v19  ;;  %v4797_v19 = vsub.f32 %v3127_v35, %v4453_v7  ;;  %v4817_v32 = vsub.f32 %v3130_v61, %v4453_v7  ;;  %v1161_v35 = vadd.f32 %v1160_v55, %v904_v50  ;;  %v854_v50 = vmul.f32 %v4805_v0, %v4805_v0 }
  0xd7   :  { %7954 = vst [vmem:[#allocation71_spill] sm:$0xff] %v4754_v59  ;;  %v855_v27 = vmul.f32 %v4811_v28, %v4811_v28  ;;  %v1121_v55 = vadd.f32 %v1120_v54, %v1119_v40 }
  0xd8   :  { %7955 = vst [vmem:[#allocation72_spill] sm:$0xff] %v4760_v4  ;;  %v853_v23 = vmul.f32 %v4797_v19, %v4797_v19  ;;  %v1162_v61 = vadd.f32 %v1161_v35, %v905_v10  ;;  %v856_v4 = vmul.f32 %v4817_v32, %v4817_v32  ;;  %v3134_v10 = vld [vmem:[%s7681_s0 + $0x348] sm:$0xff]  ;;  %v3136_v35 = vld [vmem:[%s7681_s0 + $0x358] sm:$0xff] }
  0xd9   :  { %7956 = vst [vmem:[#allocation73_spill] sm:$0xff] %v4766_v37  ;;  %v4831_v37 = vsub.f32 %v3132_v60, %v4453_v7  ;;  %v4854_v54 = vsub.f32 %v3134_v10, %v4544_v43  ;;  %1122 = vadd.xlane.f32.xlu2 %v1121_v55  ;;  %v3138_v10 = vld [vmem:[%s7681_s0 + $0x368] sm:$0xff] }
  0xda   :  { %7957 = vst [vmem:[#allocation74_spill] sm:$0xff] %v4772_v36  ;;  %v3133_v36 = vld [vmem:[%s7681_s0 + $0x258] sm:$0xff]  ;;  %v1097_v16 = vadd.f32 %v854_v50, %v853_v23  ;;  %v1163_v40 = vadd.f32 %v1162_v61, %v906_v45  ;;  %v4866_v23 = vsub.f32 %v3136_v35, %v4544_v43  ;;  %v3137_v50 = vld [vmem:[%s7681_s0 + $0x360] sm:$0xff]  ;;  %v3139_v35 = vld [vmem:[%s7681_s0 + $0x370] sm:$0xff] }
  0xdb   :  { %7958 = vst [vmem:[#allocation75_spill] sm:$0xff] %v4778_v8  ;;  %v4825_v8 = vsub.f32 %v3131_v42, %v4453_v7  ;;  %v1165_v42 = vsel %vm243_vm0, %v908_v13, 0.0  ;;  %v4844_v60 = vsub.f32 %v3133_v36, %v4453_v7  ;;  %v859_v59 = vmul.f32 %v4831_v37, %v4831_v37  ;;  %v436_v13 = vpop.xlane.xlu0 %435  ;;  %v3135_v7 = vld [vmem:[%s7681_s0 + $0x350] sm:$0xff] }
  0xdc   :  { %7959 = vst [vmem:[#allocation76_spill] sm:$0xff] %v4797_v19  ;;  %v4860_v36 = vsub.f32 %v3135_v7, %v4544_v43  ;;  %v4872_v45 = vsub.f32 %v3137_v50, %v4544_v43  ;;  %v1098_v61 = vadd.f32 %v1097_v16, %v855_v27  ;;  %v4880_v7 = vsub.f32 %v3138_v10, %v4544_v43 }
  0xdd   :  { %7960 = vst [vmem:[#allocation77_spill] sm:$0xff] %v4805_v0  ;;  %v857_v55 = vmul.f32 %v4825_v8, %v4825_v8  ;;  %v1164_v50 = vadd.f32 %v1163_v40, %v907_v2  ;;  %v888_v27 = vmul.f32 %v4854_v54, %v4854_v54  ;;  %v890_v2 = vmul.f32 %v4866_v23, %v4866_v23  ;;  %v481_v40 = vpop.xlane.xlu2 %480 }
  0xde   :  { %7961 = vst [vmem:[#allocation78_spill] sm:$0xff] %v4811_v28  ;;  %v889_v10 = vmul.f32 %v4860_v36, %v4860_v36  ;;  %v1099_v28 = vadd.f32 %v1098_v61, %v856_v4 }
  0xdf   :  { %7962 = vst [vmem:[#allocation79_spill] sm:$0xff] %v4817_v32  ;;  %v4898_v32 = vmul.f32 0.0012755102, %v436_v13  ;;  %v1166_v0 = vadd.f32 %v1165_v42, %v1164_v50  ;;  %v892_v13 = vmul.f32 %v4880_v7, %v4880_v7  ;;  %v418_v42 = vpop.xlane.xlu1 %417 }
  0xe0   :  { %7963 = vst [vmem:[#allocation80_spill] sm:$0xff] %v4825_v8  ;;  %v3140_v8 = vld [vmem:[%s7681_s0 + $0x378] sm:$0xff]  ;;  %v1100_v19 = vadd.f32 %v1099_v28, %v857_v55  ;;  %v3142_v55 = vld [vmem:[%s7681_s0 + $0x468] sm:$0xff] }
  0xe1   :  { %7964 = vst [vmem:[#allocation81_spill] sm:$0xff] %v4831_v37  ;;  %v4886_v37 = vsub.f32 %v3139_v35, %v4544_v43  ;;  %v4892_v16 = vsub.f32 %v3140_v8, %v4544_v43  ;;  %v858_v35 = vmul.f32 %v4844_v60, %v4844_v60  ;;  %v1102_v43 = vsel %vm243_vm0, %v859_v59, 0.0  ;;  %1167 = vadd.xlane.f32.xlu1 %v1166_v0  ;;  %v3141_v59 = vld [vmem:[%s7681_s0 + $0x460] sm:$0xff]  ;;  %v3143_v0 = vld [vmem:[%s7681_s0 + $0x470] sm:$0xff] }
  0xe2   :  { %7965 = vst [vmem:[#allocation82_spill] sm:$0xff] %v4844_v60  ;;  %v891_v8 = vmul.f32 %v4872_v45, %v4872_v45  ;;  %v4919_v28 = vsub.f32 %v3141_v59, %v4565_v41  ;;  %v4925_v50 = vsub.f32 %v3142_v55, %v4565_v41  ;;  %v3146_v59 = vld [vmem:[%s7681_s0 + $0x488] sm:$0xff] }
  0xe3   :  { %7966 = vst [vmem:[#allocation83_spill] sm:$0xff] %v4854_v54  ;;  %v1142_v54 = vadd.f32 %v889_v10, %v888_v27  ;;  %v894_v4 = vmul.f32 %v4892_v16, %v4892_v16  ;;  %v1101_v27 = vadd.f32 %v1100_v19, %v858_v35  ;;  %v3144_v10 = vld [vmem:[%s7681_s0 + $0x478] sm:$0xff]  ;;  %v4949_v55 = vsub.f32 %v3146_v59, %v4565_v41 }
  0xe4   :  { %7967 = vst [vmem:[#allocation84_spill] sm:$0xff] %v4860_v36  ;;  %v893_v36 = vmul.f32 %v4886_v37, %v4886_v37 }
  0xe5   :  { %7968 = vst [vmem:[#allocation85_spill] sm:$0xff] %v4866_v23  ;;  %v1143_v61 = vadd.f32 %v1142_v54, %v890_v2  ;;  %v4913_v23 = vmul.f32 0.0012755102, %v481_v40  ;;  %v4931_v54 = vsub.f32 %v3143_v0, %v4565_v41  ;;  %v4937_v2 = vsub.f32 %v3144_v10, %v4565_v41  ;;  %v3145_v40 = vld [vmem:[%s7681_s0 + $0x480] sm:$0xff]  ;;  %v3147_v0 = vld [vmem:[%s7681_s0 + $0x490] sm:$0xff] }
  0xe6   :  { %7969 = vst [vmem:[#allocation86_spill] sm:$0xff] %v4872_v45  ;;  %v4943_v19 = vsub.f32 %v3145_v40, %v4565_v41  ;;  %v4955_v10 = vsub.f32 %v3147_v0, %v4565_v41  ;;  %v1103_v40 = vadd.f32 %v1102_v43, %v1101_v27  ;;  %v3148_v43 = vld [vmem:[%s7681_s0 + $0x2d8] sm:$0xff]  ;;  %v3150_v27 = vld [vmem:[%s7681_s0 + $0x2e8] sm:$0xff] }
  0xe7   :  { %7970 = vst [vmem:[#allocation87_spill] sm:$0xff] %v4880_v7  ;;  %v1144_v35 = vadd.f32 %v1143_v61, %v891_v8  ;;  %v924_v8 = vmul.f32 %v4925_v50, %v4925_v50  ;;  %v925_v61 = vmul.f32 %v4931_v54, %v4931_v54  ;;  %v1147_v7 = vsel %vm243_vm0, %v894_v4, 0.0 }
  0xe8   :  { %7971 = vst [vmem:[#allocation88_spill] sm:$0xff] %v4886_v37  ;;  %v4959_v37 = vmul.f32 0.0012755102, %v418_v42  ;;  %v926_v45 = vmul.f32 %v4937_v2, %v4937_v2  ;;  %v929_v41 = vmul.f32 %v4955_v10, %v4955_v10  ;;  %1104 = vadd.xlane.f32.xlu0 %v1103_v40  ;;  %v4974_v42 = vsub.f32 %v3148_v43, %v4606_v29  ;;  %v3151_v43 = vld [vmem:[%s7681_s0 + $0x2f0] sm:$0xff] }
  0xe9   :  { %7972 = vst [vmem:[#allocation89_spill] sm:$0xff] %v4892_v16  ;;  %v923_v16 = vmul.f32 %v4919_v28, %v4919_v28  ;;  %v1145_v59 = vadd.f32 %v1144_v35, %v892_v13  ;;  %v3149_v13 = vld [vmem:[%s7681_s0 + $0x2e0] sm:$0xff]  ;;  %v927_v40 = vmul.f32 %v4943_v19, %v4943_v19 }
  0xea   :  { %7973 = vst [vmem:[#allocation90_spill] sm:$0xff] %v4919_v28  ;;  %v4980_v4 = vsub.f32 %v3149_v13, %v4606_v29  ;;  %v4996_v13 = vsub.f32 %v3151_v43, %v4606_v29 }
  0xeb   :  { %7974 = vst [vmem:[#allocation91_spill] sm:$0xff] %v4925_v50  ;;  %v1187_v0 = vadd.f32 %v924_v8, %v923_v16  ;;  %v4986_v16 = vsub.f32 %v3150_v27, %v4606_v29  ;;  %v1146_v35 = vadd.f32 %v1145_v59, %v893_v36  ;;  %v928_v8 = vmul.f32 %v4949_v55, %v4949_v55  ;;  %v3152_v27 = vld [vmem:[%s7681_s0 + $0x2f8] sm:$0xff]  ;;  %v3153_v59 = vld [vmem:[%s7681_s0 + $0x308] sm:$0xff] }
  0xec   :  { %7975 = vst [vmem:[#allocation92_spill] sm:$0xff] %v4931_v54  ;;  %v5002_v36 = vsub.f32 %v3152_v27, %v4606_v29  ;;  %v3154_v54 = vld [vmem:[%s7681_s0 + $0x300] sm:$0xff]  ;;  %v877_v50 = vmul.f32 %v4996_v13, %v4996_v13 }
  0xed   :  { %7976 = vst [vmem:[#allocation93_spill] sm:$0xff] %v4937_v2  ;;  %v1148_v43 = vadd.f32 %v1147_v7, %v1146_v35  ;;  %v876_v27 = vmul.f32 %v4986_v16, %v4986_v16 }
  0xee   :  { %7977 = vst [vmem:[#allocation94_spill] sm:$0xff] %v4943_v19  ;;  %v874_v19 = vmul.f32 %v4974_v42, %v4974_v42  ;;  %v878_v28 = vmul.f32 %v5002_v36, %v5002_v36 }
  0xef   :  { %7978 = vst [vmem:[#allocation95_spill] sm:$0xff] %v4949_v55  ;;  %v5008_v55 = vsub.f32 %v3153_v59, %v4606_v29  ;;  %v5021_v59 = vsub.f32 %v3154_v54, %v4606_v29  ;;  %1149 = vadd.xlane.f32.xlu2 %v1148_v43  ;;  %v3156_v29 = vld [vmem:[%s7681_s0 + $0x3f8] sm:$0xff]  ;;  %v3157_v43 = vld [vmem:[%s7681_s0 + $0x400] sm:$0xff] }
  0xf0   :  { %7979 = vst [vmem:[#allocation96_spill] sm:$0xff] %v4955_v10  ;;  %v1188_v10 = vadd.f32 %v1187_v0, %v925_v61  ;;  %v1192_v61 = vsel %vm243_vm0, %v929_v41, 0.0  ;;  %v875_v0 = vmul.f32 %v4980_v4, %v4980_v4  ;;  %v463_v41 = vpop.xlane.xlu0 %462  ;;  %v5037_v54 = vsub.f32 %v3156_v29, %v4719_v20  ;;  %v3159_v29 = vld [vmem:[%s7681_s0 + $0x410] sm:$0xff] }
  0xf1   :  { %7980 = vst [vmem:[#allocation97_spill] sm:$0xff] %v4974_v42  ;;  %v880_v7 = vmul.f32 %v5008_v55, %v5008_v55  ;;  %v879_v42 = vmul.f32 %v5021_v59, %v5021_v59 }
  0xf2   :  { %7981 = vst [vmem:[#allocation98_spill] sm:$0xff] %v4980_v4  ;;  %v1189_v2 = vadd.f32 %v1188_v10, %v926_v45  ;;  %v1124_v35 = vadd.f32 %v875_v0, %v874_v19  ;;  %v3155_v45 = vld [vmem:[%s7681_s0 + $0x3f0] sm:$0xff]  ;;  %v5043_v19 = vsub.f32 %v3157_v43, %v4719_v20  ;;  %v508_v4 = vpop.xlane.xlu2 %507 }
  0xf3   :  { %7982 = vst [vmem:[#allocation99_spill] sm:$0xff] %v4986_v16  ;;  %v5031_v10 = vsub.f32 %v3155_v45, %v4719_v20  ;;  %v3158_v45 = vld [vmem:[%s7681_s0 + $0x408] sm:$0xff]  ;;  %v5090_v53 = vmul.f32 0.0012755102, %v508_v4 }
  0xf4   :  { %7983 = vst [vmem:[#allocation100_spill] sm:$0xff] %v4996_v13  ;;  %v1190_v0 = vadd.f32 %v1189_v2, %v927_v40  ;;  %v5057_v13 = vsub.f32 %v3159_v29, %v4719_v20  ;;  %v1125_v43 = vadd.f32 %v1124_v35, %v876_v27  ;;  %v3160_v2 = vld [vmem:[%s7681_s0 + $0x418] sm:$0xff]  ;;  %v5073_v29 = vmul.f32 0.0012755102, %v463_v41 }
  0xf5   :  { %7984 = vst [vmem:[#allocation101_spill] sm:$0xff] %v5002_v36  ;;  %v5063_v40 = vsub.f32 %v3160_v2, %v4719_v20  ;;  %v909_v16 = vmul.f32 %v5031_v10, %v5031_v10  ;;  %v910_v35 = vmul.f32 %v5037_v54, %v5037_v54  ;;  %v911_v2 = vmul.f32 %v5043_v19, %v5043_v19 }
  0xf6   :  { %7985 = vst [vmem:[#allocation102_spill] sm:$0xff] %v5008_v55  ;;  %v5051_v55 = vsub.f32 %v3158_v45, %v4719_v20  ;;  %v3161_v45 = vld [vmem:[%s7681_s0 + $0x420] sm:$0xff]  ;;  %v1191_v27 = vadd.f32 %v1190_v0, %v928_v8  ;;  %v1126_v60 = vadd.f32 %v1125_v43, %v877_v50  ;;  %v913_v8 = vmul.f32 %v5057_v13, %v5057_v13  ;;  %v3162_v50 = vld [vmem:[%s7681_s0 + $0x508] sm:$0xff]  ;;  %v445_v43 = vpop.xlane.xlu1 %444 }
  0xf7   :  { %7986 = vst [vmem:[#allocation103_spill] sm:$0xff] %v5021_v59  ;;  %v5069_v36 = vsub.f32 %v3161_v45, %v4719_v20  ;;  %v1129_v20 = vsel %vm243_vm0, %v880_v7, 0.0  ;;  %v914_v41 = vmul.f32 %v5063_v40, %v5063_v40  ;;  %v1169_v0 = vadd.f32 %v910_v35, %v909_v16  ;;  %v3163_v16 = vld [vmem:[%s7681_s0 + $0x510] sm:$0xff] }
  0xf8   :  { %7987 = vst [vmem:[#allocation104_spill] sm:$0xff] %v5031_v10  ;;  %v912_v45 = vmul.f32 %v5051_v55, %v5051_v55  ;;  %v1193_v10 = vadd.f32 %v1192_v61, %v1191_v27  ;;  %v5096_v7 = vsub.f32 %v3162_v50, %v4736_v62  ;;  %v3167_v50 = vld [vmem:[%s7681_s0 + $0x530] sm:$0xff] }
  0xf9   :  { %7988 = vst [vmem:[#allocation105_spill] sm:$0xff] %v5037_v54  ;;  %v1127_v54 = vadd.f32 %v1126_v60, %v878_v28  ;;  %v1170_v61 = vadd.f32 %v1169_v0, %v911_v2  ;;  %v5102_v60 = vsub.f32 %v3163_v16, %v4736_v62  ;;  %v3164_v28 = vld [vmem:[%s7681_s0 + $0x518] sm:$0xff]  ;;  %v3166_v2 = vld [vmem:[%s7681_s0 + $0x528] sm:$0xff]  ;;  %v5126_v16 = vsub.f32 %v3167_v50, %v4736_v62 }
  0xfa   :  { %7989 = vst [vmem:[#allocation106_spill] sm:$0xff] %v5043_v19  ;;  %v915_v19 = vmul.f32 %v5069_v36, %v5069_v36  ;;  %1194 = vadd.xlane.f32.xlu1 %v1193_v10  ;;  %v5108_v4 = vsub.f32 %v3164_v28, %v4736_v62  ;;  %v3165_v10 = vld [vmem:[%s7681_s0 + $0x520] sm:$0xff]  ;;  %v5120_v0 = vsub.f32 %v3166_v2, %v4736_v62  ;;  %v3168_v28 = vld [vmem:[%s7681_s0 + $0x538] sm:$0xff] }
  0xfb   :  { %7990 = vst [vmem:[#allocation107_spill] sm:$0xff] %v5051_v55  ;;  %v5114_v27 = vsub.f32 %v3165_v10, %v4736_v62  ;;  %v1128_v35 = vadd.f32 %v1127_v54, %v879_v42  ;;  %v5132_v42 = vsub.f32 %v3168_v28, %v4736_v62  ;;  %v1171_v54 = vadd.f32 %v1170_v61, %v912_v45  ;;  %v3169_v28 = vld [vmem:[%s7681_s0 + $0x380] sm:$0xff] }
  0xfc   :  { %7991 = vst [vmem:[#allocation108_spill] sm:$0xff] %v5057_v13  ;;  %v944_v10 = vmul.f32 %v5096_v7, %v5096_v7  ;;  %v945_v2 = vmul.f32 %v5102_v60, %v5102_v60  ;;  %v1174_v50 = vsel %vm243_vm0, %v915_v19, 0.0  ;;  %v5141_v13 = vmul.f32 0.0012755102, %v445_v43  ;;  %v3171_v43 = vld [vmem:[%s7681_s0 + $0x390] sm:$0xff] }
  0xfd   :  { %7992 = vst [vmem:[#allocation109_spill] sm:$0xff] %v5063_v40  ;;  %v1130_v40 = vadd.f32 %v1129_v20, %v1128_v35  ;;  %v947_v55 = vmul.f32 %v5114_v27, %v5114_v27  ;;  %v1172_v62 = vadd.f32 %v1171_v54, %v913_v8  ;;  %v950_v45 = vmul.f32 %v5132_v42, %v5132_v42  ;;  %v3170_v20 = vld [vmem:[%s7681_s0 + $0x388] sm:$0xff] }
  0xfe   :  { %7993 = vst [vmem:[#allocation110_spill] sm:$0xff] %v5069_v36  ;;  %v946_v36 = vmul.f32 %v5108_v4, %v5108_v4  ;;  %v1214_v61 = vadd.f32 %v945_v2, %v944_v10  ;;  %v948_v19 = vmul.f32 %v5120_v0, %v5120_v0  ;;  %v5159_v8 = vsub.f32 %v3170_v20, %v4787_v12  ;;  %v490_v2 = vpop.xlane.xlu0 %489 }
  0xff   :  { %7994 = vst [vmem:[#allocation111_spill] sm:$0xff] %v5096_v7  ;;  %1131 = vadd.xlane.f32.xlu0 %v1130_v40  ;;  %v5165_v35 = vsub.f32 %v3171_v43, %v4787_v12  ;;  %v3172_v40 = vld [vmem:[%s7681_s0 + $0x398] sm:$0xff]  ;;  %v1173_v10 = vadd.f32 %v1172_v62, %v914_v41 }
 0x100   :  { %7995 = vst [vmem:[#allocation112_spill] sm:$0xff] %v5102_v60  ;;  %v5151_v60 = vsub.f32 %v3169_v28, %v4787_v12  ;;  %v5171_v54 = vsub.f32 %v3172_v40, %v4787_v12  ;;  %v949_v28 = vmul.f32 %v5126_v16, %v5126_v16  ;;  %v1215_v20 = vadd.f32 %v1214_v61, %v946_v36 }
 0x101   :  { %7996 = vst [vmem:[#allocation113_spill] sm:$0xff] %v5108_v4  ;;  %v896_v36 = vmul.f32 %v5159_v8, %v5159_v8  ;;  %v897_v62 = vmul.f32 %v5165_v35, %v5165_v35  ;;  %v1175_v61 = vadd.f32 %v1174_v50, %v1173_v10  ;;  %v3178_v10 = vld [vmem:[%s7681_s0 + $0x4a8] sm:$0xff] }
 0x102   :  { %7997 = vst [vmem:[#allocation114_spill] sm:$0xff] %v5114_v27  ;;  %v895_v41 = vmul.f32 %v5151_v60, %v5151_v60  ;;  %v3175_v27 = vld [vmem:[%s7681_s0 + $0x3a8] sm:$0xff]  ;;  %v898_v4 = vmul.f32 %v5171_v54, %v5171_v54 }
 0x103   :  { %7998 = vst [vmem:[#allocation115_spill] sm:$0xff] %v5120_v0  ;;  %v3174_v0 = vld [vmem:[%s7681_s0 + $0x3b0] sm:$0xff]  ;;  %1176 = vadd.xlane.f32.xlu2 %v1175_v61  ;;  %v3180_v61 = vld [vmem:[%s7681_s0 + $0x4b8] sm:$0xff] }
 0x104   :  { %7999 = vst [vmem:[#allocation116_spill] sm:$0xff] %v5126_v16  ;;  %v5185_v40 = vsub.f32 %v3174_v0, %v4787_v12  ;;  %v1216_v16 = vadd.f32 %v1215_v20, %v947_v55  ;;  %v5198_v0 = vsub.f32 %v3175_v27, %v4787_v12  ;;  %v3176_v55 = vld [vmem:[%s7681_s0 + $0x498] sm:$0xff]  ;;  %v5220_v20 = vsub.f32 %v3178_v10, %v4898_v32 }
 0x105   :  { %8000 = vst [vmem:[#allocation117_spill] sm:$0xff] %v5132_v42  ;;  %v3173_v42 = vld [vmem:[%s7681_s0 + $0x3a0] sm:$0xff]  ;;  %v5208_v50 = vsub.f32 %v3176_v55, %v4898_v32  ;;  %v5234_v55 = vsub.f32 %v3180_v61, %v4898_v32 }
 0x106   :  { %8001 = vst [vmem:[#allocation118_spill] sm:$0xff] %v5151_v60  ;;  %v5179_v43 = vsub.f32 %v3173_v42, %v4787_v12  ;;  %v1219_v42 = vsel %vm243_vm0, %v950_v45, 0.0  ;;  %v901_v7 = vmul.f32 %v5185_v40, %v5185_v40  ;;  %v1217_v45 = vadd.f32 %v1216_v16, %v948_v19  ;;  %v3177_v12 = vld [vmem:[%s7681_s0 + $0x4a0] sm:$0xff] }
 0x107   :  { %8002 = vst [vmem:[#allocation119_spill] sm:$0xff] %v5159_v8  ;;  %v1151_v8 = vadd.f32 %v896_v36, %v895_v41  ;;  %v5214_v27 = vsub.f32 %v3177_v12, %v4898_v32  ;;  %v3179_v41 = vld [vmem:[%s7681_s0 + $0x4b0] sm:$0xff]  ;;  %v3181_v12 = vld [vmem:[%s7681_s0 + $0x4c0] sm:$0xff] }
 0x108   :  { %8003 = vst [vmem:[#allocation120_spill] sm:$0xff] %v5165_v35  ;;  %v5226_v16 = vsub.f32 %v3179_v41, %v4898_v32  ;;  %v899_v19 = vmul.f32 %v5179_v43, %v5179_v43  ;;  %v5240_v10 = vsub.f32 %v3181_v12, %v4898_v32  ;;  %v1218_v41 = vadd.f32 %v1217_v45, %v949_v28 }
 0x109   :  { %8004 = vst [vmem:[#allocation121_spill] sm:$0xff] %v5171_v54  ;;  %v1152_v36 = vadd.f32 %v1151_v8, %v897_v62  ;;  %v930_v62 = vmul.f32 %v5208_v50, %v5208_v50  ;;  %v931_v61 = vmul.f32 %v5214_v27, %v5214_v27  ;;  %v900_v12 = vmul.f32 %v5198_v0, %v5198_v0 }
 0x10a   :  { %8005 = vst [vmem:[#allocation122_spill] sm:$0xff] %v5179_v43  ;;  %v5252_v43 = vmul.f32 0.0012755102, %v490_v2  ;;  %v932_v28 = vmul.f32 %v5220_v20, %v5220_v20  ;;  %v1220_v45 = vadd.f32 %v1219_v42, %v1218_v41  ;;  %v1156_v35 = vsel %vm243_vm0, %v901_v7, 0.0  ;;  %v517_v41 = vpop.xlane.xlu0 %516 }
 0x10b   :  { %8006 = vst [vmem:[#allocation123_spill] sm:$0xff] %v5185_v40  ;;  %v3182_v40 = vld [vmem:[%s7681_s0 + $0x4c8] sm:$0xff]  ;;  %v1153_v54 = vadd.f32 %v1152_v36, %v898_v4  ;;  %v934_v2 = vmul.f32 %v5234_v55, %v5234_v55  ;;  %v3183_v4 = vld [vmem:[%s7681_s0 + $0x5b0] sm:$0xff]  ;;  %v935_v7 = vmul.f32 %v5240_v10, %v5240_v10 }
 0x10c   :  { %8007 = vst [vmem:[#allocation124_spill] sm:$0xff] %v5198_v0  ;;  %v5246_v8 = vsub.f32 %v3182_v40, %v4898_v32  ;;  %v933_v32 = vmul.f32 %v5226_v16, %v5226_v16  ;;  %v1196_v40 = vadd.f32 %v931_v61, %v930_v62  ;;  %v5269_v42 = vsub.f32 %v3183_v4, %v4913_v23  ;;  %v3185_v62 = vld [vmem:[%s7681_s0 + $0x5c0] sm:$0xff] }
 0x10d   :  { %8008 = vst [vmem:[#allocation125_spill] sm:$0xff] %v5208_v50  ;;  %v472_v50 = vpop.xlane.xlu1 %471  ;;  %v1154_v60 = vadd.f32 %v1153_v54, %v899_v19  ;;  %1221 = vadd.xlane.f32.xlu1 %v1220_v45  ;;  %v3184_v54 = vld [vmem:[%s7681_s0 + $0x5b8] sm:$0xff]  ;;  %v5283_v61 = vsub.f32 %v3185_v62, %v4913_v23 }
 0x10e   :  { %8009 = vst [vmem:[#allocation126_spill] sm:$0xff] %v5214_v27  ;;  %v936_v27 = vmul.f32 %v5246_v8, %v5246_v8  ;;  %v1197_v36 = vadd.f32 %v1196_v40, %v932_v28  ;;  %v5277_v19 = vsub.f32 %v3184_v54, %v4913_v23  ;;  %v5285_v4 = vmul.f32 0.0012755102, %v472_v50  ;;  %v3186_v28 = vld [vmem:[%s7681_s0 + $0x5c8] sm:$0xff]  ;;  %v3187_v54 = vld [vmem:[%s7681_s0 + $0x5d0] sm:$0xff] }
 0x10f   :  { %8010 = vst [vmem:[#allocation127_spill] sm:$0xff] %v5220_v20  ;;  %v1155_v45 = vadd.f32 %v1154_v60, %v900_v12  ;;  %v5291_v40 = vsub.f32 %v3186_v28, %v4913_v23  ;;  %v3188_v60 = vld [vmem:[%s7681_s0 + $0x5e0] sm:$0xff]  ;;  %v965_v12 = vmul.f32 %v5269_v42, %v5269_v42 }
 0x110   :  { %8011 = vst [vmem:[#allocation128_spill] sm:$0xff] %v5226_v16  ;;  %v5303_v50 = vsub.f32 %v3188_v60, %v4913_v23  ;;  %v966_v62 = vmul.f32 %v5277_v19, %v5277_v19  ;;  %v5310_v16 = vmul.f32 0.0012755102, %v517_v41 }
 0x111   :  { %8012 = vst [vmem:[#allocation129_spill] sm:$0xff] %v5234_v55  ;;  %v1157_v28 = vadd.f32 %v1156_v35, %v1155_v45  ;;  %v1201_v55 = vsel %vm243_vm0, %v936_v27, 0.0  ;;  %v968_v20 = vmul.f32 %v5291_v40, %v5291_v40  ;;  %v3190_v35 = vld [vmem:[%s7681_s0 + $0x428] sm:$0xff]  ;;  %v3193_v45 = vld [vmem:[%s7681_s0 + $0x440] sm:$0xff] }
 0x112   :  { %8013 = vst [vmem:[#allocation130_spill] sm:$0xff] %v5240_v10  ;;  %v1198_v10 = vadd.f32 %v1197_v36, %v933_v32  ;;  %v967_v32 = vmul.f32 %v5283_v61, %v5283_v61  ;;  %v5326_v27 = vsub.f32 %v3190_v35, %v4959_v37 }
 0x113   :  { %8014 = vst [vmem:[#allocation131_spill] sm:$0xff] %v5246_v8  ;;  %v5297_v8 = vsub.f32 %v3187_v54, %v4913_v23  ;;  %v3189_v54 = vld [vmem:[%s7681_s0 + $0x5d8] sm:$0xff]  ;;  %1158 = vadd.xlane.f32.xlu0 %v1157_v28 }
 0x114   :  { %8015 = vst [vmem:[#allocation132_spill] sm:$0xff] %v5269_v42  ;;  %v1199_v36 = vadd.f32 %v1198_v10, %v934_v2  ;;  %v5318_v60 = vsub.f32 %v3189_v54, %v4913_v23  ;;  %v3191_v10 = vld [vmem:[%s7681_s0 + $0x430] sm:$0xff]  ;;  %v3192_v23 = vld [vmem:[%s7681_s0 + $0x438] sm:$0xff]  ;;  %v971_v54 = vmul.f32 %v5303_v50, %v5303_v50 }
 0x115   :  { %8016 = vst [vmem:[#allocation133_spill] sm:$0xff] %v5277_v19  ;;  %v1241_v19 = vadd.f32 %v966_v62, %v965_v12  ;;  %v5332_v2 = vsub.f32 %v3191_v10, %v4959_v37  ;;  %v5338_v41 = vsub.f32 %v3192_v23, %v4959_v37  ;;  %v5344_v12 = vsub.f32 %v3193_v45, %v4959_v37  ;;  %v3194_v10 = vld [vmem:[%s7681_s0 + $0x448] sm:$0xff]  ;;  %v3195_v45 = vld [vmem:[%s7681_s0 + $0x458] sm:$0xff] }
 0x116   :  { %8017 = vst [vmem:[#allocation134_spill] sm:$0xff] %v5283_v61  ;;  %v1200_v62 = vadd.f32 %v1199_v36, %v935_v7  ;;  %v969_v28 = vmul.f32 %v5297_v8, %v5297_v8  ;;  %v5354_v23 = vsub.f32 %v3194_v10, %v4959_v37  ;;  %v5360_v7 = vsub.f32 %v3195_v45, %v4959_v37 }
 0x117   :  { %8018 = vst [vmem:[#allocation135_spill] sm:$0xff] %v5291_v40  ;;  %v1242_v35 = vadd.f32 %v1241_v19, %v967_v32  ;;  %v916_v36 = vmul.f32 %v5326_v27, %v5326_v27  ;;  %v917_v19 = vmul.f32 %v5332_v2, %v5332_v2  ;;  %v918_v10 = vmul.f32 %v5338_v41, %v5338_v41  ;;  %v3196_v40 = vld [vmem:[%s7681_s0 + $0x450] sm:$0xff] }
 0x118   :  { %8019 = vst [vmem:[#allocation136_spill] sm:$0xff] %v5297_v8  ;;  %v1202_v32 = vadd.f32 %v1201_v55, %v1200_v62  ;;  %v5374_v45 = vsub.f32 %v3196_v40, %v4959_v37  ;;  %v919_v61 = vmul.f32 %v5344_v12, %v5344_v12  ;;  %v922_v55 = vmul.f32 %v5360_v7, %v5360_v7  ;;  %v3198_v37 = vld [vmem:[%s7681_s0 + $0x548] sm:$0xff] }
 0x119   :  { %8020 = vst [vmem:[#allocation137_spill] sm:$0xff] %v5303_v50  ;;  %v970_v50 = vmul.f32 %v5318_v60, %v5318_v60  ;;  %v1243_v8 = vadd.f32 %v1242_v35, %v968_v20  ;;  %v1178_v62 = vadd.f32 %v917_v19, %v916_v36  ;;  %v3197_v20 = vld [vmem:[%s7681_s0 + $0x540] sm:$0xff]  ;;  %v5390_v40 = vsub.f32 %v3198_v37, %v5073_v29  ;;  %v3199_v36 = vld [vmem:[%s7681_s0 + $0x550] sm:$0xff] }
 0x11a   :  { %8021 = vst [vmem:[#allocation138_spill] sm:$0xff] %v5318_v60  ;;  %1203 = vadd.xlane.f32.xlu2 %v1202_v32  ;;  %v5384_v35 = vsub.f32 %v3197_v20, %v5073_v29  ;;  %v920_v19 = vmul.f32 %v5354_v23, %v5354_v23  ;;  %v3200_v20 = vld [vmem:[%s7681_s0 + $0x558] sm:$0xff] }
 0x11b   :  { %8022 = vst [vmem:[#allocation139_spill] sm:$0xff] %v5326_v27  ;;  %v1244_v60 = vadd.f32 %v1243_v8, %v969_v28  ;;  %v5396_v8 = vsub.f32 %v3199_v36, %v5073_v29  ;;  %v1246_v28 = vsel %vm243_vm0, %v971_v54, 0.0  ;;  %v1179_v32 = vadd.f32 %v1178_v62, %v918_v10  ;;  %v3202_v54 = vld [vmem:[%s7681_s0 + $0x570] sm:$0xff] }
 0x11c   :  { %8023 = vst [vmem:[#allocation140_spill] sm:$0xff] %v5332_v2  ;;  %v5405_v37 = vsub.f32 %v3200_v20, %v5073_v29  ;;  %v5417_v10 = vsub.f32 %v3202_v54, %v5073_v29  ;;  %v951_v62 = vmul.f32 %v5384_v35, %v5384_v35  ;;  %v952_v20 = vmul.f32 %v5390_v40, %v5390_v40  ;;  %v3203_v54 = vld [vmem:[%s7681_s0 + $0x568] sm:$0xff] }
 0x11d   :  { %8024 = vst [vmem:[#allocation141_spill] sm:$0xff] %v5338_v41  ;;  %v1245_v42 = vadd.f32 %v1244_v60, %v970_v50  ;;  %v921_v50 = vmul.f32 %v5374_v45, %v5374_v45  ;;  %v1180_v60 = vadd.f32 %v1179_v32, %v919_v61  ;;  %v5432_v41 = vsub.f32 %v3203_v54, %v5073_v29 }
 0x11e   :  { %8025 = vst [vmem:[#allocation142_spill] sm:$0xff] %v5344_v12  ;;  %v1183_v12 = vsel %vm243_vm0, %v922_v55, 0.0  ;;  %v957_v32 = vmul.f32 %v5417_v10, %v5417_v10 }
 0x11f   :  { %8026 = vst [vmem:[#allocation143_spill] sm:$0xff] %v5354_v23  ;;  %v1247_v23 = vadd.f32 %v1246_v28, %v1245_v42  ;;  %v1181_v61 = vadd.f32 %v1180_v60, %v920_v19  ;;  %v3204_v42 = vld [vmem:[%s7681_s0 + $0x658] sm:$0xff]  ;;  %v3205_v28 = vld [vmem:[%s7681_s0 + $0x660] sm:$0xff] }
 0x120   :  { %8027 = vst [vmem:[#allocation144_spill] sm:$0xff] %v5360_v7  ;;  %v3201_v7 = vld [vmem:[%s7681_s0 + $0x560] sm:$0xff]  ;;  %v5442_v55 = vsub.f32 %v3204_v42, %v5090_v53  ;;  %v5450_v19 = vsub.f32 %v3205_v28, %v5090_v53  ;;  %v3208_v28 = vld [vmem:[%s7681_s0 + $0x678] sm:$0xff] }
 0x121   :  { %8028 = vst [vmem:[#allocation145_spill] sm:$0xff] %v5374_v45  ;;  %v5411_v36 = vsub.f32 %v3201_v7, %v5073_v29  ;;  %v953_v7 = vmul.f32 %v5396_v8, %v5396_v8  ;;  %1248 = vadd.xlane.f32.xlu1 %v1247_v23  ;;  %v3207_v23 = vld [vmem:[%s7681_s0 + $0x670] sm:$0xff]  ;;  %v1182_v54 = vadd.f32 %v1181_v61, %v921_v50  ;;  %v1228_v45 = vsel %vm243_vm0, %v957_v32, 0.0 }
 0x122   :  { %8029 = vst [vmem:[#allocation146_spill] sm:$0xff] %v5384_v35  ;;  %v954_v35 = vmul.f32 %v5405_v37, %v5405_v37  ;;  %v987_v61 = vmul.f32 %v5450_v19, %v5450_v19 }
 0x123   :  { %8030 = vst [vmem:[#allocation147_spill] sm:$0xff] %v5390_v40  ;;  %v1223_v40 = vadd.f32 %v952_v20, %v951_v62  ;;  %v955_v29 = vmul.f32 %v5411_v36, %v5411_v36  ;;  %v3206_v62 = vld [vmem:[%s7681_s0 + $0x668] sm:$0xff]  ;;  %v5462_v20 = vsub.f32 %v3207_v23, %v5090_v53 }
 0x124   :  { %8031 = vst [vmem:[#allocation148_spill] sm:$0xff] %v5396_v8  ;;  %v5456_v60 = vsub.f32 %v3206_v62, %v5090_v53  ;;  %v3209_v62 = vld [vmem:[%s7681_s0 + $0x680] sm:$0xff] }
 0x125   :  { %8032 = vst [vmem:[#allocation149_spill] sm:$0xff] %v5405_v37  ;;  %v1224_v42 = vadd.f32 %v1223_v40, %v953_v7  ;;  %v5476_v37 = vsub.f32 %v3209_v62, %v5090_v53  ;;  %v3210_v40 = vld [vmem:[%s7681_s0 + $0x688] sm:$0xff]  ;;  %v986_v7 = vmul.f32 %v5442_v55, %v5442_v55  ;;  %v956_v62 = vmul.f32 %v5432_v41, %v5432_v41 }
 0x126   :  { %8033 = vst [vmem:[#allocation150_spill] sm:$0xff] %v5411_v36  ;;  %v5470_v36 = vsub.f32 %v3208_v28, %v5090_v53  ;;  %v5482_v50 = vsub.f32 %v3210_v40, %v5090_v53  ;;  %v988_v23 = vmul.f32 %v5456_v60, %v5456_v60  ;;  %v1184_v28 = vadd.f32 %v1183_v12, %v1182_v54  ;;  %v3213_v54 = vld [vmem:[%s7681_s0 + $0x4e0] sm:$0xff] }
 0x127   :  { %8034 = vst [vmem:[#allocation151_spill] sm:$0xff] %v5417_v10  ;;  %v5464_v10 = vpop.xlane.xlu1 %498  ;;  %v1225_v8 = vadd.f32 %v1224_v42, %v954_v35  ;;  %v989_v53 = vmul.f32 %v5462_v20, %v5462_v20  ;;  %v3212_v35 = vld [vmem:[%s7681_s0 + $0x4d8] sm:$0xff]  ;;  %v5513_v42 = vsub.f32 %v3213_v54, %v5141_v13 }
 0x128   :  { %8035 = vst [vmem:[#allocation152_spill] sm:$0xff] %v5432_v41  ;;  %v992_v40 = vmul.f32 %v5482_v50, %v5482_v50  ;;  %1185 = vadd.xlane.f32.xlu0 %v1184_v28  ;;  %v5507_v32 = vsub.f32 %v3212_v35, %v5141_v13  ;;  %v3215_v28 = vld [vmem:[%s7681_s0 + $0x4f0] sm:$0xff] }
 0x129   :  { %8036 = vst [vmem:[#allocation153_spill] sm:$0xff] %v5442_v55  ;;  %v1268_v55 = vadd.f32 %v987_v61, %v986_v7  ;;  %v1226_v12 = vadd.f32 %v1225_v8, %v955_v29  ;;  %v990_v29 = vmul.f32 %v5470_v36, %v5470_v36  ;;  %v991_v7 = vmul.f32 %v5476_v37, %v5476_v37 }
 0x12a   :  { %8037 = vst [vmem:[#allocation154_spill] sm:$0xff] %v5450_v19  ;;  %v3211_v19 = vld [vmem:[%s7681_s0 + $0x4d0] sm:$0xff]  ;;  %v5529_v35 = vsub.f32 %v3215_v28, %v5141_v13  ;;  %v939_v28 = vmul.f32 %v5513_v42, %v5513_v42 }
 0x12b   :  { %8038 = vst [vmem:[#allocation155_spill] sm:$0xff] %v5456_v60  ;;  %v5501_v60 = vsub.f32 %v3211_v19, %v5141_v13  ;;  %v3214_v19 = vld [vmem:[%s7681_s0 + $0x4e8] sm:$0xff]  ;;  %v1269_v61 = vadd.f32 %v1268_v55, %v988_v23  ;;  %v1227_v54 = vadd.f32 %v1226_v12, %v956_v62  ;;  %v938_v55 = vmul.f32 %v5507_v32, %v5507_v32  ;;  %v3217_v62 = vld [vmem:[%s7681_s0 + $0x4f8] sm:$0xff] }
 0x12c   :  { %8039 = vst [vmem:[#allocation156_spill] sm:$0xff] %v5462_v20  ;;  %v5519_v8 = vsub.f32 %v3214_v19, %v5141_v13  ;;  %v3216_v19 = vld [vmem:[%s7681_s0 + $0x500] sm:$0xff]  ;;  %v5546_v12 = vsub.f32 %v3217_v62, %v5141_v13 }
 0x12d   :  { %8040 = vst [vmem:[#allocation157_spill] sm:$0xff] %v5470_v36  ;;  %v5535_v41 = vsub.f32 %v3216_v19, %v5141_v13  ;;  %v1270_v23 = vadd.f32 %v1269_v61, %v989_v53  ;;  %v1229_v19 = vadd.f32 %v1228_v45, %v1227_v54  ;;  %v3219_v13 = vld [vmem:[%s7681_s0 + $0x5f0] sm:$0xff]  ;;  %v3220_v54 = vld [vmem:[%s7681_s0 + $0x5f8] sm:$0xff] }
 0x12e   :  { %8041 = vst [vmem:[#allocation158_spill] sm:$0xff] %v5476_v37  ;;  %v1273_v37 = vsel %vm243_vm0, %v992_v40, 0.0  ;;  %v940_v36 = vmul.f32 %v5519_v8, %v5519_v8  ;;  %v3218_v40 = vld [vmem:[%s7681_s0 + $0x5e8] sm:$0xff]  ;;  %v5564_v45 = vsub.f32 %v3219_v13, %v5252_v43 }
 0x12f   :  { %8042 = vst [vmem:[#allocation159_spill] sm:$0xff] %v5482_v50  ;;  %v937_v50 = vmul.f32 %v5501_v60, %v5501_v60  ;;  %v943_v20 = vmul.f32 %v5535_v41, %v5535_v41  ;;  %v1271_v61 = vadd.f32 %v1270_v23, %v990_v29  ;;  %1230 = vadd.xlane.f32.xlu2 %v1229_v19  ;;  %v3221_v23 = vld [vmem:[%s7681_s0 + $0x600] sm:$0xff] }
 0x130   :  { %8043 = vst [vmem:[#allocation160_spill] sm:$0xff] %v5501_v60  ;;  %v941_v29 = vmul.f32 %v5529_v35, %v5529_v35  ;;  %v5578_v62 = vsub.f32 %v3221_v23, %v5252_v43 }
 0x131   :  { %8044 = vst [vmem:[#allocation161_spill] sm:$0xff] %v5507_v32  ;;  %v1205_v53 = vadd.f32 %v938_v55, %v937_v50  ;;  %v5558_v32 = vsub.f32 %v3218_v40, %v5252_v43  ;;  %v5570_v50 = vsub.f32 %v3220_v54, %v5252_v43  ;;  %v3222_v40 = vld [vmem:[%s7681_s0 + $0x608] sm:$0xff]  ;;  %v526_v54 = vpop.xlane.xlu1 %525  ;;  %v1272_v19 = vadd.f32 %v1271_v61, %v991_v7 }
 0x132   :  { %8045 = vst [vmem:[#allocation162_spill] sm:$0xff] %v5513_v42  ;;  %v5584_v13 = vsub.f32 %v3222_v40, %v5252_v43  ;;  %v3224_v40 = vld [vmem:[%s7681_s0 + $0x618] sm:$0xff]  ;;  %v973_v61 = vmul.f32 %v5564_v45, %v5564_v45 }
 0x133   :  { %8046 = vst [vmem:[#allocation163_spill] sm:$0xff] %v5519_v8  ;;  %v1206_v55 = vadd.f32 %v1205_v53, %v939_v28  ;;  %v3223_v28 = vld [vmem:[%s7681_s0 + $0x610] sm:$0xff]  ;;  %v972_v23 = vmul.f32 %v5558_v32, %v5558_v32  ;;  %v5600_v7 = vsub.f32 %v3224_v40, %v5252_v43  ;;  %v1274_v8 = vadd.f32 %v1273_v37, %v1272_v19 }
 0x134   :  { %8047 = vst [vmem:[#allocation164_spill] sm:$0xff] %v5529_v35  ;;  %v5592_v53 = vsub.f32 %v3223_v28, %v5252_v43  ;;  %v5607_v28 = vmul.f32 0.0012755102, %v5464_v10  ;;  %v976_v43 = vmul.f32 %v5584_v13, %v5584_v13  ;;  %v3226_v10 = vld [vmem:[%s7681_s0 + $0x580] sm:$0xff] }
 0x135   :  { %8048 = vst [vmem:[#allocation165_spill] sm:$0xff] %v5535_v41  ;;  %v942_v41 = vmul.f32 %v5546_v12, %v5546_v12  ;;  %v1207_v35 = vadd.f32 %v1206_v55, %v940_v36  ;;  %v975_v36 = vmul.f32 %v5578_v62, %v5578_v62  ;;  %v1250_v40 = vadd.f32 %v973_v61, %v972_v23 }
 0x136   :  { %8049 = vst [vmem:[#allocation166_spill] sm:$0xff] %v5546_v12  ;;  %v974_v12 = vmul.f32 %v5570_v50, %v5570_v50  ;;  %1275 = vadd.xlane.f32.xlu1 %v1274_v8  ;;  %v977_v37 = vmul.f32 %v5592_v53, %v5592_v53  ;;  %v3228_v8 = vld [vmem:[%s7681_s0 + $0x590] sm:$0xff]  ;;  %v978_v23 = vmul.f32 %v5600_v7, %v5600_v7 }
 0x137   :  { %8050 = vst [vmem:[#allocation167_spill] sm:$0xff] %v5558_v32  ;;  %v1210_v32 = vsel %vm243_vm0, %v943_v20, 0.0  ;;  %v1208_v55 = vadd.f32 %v1207_v35, %v941_v29  ;;  %v5626_v20 = vsub.f32 %v3226_v10, %v5285_v4  ;;  %v3227_v35 = vld [vmem:[%s7681_s0 + $0x588] sm:$0xff]  ;;  %v3229_v10 = vld [vmem:[%s7681_s0 + $0x598] sm:$0xff] }
 0x138   :  { %8051 = vst [vmem:[#allocation168_spill] sm:$0xff] %v5564_v45  ;;  %v3225_v45 = vld [vmem:[%s7681_s0 + $0x578] sm:$0xff]  ;;  %v5632_v29 = vsub.f32 %v3227_v35, %v5285_v4  ;;  %v1251_v61 = vadd.f32 %v1250_v40, %v974_v12  ;;  %v3230_v35 = vld [vmem:[%s7681_s0 + $0x5a8] sm:$0xff] }
 0x139   :  { %8052 = vst [vmem:[#allocation169_spill] sm:$0xff] %v5570_v50  ;;  %v5618_v50 = vsub.f32 %v3225_v45, %v5285_v4  ;;  %v5638_v45 = vsub.f32 %v3228_v8, %v5285_v4  ;;  %v1209_v19 = vadd.f32 %v1208_v55, %v942_v41  ;;  %v959_v12 = vmul.f32 %v5626_v20, %v5626_v20 }
 0x13a   :  { %8053 = vst [vmem:[#allocation170_spill] sm:$0xff] %v5578_v62  ;;  %v960_v55 = vmul.f32 %v5632_v29, %v5632_v29  ;;  %v1252_v8 = vadd.f32 %v1251_v61, %v975_v36  ;;  %v5668_v62 = vpop.xlane.xlu1 %1032 }
 0x13b   :  { %8054 = vst [vmem:[#allocation171_spill] sm:$0xff] %v5584_v13  ;;  %v5652_v13 = vsub.f32 %v3230_v35, %v5285_v4  ;;  %v958_v41 = vmul.f32 %v5618_v50, %v5618_v50  ;;  %v1211_v40 = vadd.f32 %v1210_v32, %v1209_v19  ;;  %v3232_v32 = vld [vmem:[%s7681_s0 + $0x690] sm:$0xff]  ;;  %v3234_v19 = vld [vmem:[%s7681_s0 + $0x6a0] sm:$0xff] }
 0x13c   :  { %8055 = vst [vmem:[#allocation172_spill] sm:$0xff] %v5592_v53  ;;  %v5646_v53 = vsub.f32 %v3229_v10, %v5285_v4  ;;  %v5660_v10 = vmul.f32 0.0012755102, %v526_v54  ;;  %v5678_v54 = vsub.f32 %v3232_v32, %v5310_v16  ;;  %v1253_v36 = vadd.f32 %v1252_v8, %v976_v43 }
 0x13d   :  { %8056 = vst [vmem:[#allocation173_spill] sm:$0xff] %v5600_v7  ;;  %v3231_v7 = vld [vmem:[%s7681_s0 + $0x5a0] sm:$0xff]  ;;  %1212 = vadd.xlane.f32.xlu0 %v1211_v40  ;;  %v5690_v61 = vsub.f32 %v3234_v19, %v5310_v16  ;;  %v1255_v40 = vsel %vm243_vm0, %v978_v23, 0.0 }
 0x13e   :  { %8057 = vst [vmem:[#allocation174_spill] sm:$0xff] %v5618_v50  ;;  %v5666_v35 = vsub.f32 %v3231_v7, %v5285_v4  ;;  %v961_v50 = vmul.f32 %v5638_v45, %v5638_v45  ;;  %v3233_v4 = vld [vmem:[%s7681_s0 + $0x698] sm:$0xff]  ;;  %v962_v8 = vmul.f32 %v5646_v53, %v5646_v53  ;;  %v993_v23 = vmul.f32 %v5678_v54, %v5678_v54 }
 0x13f   :  { %8058 = vst [vmem:[#allocation175_spill] sm:$0xff] %v5626_v20  ;;  %v964_v20 = vmul.f32 %v5652_v13, %v5652_v13  ;;  %v5684_v7 = vsub.f32 %v3233_v4, %v5310_v16  ;;  %v3236_v4 = vld [vmem:[%s7681_s0 + $0x6b0] sm:$0xff] }
 0x140   :  { %8059 = vst [vmem:[#allocation176_spill] sm:$0xff] %v5632_v29  ;;  %v1232_v29 = vadd.f32 %v959_v12, %v958_v41  ;;  %v3235_v41 = vld [vmem:[%s7681_s0 + $0x6a8] sm:$0xff]  ;;  %v5698_v12 = vpop.xlane.xlu2 %1014  ;;  %v5707_v19 = vsub.f32 %v3236_v4, %v5310_v16  ;;  %v995_v4 = vmul.f32 %v5690_v61, %v5690_v61 }
 0x141   :  { %8060 = vst [vmem:[#allocation177_spill] sm:$0xff] %v5638_v45  ;;  %v5696_v43 = vsub.f32 %v3235_v41, %v5310_v16  ;;  %v3237_v41 = vld [vmem:[%s7681_s0 + $0x6b8] sm:$0xff] }
 0x142   :  { %8061 = vst [vmem:[#allocation178_spill] sm:$0xff] %v5646_v53  ;;  %v1233_v32 = vadd.f32 %v1232_v29, %v960_v55  ;;  %v5713_v45 = vsub.f32 %v3237_v41, %v5310_v16  ;;  %v994_v29 = vmul.f32 %v5684_v7, %v5684_v7  ;;  %v963_v55 = vmul.f32 %v5666_v35, %v5666_v35 }
 0x143   :  { %8062 = vst [vmem:[#allocation179_spill] sm:$0xff] %v5652_v13  ;;  %v1254_v13 = vadd.f32 %v1253_v36, %v977_v37  ;;  %v3238_v37 = vld [vmem:[%s7681_s0 + $0x6c0] sm:$0xff] }
 0x144   :  { %8063 = vst [vmem:[#allocation180_spill] sm:$0xff] %v5666_v35  ;;  %v1234_v53 = vadd.f32 %v1233_v32, %v961_v50  ;;  %v5725_v36 = vsub.f32 %v3238_v37, %v5310_v16  ;;  %v1277_v42 = vadd.f32 %v994_v29, %v993_v23  ;;  %v3239_v50 = vld [vmem:[%s7681_s0 + $0x620] sm:$0xff]  ;;  %v3240_v16 = vld [vmem:[%s7681_s0 + $0x628] sm:$0xff]  ;;  %v3242_v29 = vld [vmem:[%s7681_s0 + $0x638] sm:$0xff]  ;;  %v3253_v35 = vmov 0  }
 0x145   :  { %8064 = vst [vmem:[#allocation181_spill] sm:$0xff] %v5678_v54  ;;  %v1256_v41 = vadd.f32 %v1255_v40, %v1254_v13  ;;  %v1237_v54 = vsel %vm243_vm0, %v964_v20, 0.0  ;;  %v5736_v32 = vsub.f32 %v3239_v50, %v5607_v28  ;;  %v5742_v13 = vsub.f32 %v3240_v16, %v5607_v28  ;;  %v3241_v20 = vld [vmem:[%s7681_s0 + $0x630] sm:$0xff]  ;;  %2997 = vset.pattern.permute.xlu0 %v3253_v35 }
 0x146   :  { %8065 = vst [vmem:[#allocation182_spill] sm:$0xff] %v5684_v7  ;;  %v996_v7 = vmul.f32 %v5696_v43, %v5696_v43  ;;  %v1235_v60 = vadd.f32 %v1234_v53, %v962_v8  ;;  %v5748_v53 = vsub.f32 %v3241_v20, %v5607_v28  ;;  %v997_v40 = vmul.f32 %v5707_v19, %v5707_v19 }
 0x147   :  { %8066 = vst [vmem:[#allocation183_spill] sm:$0xff] %v5690_v61  ;;  %1257 = vadd.xlane.f32.xlu2 %v1256_v41  ;;  %v998_v8 = vmul.f32 %v5713_v45, %v5713_v45  ;;  %v1278_v23 = vadd.f32 %v1277_v42, %v995_v4  ;;  %v5758_v37 = vsub.f32 %v3242_v29, %v5607_v28  ;;  %v3243_v41 = vld [vmem:[%s7681_s0 + $0x640] sm:$0xff]  ;;  %v3244_v29 = vld [vmem:[%s7681_s0 + $0x650] sm:$0xff] }
 0x148   :  { %8067 = vst [vmem:[#allocation184_spill] sm:$0xff] %v5696_v43  ;;  %v1236_v50 = vadd.f32 %v1235_v60, %v963_v55  ;;  %v999_v16 = vmul.f32 %v5725_v36, %v5725_v36  ;;  %v5766_v20 = vsub.f32 %v3243_v41, %v5607_v28  ;;  %v979_v42 = vmul.f32 %v5736_v32, %v5736_v32  ;;  %v1042_v41 = vpop.xlane.xlu2 %1041  ;;  %v1024_v43 = vpop.xlane.xlu0 %1023 }
 0x149   :  { %8068 = vst [vmem:[#allocation185_spill] sm:$0xff] %v5707_v19  ;;  %v1279_v4 = vadd.f32 %v1278_v23, %v996_v7  ;;  %v5774_v60 = vsub.f32 %v3244_v29, %v5607_v28  ;;  %v980_v55 = vmul.f32 %v5742_v13, %v5742_v13  ;;  %v3245_v7 = vld [vmem:[%s7681_s0 + $0x648] sm:$0xff]  ;;  %v982_v29 = vmul.f32 %v5758_v37, %v5758_v37 }
 0x14a   :  { %8069 = vst [vmem:[#allocation186_spill] sm:$0xff] %v5713_v45  ;;  %v5780_v45 = vpop.xlane.xlu1 %1059  ;;  %v1238_v19 = vadd.f32 %v1237_v54, %v1236_v50  ;;  %v5786_v23 = vsub.f32 %v3245_v7, %v5607_v28  ;;  %v3247_v54 = vld [vmem:[%s7681_s0 + $0x6d0] sm:$0xff]  ;;  %v1282_v50 = vsel %vm243_vm0, %v999_v16, 0.0  ;;  %2996 = vset.pattern.permute.xlu1 %v3253_v35  ;;  %2998 = vset.pattern.permute.xlu2 %v3253_v35 }
 0x14b   :  { %8070 = vst [vmem:[#allocation187_spill] sm:$0xff] %v5725_v36  ;;  %v981_v36 = vmul.f32 %v5748_v53, %v5748_v53  ;;  %v1280_v61 = vadd.f32 %v1279_v4, %v997_v40  ;;  %v5800_v28 = vsub.f32 %v3247_v54, %v5660_v10  ;;  %v3248_v40 = vld [vmem:[%s7681_s0 + $0x6d8] sm:$0xff]  ;;  %v985_v16 = vmul.f32 %v5774_v60, %v5774_v60  ;;  %v3250_v54 = vld [vmem:[%s7681_s0 + $0x6e8] sm:$0xff] }
 0x14c   :  { %8071 = vst [vmem:[#allocation188_spill] sm:$0xff] %v5736_v32  ;;  %1239 = vadd.xlane.f32.xlu0 %v1238_v19  ;;  %v983_v19 = vmul.f32 %v5766_v20, %v5766_v20 }
 0x14d   :  { %8072 = vst [vmem:[#allocation189_spill] sm:$0xff] %v5742_v13  ;;  %v1259_v13 = vadd.f32 %v980_v55, %v979_v42  ;;  %v5807_v42 = vsub.f32 %v3248_v40, %v5660_v10  ;;  %v1281_v55 = vadd.f32 %v1280_v61, %v998_v8  ;;  %v5823_v40 = vsub.f32 %v3250_v54, %v5660_v10 }
 0x14e   :  { %8073 = vst [vmem:[#allocation190_spill] sm:$0xff] %v5748_v53  ;;  %v3246_v53 = vld [vmem:[%s7681_s0 + $0x6c8] sm:$0xff]  ;;  %v1001_v61 = vmul.f32 %v5800_v28, %v5800_v28 }
 0x14f   :  { %8074 = vst [vmem:[#allocation191_spill] sm:$0xff] %v5758_v37  ;;  %v5794_v32 = vsub.f32 %v3246_v53, %v5660_v10  ;;  %v3249_v53 = vld [vmem:[%s7681_s0 + $0x6e0] sm:$0xff]  ;;  %v1260_v7 = vadd.f32 %v1259_v13, %v981_v36  ;;  %v1002_v8 = vmul.f32 %v5807_v42, %v5807_v42  ;;  %v984_v36 = vmul.f32 %v5786_v23, %v5786_v23 }
 0x150   :  { %8075 = vst [vmem:[#allocation192_spill] sm:$0xff] %v5766_v20  ;;  %v5813_v4 = vsub.f32 %v3249_v53, %v5660_v10  ;;  %v1283_v53 = vadd.f32 %v1282_v50, %v1281_v55 }
 0x151   :  { %8076 = vst [vmem:[#allocation193_spill] sm:$0xff] %v5774_v60  ;;  %v1000_v37 = vmul.f32 %v5794_v32, %v5794_v32  ;;  %v1261_v13 = vadd.f32 %v1260_v7, %v982_v29  ;;  %v3251_v60 = vld [vmem:[%s7681_s0 + $0x6f0] sm:$0xff]  ;;  %v1295_v29 = vmul.f32 0.0012755102, %v5698_v12  ;;  %v1297_v12 = vmul.f32 0.0012755102, %v5668_v62 }
 0x152   :  { %8077 = vst [vmem:[#allocation194_spill] sm:$0xff] %v5786_v23  ;;  %v5837_v54 = vsub.f32 %v3251_v60, %v5660_v10  ;;  %v1003_v50 = vmul.f32 %v5813_v4, %v5813_v4  ;;  %1284 = vadd.xlane.f32.xlu2 %v1283_v53  ;;  %v1004_v60 = vmul.f32 %v5823_v40, %v5823_v40 }
 0x153   :  { %8078 = vst [vmem:[#allocation195_spill] sm:$0xff] %v5794_v32  ;;  %v3252_v32 = vld [vmem:[%s7681_s0 + $0x6f8] sm:$0xff]  ;;  %v1286_v55 = vadd.f32 %v1001_v61, %v1000_v37  ;;  %v1262_v7 = vadd.f32 %v1261_v13, %v983_v19  ;;  %v5851_v20 = vadd.f32 1e-05, %v1295_v29  ;;  %v1296_v37 = vmul.f32 0.0012755102, %v1024_v43  ;;  %v1087_v19 = vpop.xlane.xlu1 %1086  ;;  %v1051_v13 = vpop.xlane.xlu0 %1050 }
 0x154   :  { %8079 = vst [vmem:[#allocation196_spill] sm:$0xff] %v5800_v28  ;;  %v5843_v28 = vsub.f32 %v3252_v32, %v5660_v10  ;;  %v2127_v10 = vld [vmem:[%s7682_s2] sm:$0xff]  ;;  %v1005_v61 = vmul.f32 %v5837_v54, %v5837_v54  ;;  %v5864_v62 = vadd.f32 1e-05, %v1297_v12  ;;  %v1299_v43 = vmul.f32 0.0012755102, %v1051_v13 }
 0x155   :  { %8080 = vst [vmem:[#allocation197_spill] sm:$0xff] %v5807_v42  ;;  %v1264_v42 = vsel %vm243_vm0, %v985_v16, 0.0  ;;  %v1287_v23 = vadd.f32 %v1286_v55, %v1002_v8  ;;  %v1263_v32 = vadd.f32 %v1262_v7, %v984_v36  ;;  %v1069_v16 = vpop.xlane.xlu2 %1068  ;;  %2999 = vrsqrt.f32 %v5851_v20  ;;  %2161 = vperm.xlu1 %2996, %v2127_v10  }
 0x156   :  { %8081 = vst [vmem:[#allocation198_spill] sm:$0xff] %v5813_v4  ;;  %v1006_v8 = vmul.f32 %v5843_v28, %v5843_v28  ;;  %v1298_v36 = vmul.f32 0.0012755102, %v1042_v41  ;;  %v5862_v7 = vadd.f32 1e-05, %v1296_v37  ;;  %v2130_v41 = vld [vmem:[%s7682_s2 + $0x18] sm:$0xff]  ;;  %vm1397_vm2 = vweird.f32 %v5851_v20 }
 0x157   :  { %8082 = vst [vmem:[#allocation199_spill] sm:$0xff] %v5823_v40  ;;  %v1288_v53 = vadd.f32 %v1287_v23, %v1003_v50  ;;  %v1265_v55 = vadd.f32 %v1264_v42, %v1263_v32  ;;  %v1301_v35 = vmul.f32 0.0012755102, %v1069_v16  ;;  %v5868_v23 = vadd.f32 1e-05, %v1299_v43 }
 0x158   :  { %8083 = vst [vmem:[#allocation200_spill] sm:$0xff] %v5837_v54  ;;  %v1291_v54 = vsel %vm243_vm0, %v1006_v8, 0.0  ;;  %3001 = vrsqrt.f32 %v5862_v7  ;;  %v5870_v42 = vadd.f32 1e-05, %v1298_v36  ;;  %v1303_v50 = vmul.f32 0.0012755102, %v1087_v19 }
 0x159   :  { %8084 = vst [vmem:[#allocation201_spill] sm:$0xff] %v5843_v28  ;;  %v1289_v29 = vadd.f32 %v1288_v53, %v1004_v60  ;;  %1266 = vadd.xlane.f32.xlu0 %v1265_v55  ;;  %3003 = vrsqrt.f32 %v5864_v62  ;;  %v5876_v32 = vadd.f32 1e-05, %v1301_v35  ;;  %v1300_v16 = vmul.f32 0.0012755102, %v5780_v45  ;;  %v1327_v28 = vld [vmem:[%s7683_s1] sm:$0xff] }
 0x15a   :  { %3005 = vrsqrt.f32 %v5868_v23  ;;  %v5884_v53 = vadd.f32 1e-05, %v1303_v50  ;;  %vm1437_vm4 = vweird.f32 %v5868_v23  ;;  %vm1407_vm7 = vweird.f32 %v5862_v7 }
 0x15b   :  { %v1290_v40 = vadd.f32 %v1289_v29, %v1005_v61  ;;  %v3000_v60 = vpop.eup %2999  ;;  %v1114_v12 = vpop.xlane.xlu1 %1113  ;;  %3007 = vrsqrt.f32 %v5870_v42  ;;  %v5889_v45 = vadd.f32 1e-05, %v1300_v16  ;;  %vm1417_vm10 = vweird.f32 %v5864_v62 }
 0x15c   :  { %v1392_v37 = vmul.f32 %v3000_v60, %v5851_v20  ;;  %3009 = vrsqrt.f32 %v5876_v32  ;;  %v1306_v43 = vmul.f32 0.0012755102, %v1114_v12  ;;  %vm1398_vm1 = vweird.f32 %v3000_v60 }
 0x15d   :  { %v1292_v10 = vadd.f32 %v1291_v54, %v1290_v40  ;;  %v1096_v61 = vpop.xlane.xlu2 %1095  ;;  %2176 = vperm.xlu1 %2996, %v2130_v41   ;;  %3011 = vrsqrt.f32 %v5884_v53  ;;  %vm1399_vm3 = vmor %vm1397_vm2, %vm1398_vm1  ;;  %vm1427_vm12 = vweird.f32 %v5870_v42  ;;  %vm1477_vm13 = vweird.f32 %v5884_v53 }
 0x15e   :  { %v5881_v19 = vpop.eup %3001  ;;  %v1393_v8 = vmul.f32 %v3000_v60, %v1392_v37  ;;  %v1304_v54 = vmul.f32 0.0012755102, %v1096_v61  ;;  %3013 = vrsqrt.f32 %v5889_v45  ;;  %vm1457_vm14 = vweird.f32 %v5876_v32 }
 0x15f   :  { %v1402_v40 = vmul.f32 %v5881_v19, %v5862_v7  ;;  %v5891_v55 = vpop.eup %3003  ;;  %vm1408_vm6 = vweird.f32 %v5881_v19 }
 0x160   :  { %v1394_v13 = vmul.f32 0.5, %v1393_v8  ;;  %v5893_v29 = vpop.eup %3005  ;;  %v5897_v50 = vadd.f32 1e-05, %v1304_v54  ;;  %v1412_v16 = vmul.f32 %v5891_v55, %v5864_v62  ;;  %v1078_v8 = vpop.xlane.xlu0 %1077  ;;  %v2129_v54 = vld [vmem:[%s7682_s2 + $0x10] sm:$0xff]  ;;  %vm5973_vm9 = vmor %vm1407_vm7, %vm1408_vm6  ;;  %vm1418_vm11 = vweird.f32 %v5891_v55 }
 0x161   :  { %1293 = vadd.xlane.f32.xlu0 %v1292_v10  ;;  %v1403_v36 = vmul.f32 %v5881_v19, %v1402_v40  ;;  %v5899_v41 = vpop.eup %3007  ;;  %v1432_v10 = vmul.f32 %v5893_v29, %v5868_v23  ;;  %vm1438_vm5 = vweird.f32 %v5893_v29  ;;  %vm6013_vm2 = vmor %vm1417_vm10, %vm1418_vm11  ;;  %vm1447_vm6 = vweird.f32 %v5889_v45 }
 0x162   :  { %v1395_v35 = vsub.f32 1.5, %v1394_v13  ;;  %v5904_v37 = vpop.eup %3009  ;;  %v5913_v13 = vadd.f32 1e-05, %v1306_v43  ;;  %3015 = vrsqrt.f32 %v5897_v50  ;;  %v1302_v43 = vmul.f32 0.0012755102, %v1078_v8  ;;  %vm1439_vm8 = vmor %vm1437_vm4, %vm1438_vm5 }
 0x163   :  { %v1141_v61 = vpop.xlane.xlu1 %1140  ;;  %v1404_v40 = vmul.f32 0.5, %v1403_v36  ;;  %v1433_v12 = vmul.f32 %v5893_v29, %v1432_v10  ;;  %v5919_v2 = vpop.eup %3011  ;;  %v1422_v36 = vmul.f32 %v5899_v41, %v5870_v42  ;;  %v1452_v10 = vmul.f32 %v5904_v37, %v5876_v32  ;;  %v1330_v42 = vld [vmem:[%s7683_s1 + $0x18] sm:$0xff] }
 0x164   :  { %v1396_v4 = vmul.f32 %v3000_v60, %v1395_v35  ;;  %v1413_v0 = vmul.f32 %v5891_v55, %v1412_v16  ;;  %v1309_v51 = vmul.f32 0.0012755102, %v1141_v61  ;;  %v5926_v47 = vpop.eup %3013  ;;  %v5928_v9 = vadd.f32 1e-05, %v1302_v43 }
 0x165   :  { %v1434_v27 = vmul.f32 0.5, %v1433_v12  ;;  %v1123_v20 = vpop.xlane.xlu2 %1122  ;;  %v1405_v35 = vsub.f32 1.5, %v1404_v40  ;;  %v1472_v5 = vmul.f32 %v5919_v2, %v5884_v53  ;;  %3017 = vrsqrt.f32 %v5913_v13  ;;  %v1335_v53 = vld [vmem:[%s7683_s1 + $0x40] sm:$0xff] }
 0x166   :  { %v1400_v59 = vsel %vm1399_vm3, %v3000_v60, %v1396_v4  ;;  %v1307_v58 = vmul.f32 0.0012755102, %v1123_v20  ;;  %v1423_v16 = vmul.f32 %v5899_v41, %v1422_v36  ;;  %v1453_v4 = vmul.f32 %v5904_v37, %v1452_v10 }
 0x167   :  { %v1435_v15 = vsub.f32 1.5, %v1434_v27  ;;  %v1711_v26 = vmul.f32 %v1400_v59, %v1327_v28  ;;  %v1414_v59 = vmul.f32 0.5, %v1413_v0  ;;  %v1442_v28 = vmul.f32 %v5926_v47, %v5889_v45  ;;  %v1331_v0 = vld [vmem:[%s7683_s1 + $0x20] sm:$0xff] }
 0x168   :  { %v5933_v12 = vadd.f32 1e-05, %v1307_v58  ;;  %v5939_v27 = vpop.eup %3015  ;;  %v5943_v60 = vadd.f32 1e-05, %v1309_v51  ;;  %3019 = vrsqrt.f32 %v5928_v9  ;;  %v2132_v58 = vld [vmem:[%s7682_s2 + $0x28] sm:$0xff]  ;;  %v1473_v51 = vmul.f32 %v5919_v2, %v1472_v5 }
 0x169   :  { %1745 = vperm.xlu1 %2996, %v1711_v26   ;;  %v1406_v26 = vmul.f32 %v5881_v19, %v1405_v35  ;;  %v1436_v61 = vmul.f32 %v5893_v29, %v1435_v15  ;;  %v1424_v40 = vmul.f32 0.5, %v1423_v16  ;;  %v1454_v36 = vmul.f32 0.5, %v1453_v4  ;;  %v1328_v35 = vld [vmem:[%s7683_s1 + $0x8] sm:$0xff] }
 0x16a   :  { %2171 = vperm.xlu2 %2998, %v2129_v54   ;;  %3021 = vrsqrt.f32 %v5933_v12  ;;  %v2128_v54 = vld [vmem:[%s7682_s2 + $0x8] sm:$0xff]  ;;  %v1482_v10 = vmul.f32 %v5939_v27, %v5897_v50  ;;  %v1443_v5 = vmul.f32 %v5926_v47, %v1442_v28  ;;  %v1415_v43 = vsub.f32 1.5, %v1414_v59  ;;  %v1105_v59 = vpop.xlane.xlu0 %1104 }
 0x16b   :  { %v1168_v8 = vpop.xlane.xlu1 %1167  ;;  %v1440_v15 = vsel %vm1439_vm8, %v5893_v29, %v1436_v61  ;;  %v5968_v7 = vpop.eup %3017  ;;  %3023 = vrsqrt.f32 %v5943_v60  ;;  %v1410_v29 = vsel %vm5973_vm9, %v5881_v19, %v1406_v26  ;;  %v1474_v28 = vmul.f32 0.5, %v1473_v51 }
 0x16c   :  { %v1715_v20 = vmul.f32 %v1440_v15, %v1331_v0  ;;  %v1312_v16 = vmul.f32 0.0012755102, %v1168_v8  ;;  %v1425_v0 = vsub.f32 1.5, %v1424_v40  ;;  %v1455_v61 = vsub.f32 1.5, %v1454_v36 }
 0x16d   :  { %v1502_v19 = vmul.f32 %v5968_v7, %v5913_v13  ;;  %v1483_v26 = vmul.f32 %v5939_v27, %v1482_v10  ;;  %v1444_v8 = vmul.f32 0.5, %v1443_v5  ;;  %v1712_v15 = vmul.f32 %v1410_v29, %v1328_v35 }
 0x16e   :  { %v5984_v4 = vpop.eup %3019  ;;  %v1305_v23 = vmul.f32 0.0012755102, %v1105_v59  ;;  %vm1428_vm15 = vweird.f32 %v5899_v41  ;;  %vm1458_vm1 = vweird.f32 %v5904_v37  ;;  %v1416_v51 = vmul.f32 %v5891_v55, %v1415_v43  ;;  %v2131_v43 = vld [vmem:[%s7682_s2 + $0x20] sm:$0xff] }
 0x16f   :  { %v5999_v40 = vadd.f32 1e-05, %v1312_v16  ;;  %v1475_v36 = vsub.f32 1.5, %v1474_v28  ;;  %v1462_v5 = vmul.f32 %v5984_v4, %v5928_v9  ;;  %v1503_v29 = vmul.f32 %v5968_v7, %v1502_v19  ;;  %v1150_v28 = vpop.xlane.xlu2 %1149  ;;  %vm1459_vm4 = vmor %vm1457_vm14, %vm1458_vm1 }
 0x170   :  { %v1484_v16 = vmul.f32 0.5, %v1483_v26  ;;  %v1426_v59 = vmul.f32 %v5899_v41, %v1425_v0  ;;  %v1445_v25 = vsub.f32 1.5, %v1444_v8  ;;  %vm1478_vm3 = vweird.f32 %v5919_v2  ;;  %vm6043_vm5 = vmor %vm1427_vm12, %vm1428_vm15 }
 0x171   :  { %1765 = vperm.xlu1 %2996, %v1715_v20   ;;  %v6007_v20 = vadd.f32 1e-05, %v1305_v23  ;;  %v1456_v23 = vmul.f32 %v5904_v37, %v1455_v61  ;;  %v1310_v62 = vmul.f32 0.0012755102, %v1150_v28  ;;  %v1420_v19 = vsel %vm6013_vm2, %v5891_v55, %v1416_v51  ;;  %v1333_v61 = vld [vmem:[%s7683_s1 + $0x30] sm:$0xff]  ;;  %vm6073_vm9 = vmor %vm1477_vm13, %vm1478_vm3 }
 0x172   :  { %2186 = vperm.xlu2 %2998, %v2132_v58   ;;  %v5989_v58 = vpop.eup %3021  ;;  %v1329_v55 = vld [vmem:[%s7683_s1 + $0x10] sm:$0xff]  ;;  %v1504_v35 = vmul.f32 0.5, %v1503_v29  ;;  %v1485_v28 = vsub.f32 1.5, %v1484_v16  ;;  %vm1448_vm7 = vweird.f32 %v5926_v47  ;;  %vm1507_vm8 = vweird.f32 %v5913_v13 }
 0x173   :  { %v1512_v10 = vmul.f32 %v5989_v58, %v5933_v12  ;;  %3025 = vrsqrt.f32 %v6007_v20  ;;  %v1460_v32 = vsel %vm1459_vm4, %v5904_v37, %v1456_v23  ;;  %v6052_v51 = vadd.f32 1e-05, %v1310_v62  ;;  %vm6091_vm11 = vmor %vm1447_vm6, %vm1448_vm7 }
 0x174   :  { %3027 = vrsqrt.f32 %v5999_v40  ;;  %v1717_v37 = vmul.f32 %v1460_v32, %v1333_v61  ;;  %v1476_v23 = vmul.f32 %v5919_v2, %v1475_v36  ;;  %v1446_v29 = vmul.f32 %v5926_v47, %v1445_v25 }
 0x175   :  { %2166 = vperm.xlu0 %2997, %v2128_v54   ;;  %v6001_v54 = vpop.eup %3023  ;;  %v1513_v8 = vmul.f32 %v5989_v58, %v1512_v10  ;;  %3029 = vrsqrt.f32 %v6052_v51  ;;  %v1713_v10 = vmul.f32 %v1420_v19, %v1329_v55  ;;  %vm1488_vm10 = vweird.f32 %v5939_v27  ;;  %v1195_v19 = vpop.xlane.xlu1 %1194 }
 0x176   :  { %v1532_v0 = vmul.f32 %v6001_v54, %v5943_v60  ;;  %v1315_v25 = vmul.f32 0.0012755102, %v1195_v19  ;;  %v1486_v32 = vmul.f32 %v5939_v27, %v1485_v28  ;;  %v1480_v26 = vsel %vm6073_vm9, %v5919_v2, %v1476_v23 }
 0x177   :  { %v1514_v36 = vmul.f32 0.5, %v1513_v8  ;;  %vm1508_vm12 = vweird.f32 %v5968_v7  ;;  %vm1487_vm13 = vweird.f32 %v5897_v50  ;;  %vm1467_vm14 = vweird.f32 %v5928_v9  ;;  %v1177_v50 = vpop.xlane.xlu2 %1176 }
 0x178   :  { %vm1468_vm15 = vweird.f32 %v5984_v4  ;;  %v6101_v2 = vadd.f32 1e-05, %v1315_v25  ;;  %v1450_v45 = vsel %vm6091_vm11, %v5926_v47, %v1446_v29  ;;  %vm6110_vm1 = vmor %vm1487_vm13, %vm1488_vm10  ;;  %v1719_v23 = vmul.f32 %v1480_v26, %v1335_v53 }
 0x179   :  { %1775 = vperm.xlu1 %2996, %v1717_v37   ;;  %v6067_v16 = vpop.eup %3025  ;;  %v1490_v29 = vsel %vm6110_vm1, %v5939_v27, %v1486_v32  ;;  %vm6134_vm2 = vmor %vm1507_vm8, %vm1508_vm12  ;;  %vm1518_vm3 = vweird.f32 %v5989_v58  ;;  %vm1517_vm6 = vweird.f32 %v5933_v12  ;;  %vm1538_vm7 = vweird.f32 %v6001_v54 }
 0x17a   :  { %1750 = vperm.xlu2 %2998, %v1712_v15   ;;  %v1463_v15 = vmul.f32 %v5984_v4, %v1462_v5  ;;  %v1533_v5 = vmul.f32 %v6001_v54, %v1532_v0  ;;  %v6078_v61 = vpop.eup %3027  ;;  %v1505_v0 = vsub.f32 1.5, %v1504_v35  ;;  %v1492_v8 = vmul.f32 %v6067_v16, %v6007_v20  ;;  %vm6144_vm4 = vmor %vm1467_vm14, %vm1468_vm15 }
 0x17b   :  { %v6106_v37 = vpop.eup %3029  ;;  %v1515_v35 = vsub.f32 1.5, %v1514_v36  ;;  %3031 = vrsqrt.f32 %v6101_v2  ;;  %vm6173_vm8 = vmor %vm1517_vm6, %vm1518_vm3  ;;  %vm1497_vm9 = vweird.f32 %v6007_v20  ;;  %vm1498_vm10 = vweird.f32 %v6067_v16 }
 0x17c   :  { %v1542_v47 = vmul.f32 %v6106_v37, %v6052_v51  ;;  %v1493_v36 = vmul.f32 %v6067_v16, %v1492_v8  ;;  %vm1548_vm12 = vweird.f32 %v6106_v37  ;;  %vm6203_vm13 = vmor %vm1497_vm9, %vm1498_vm10  ;;  %vm1567_vm14 = vweird.f32 %v5999_v40 }
 0x17d   :  { %2181 = vperm.xlu0 %2997, %v2131_v43   ;;  %v1430_v43 = vsel %vm6043_vm5, %v5899_v41, %v1426_v59  ;;  %v1464_v59 = vmul.f32 0.5, %v1463_v15  ;;  %v1534_v15 = vmul.f32 0.5, %v1533_v5  ;;  %v1132_v5 = vpop.xlane.xlu0 %1131  ;;  %v1506_v41 = vmul.f32 %v5968_v7, %v1505_v0 }
 0x17e   :  { %v1714_v62 = vmul.f32 %v1430_v43, %v1330_v42  ;;  %v1562_v42 = vmul.f32 %v6078_v61, %v5999_v40  ;;  %v1332_v43 = vld [vmem:[%s7683_s1 + $0x28] sm:$0xff]  ;;  %v1543_v19 = vmul.f32 %v6106_v37, %v1542_v47  ;;  %v1516_v55 = vmul.f32 %v5989_v58, %v1515_v35 }
 0x17f   :  { %v1465_v28 = vsub.f32 1.5, %v1464_v59  ;;  %v1308_v59 = vmul.f32 0.0012755102, %v1132_v5  ;;  %v1716_v25 = vmul.f32 %v1450_v45, %v1332_v43  ;;  %v1535_v27 = vsub.f32 1.5, %v1534_v15  ;;  %v1338_v15 = vld [vmem:[%s7683_s1 + $0x58] sm:$0xff]  ;;  %v1344_v40 = vld [vmem:[%s7683_s1 + $0x88] sm:$0xff] }
 0x180   :  { %v1563_v13 = vmul.f32 %v6078_v61, %v1562_v42  ;;  %v1544_v26 = vmul.f32 0.5, %v1543_v19  ;;  %v1510_v9 = vsel %vm6134_vm2, %v5968_v7, %v1506_v41  ;;  %v1494_v45 = vmul.f32 0.5, %v1493_v36 }
 0x181   :  { %1785 = vperm.xlu1 %2996, %v1719_v23   ;;  %v6149_v32 = vadd.f32 1e-05, %v1308_v59  ;;  %v1466_v8 = vmul.f32 %v5984_v4, %v1465_v28  ;;  %v6160_v42 = vpop.eup %3031  ;;  %vm1537_vm5 = vweird.f32 %v5943_v60  ;;  %v1313_v35 = vmul.f32 0.0012755102, %v1177_v50  ;;  %v1334_v28 = vld [vmem:[%s7683_s1 + $0x38] sm:$0xff] }
 0x182   :  { %1760 = vperm.xlu2 %2998, %v1714_v62   ;;  %v1564_v23 = vmul.f32 0.5, %v1563_v13  ;;  %v1592_v12 = vmul.f32 %v6160_v42, %v6101_v2  ;;  %v1722_v47 = vmul.f32 %v1510_v9, %v1338_v15  ;;  %v1545_v5 = vsub.f32 1.5, %v1544_v26  ;;  %vm6197_vm11 = vmor %vm1537_vm5, %vm1538_vm7  ;;  %v1341_v26 = vld [vmem:[%s7683_s1 + $0x70] sm:$0xff] }
 0x183   :  { %3033 = vrsqrt.f32 %v6149_v32  ;;  %v1470_v7 = vsel %vm6144_vm4, %v5984_v4, %v1466_v8  ;;  %v1339_v4 = vld [vmem:[%s7683_s1 + $0x60] sm:$0xff]  ;;  %v1536_v41 = vmul.f32 %v6001_v54, %v1535_v27  ;;  %v1495_v36 = vsub.f32 1.5, %v1494_v45  ;;  %v1337_v45 = vld [vmem:[%s7683_s1 + $0x50] sm:$0xff] }
 0x184   :  { %v1718_v59 = vmul.f32 %v1470_v7, %v1334_v28  ;;  %v1593_v20 = vmul.f32 %v6160_v42, %v1592_v12  ;;  %v1546_v60 = vmul.f32 %v6106_v37, %v1545_v5  ;;  %vm1568_vm15 = vweird.f32 %v6078_v61 }
 0x185   :  { %1755 = vperm.xlu0 %2997, %v1713_v10   ;;  %v1336_v10 = vld [vmem:[%s7683_s1 + $0x48] sm:$0xff]  ;;  %v1496_v8 = vmul.f32 %v6067_v16, %v1495_v36  ;;  %vm1547_vm1 = vweird.f32 %v6052_v51  ;;  %vm1527_vm2 = vweird.f32 %v6149_v32  ;;  %vm6250_vm5 = vmor %vm1567_vm14, %vm1568_vm15  ;;  %vm1598_vm9 = vweird.f32 %v6160_v42 }
 0x186   :  { %v1720_v53 = vmul.f32 %v1490_v29, %v1336_v10  ;;  %v6179_v10 = vadd.f32 1e-05, %v1313_v35  ;;  %v1520_v29 = vsel %vm6173_vm8, %v5989_v58, %v1516_v55  ;;  %v1565_v58 = vsub.f32 1.5, %v1564_v23  ;;  %vm6229_vm3 = vmor %vm1547_vm1, %vm1548_vm12  ;;  %v1159_v43 = vpop.xlane.xlu0 %1158  ;;  %v1342_v23 = vld [vmem:[%s7683_s1 + $0x78] sm:$0xff] }
 0x187   :  { %v1723_v27 = vmul.f32 %v1520_v29, %v1339_v4  ;;  %v1540_v55 = vsel %vm6197_vm11, %v6001_v54, %v1536_v41  ;;  %v1594_v50 = vmul.f32 0.5, %v1593_v20  ;;  %v1500_v51 = vsel %vm6203_vm13, %v6067_v16, %v1496_v8 }
 0x188   :  { %3035 = vrsqrt.f32 %v6179_v10  ;;  %v1725_v35 = vmul.f32 %v1540_v55, %v1341_v26  ;;  %v1550_v12 = vsel %vm6229_vm3, %v6106_v37, %v1546_v60  ;;  %v1311_v4 = vmul.f32 0.0012755102, %v1159_v43 }
 0x189   :  { %1800 = vperm.xlu1 %2996, %v1722_v47   ;;  %v6191_v62 = vpop.eup %3033  ;;  %v1566_v47 = vmul.f32 %v6078_v61, %v1565_v58  ;;  %v1721_v16 = vmul.f32 %v1500_v51, %v1337_v45  ;;  %v1726_v19 = vmul.f32 %v1550_v12, %v1342_v23  ;;  %v1595_v58 = vsub.f32 1.5, %v1594_v50 }
 0x18a   :  { %1770 = vperm.xlu2 %2998, %v1716_v25   ;;  %v1222_v25 = vpop.xlane.xlu1 %1221  ;;  %v1522_v13 = vmul.f32 %v6191_v62, %v6149_v32  ;;  %vm1528_vm4 = vweird.f32 %v6191_v62  ;;  %vm1597_vm8 = vweird.f32 %v6101_v2  ;;  %vm1577_vm10 = vweird.f32 %v6179_v10 }
 0x18b   :  { %vm6258_vm6 = vmor %vm1527_vm2, %vm1528_vm4 }
 0x18c   :  { %v1523_v15 = vmul.f32 %v6191_v62, %v1522_v13  ;;  %vm6290_vm12 = vmor %vm1597_vm8, %vm1598_vm9 }
 0x18d   :  { %1790 = vperm.xlu0 %2997, %v1720_v53   ;;  %v1318_v53 = vmul.f32 0.0012755102, %v1222_v25  ;;  %v1570_v25 = vsel %vm6250_vm5, %v6078_v61, %v1566_v47  ;;  %v1204_v0 = vpop.xlane.xlu2 %1203  ;;  %v1347_v47 = vld [vmem:[%s7683_s1 + $0xa0] sm:$0xff] }
 0x18e   :  { %v3036_v28 = vpop.eup %3035  ;;  %v1524_v7 = vmul.f32 0.5, %v1523_v15  ;;  %v1316_v13 = vmul.f32 0.0012755102, %v1204_v0  ;;  %v1728_v55 = vmul.f32 %v1570_v25, %v1344_v40  ;;  %v1596_v15 = vmul.f32 %v6160_v42, %v1595_v58 }
 0x18f   :  { %v6222_v9 = vadd.f32 1e-05, %v1318_v53  ;;  %v1572_v5 = vmul.f32 %v3036_v28, %v6179_v10  ;;  %v1340_v53 = vld [vmem:[%s7683_s1 + $0x68] sm:$0xff]  ;;  %vm1578_vm7 = vweird.f32 %v3036_v28 }
 0x190   :  { %v1525_v41 = vsub.f32 1.5, %v1524_v7  ;;  %v6281_v8 = vadd.f32 1e-05, %v1316_v13  ;;  %vm1579_vm11 = vmor %vm1577_vm10, %vm1578_vm7  ;;  %v1350_v13 = vld [vmem:[%s7683_s1 + $0xb8] sm:$0xff] }
 0x191   :  { %3037 = vrsqrt.f32 %v6222_v9  ;;  %1815 = vperm.xlu1 %2996, %v1725_v35   ;;  %v1573_v36 = vmul.f32 %v3036_v28, %v1572_v5  ;;  %v1600_v5 = vsel %vm6290_vm12, %v6160_v42, %v1596_v15  ;;  %vm1627_vm13 = vweird.f32 %v6222_v9 }
 0x192   :  { %1780 = vperm.xlu2 %2998, %v1718_v59   ;;  %v1375_v59 = vadd.f32 1e-05, %v1311_v4  ;;  %v1526_v20 = vmul.f32 %v6191_v62, %v1525_v41  ;;  %vm1607_vm5 = vweird.f32 %v6281_v8 }
 0x194   :  { %3039 = vrsqrt.f32 %v1375_v59  ;;  %v1530_v60 = vsel %vm6258_vm6, %v6191_v62, %v1526_v20  ;;  %v1345_v62 = vld [vmem:[%s7683_s1 + $0x90] sm:$0xff]  ;;  %v1249_v7 = vpop.xlane.xlu1 %1248  ;;  %vm1557_vm15 = vweird.f32 %v1375_v59 }
 0x195   :  { %1805 = vperm.xlu0 %2997, %v1723_v27   ;;  %v1574_v27 = vmul.f32 0.5, %v1573_v36  ;;  %v1724_v50 = vmul.f32 %v1530_v60, %v1340_v53  ;;  %3041 = vrsqrt.f32 %v6281_v8  ;;  %v1321_v23 = vmul.f32 0.0012755102, %v1249_v7 }
 0x197   :  { %v6269_v32 = vpop.eup %3037  ;;  %v1575_v26 = vsub.f32 1.5, %v1574_v27  ;;  %v1385_v29 = vadd.f32 1e-05, %v1321_v23 }
 0x198   :  { %v1622_v61 = vmul.f32 %v6269_v32, %v6222_v9  ;;  %vm1628_vm14 = vweird.f32 %v6269_v32 }
 0x199   :  { %v1576_v54 = vmul.f32 %v3036_v28, %v1575_v26  ;;  %1830 = vperm.xlu1 %2996, %v1728_v55   ;;  %3043 = vrsqrt.f32 %v1385_v29  ;;  %vm6304_vm2 = vmor %vm1627_vm13, %vm1628_vm14  ;;  %vm1657_vm7 = vweird.f32 %v1385_v29 }
 0x19a   :  { %1795 = vperm.xlu2 %2998, %v1721_v16   ;;  %v1623_v45 = vmul.f32 %v6269_v32, %v1622_v61  ;;  %v3040_v2 = vpop.eup %3039 }
 0x19b   :  { %v1580_v10 = vsel %vm1579_vm11, %v3036_v28, %v1576_v54  ;;  %v1552_v43 = vmul.f32 %v3040_v2, %v1375_v59  ;;  %v1731_v28 = vmul.f32 %v1600_v5, %v1347_v47  ;;  %v3042_v41 = vpop.eup %3041  ;;  %vm1558_vm1 = vweird.f32 %v3040_v2  ;;  %v1186_v37 = vpop.xlane.xlu0 %1185  ;;  %v1343_v59 = vld [vmem:[%s7683_s1 + $0x80] sm:$0xff] }
 0x19c   :  { %v1624_v35 = vmul.f32 0.5, %v1623_v45  ;;  %v1729_v12 = vmul.f32 %v1580_v10, %v1345_v62  ;;  %v1602_v42 = vmul.f32 %v3042_v41, %v6281_v8  ;;  %v1314_v58 = vmul.f32 0.0012755102, %v1186_v37  ;;  %vm6309_vm3 = vmor %vm1557_vm15, %vm1558_vm1 }
 0x19d   :  { %1820 = vperm.xlu0 %2997, %v1726_v19   ;;  %v1553_v16 = vmul.f32 %v3040_v2, %v1552_v43  ;;  %vm1608_vm4 = vweird.f32 %v3042_v41 }
 0x19e   :  { %v1625_v4 = vsub.f32 1.5, %v1624_v35  ;;  %v1603_v40 = vmul.f32 %v3042_v41, %v1602_v42  ;;  %v1378_v27 = vadd.f32 1e-05, %v1314_v58  ;;  %v1348_v35 = vld [vmem:[%s7683_s1 + $0xa8] sm:$0xff]  ;;  %vm1609_vm6 = vmor %vm1607_vm5, %vm1608_vm4 }
 0x19f   :  { %v1554_v36 = vmul.f32 0.5, %v1553_v16  ;;  %v3044_v26 = vpop.eup %3043 }
 0x1a0   :  { %v1626_v19 = vmul.f32 %v6269_v32, %v1625_v4  ;;  %v1604_v60 = vmul.f32 0.5, %v1603_v40  ;;  %3045 = vrsqrt.f32 %v1378_v27  ;;  %v1652_v45 = vmul.f32 %v3044_v26, %v1385_v29 }
 0x1a1   :  { %1845 = vperm.xlu1 %2996, %v1731_v28   ;;  %v1555_v9 = vsub.f32 1.5, %v1554_v36  ;;  %vm1658_vm8 = vweird.f32 %v3044_v26  ;;  %v1353_v28 = vld [vmem:[%s7683_s1 + $0xd0] sm:$0xff]  ;;  %vm1587_vm10 = vweird.f32 %v1378_v27 }
 0x1a2   :  { %1810 = vperm.xlu2 %2998, %v1724_v50   ;;  %v1630_v53 = vsel %vm6304_vm2, %v6269_v32, %v1626_v19  ;;  %v1231_v61 = vpop.xlane.xlu2 %1230  ;;  %v1605_v15 = vsub.f32 1.5, %v1604_v60  ;;  %v1653_v32 = vmul.f32 %v3044_v26, %v1652_v45  ;;  %vm1659_vm9 = vmor %vm1657_vm7, %vm1658_vm8 }
 0x1a3   :  { %v1556_v0 = vmul.f32 %v3040_v2, %v1555_v9  ;;  %v1319_v62 = vmul.f32 0.0012755102, %v1231_v61  ;;  %v1734_v54 = vmul.f32 %v1630_v53, %v1350_v13 }
 0x1a4   :  { %v1606_v7 = vmul.f32 %v3042_v41, %v1605_v15  ;;  %v1654_v43 = vmul.f32 0.5, %v1653_v32 }
 0x1a5   :  { %1835 = vperm.xlu0 %2997, %v1729_v12   ;;  %v1560_v55 = vsel %vm6309_vm3, %v3040_v2, %v1556_v0  ;;  %v1383_v51 = vadd.f32 1e-05, %v1319_v62  ;;  %v1346_v0 = vld [vmem:[%s7683_s1 + $0x98] sm:$0xff] }
 0x1a6   :  { %v1727_v50 = vmul.f32 %v1560_v55, %v1343_v59  ;;  %v3046_v10 = vpop.eup %3045  ;;  %v1610_v23 = vsel %vm1609_vm6, %v3042_v41, %v1606_v7  ;;  %v1655_v4 = vsub.f32 1.5, %v1654_v43 }
 0x1a7   :  { %3047 = vrsqrt.f32 %v1383_v51  ;;  %v1582_v12 = vmul.f32 %v3046_v10, %v1378_v27  ;;  %v1732_v5 = vmul.f32 %v1610_v23, %v1348_v35  ;;  %vm1588_vm11 = vweird.f32 %v3046_v10 }
 0x1a8   :  { %v1656_v36 = vmul.f32 %v3044_v26, %v1655_v4  ;;  %vm1589_vm12 = vmor %vm1587_vm10, %vm1588_vm11  ;;  %vm1637_vm14 = vweird.f32 %v1383_v51 }
 0x1a9   :  { %1860 = vperm.xlu1 %2996, %v1734_v54   ;;  %v1276_v2 = vpop.xlane.xlu1 %1275  ;;  %v1583_v8 = vmul.f32 %v3046_v10, %v1582_v12  ;;  %v1351_v54 = vld [vmem:[%s7683_s1 + $0xc0] sm:$0xff] }
 0x1aa   :  { %1825 = vperm.xlu2 %2998, %v1727_v50   ;;  %v1324_v47 = vmul.f32 0.0012755102, %v1276_v2  ;;  %v1660_v58 = vsel %vm1659_vm9, %v3044_v26, %v1656_v36 }
 0x1ab   :  { %v1584_v37 = vmul.f32 0.5, %v1583_v8  ;;  %v1737_v9 = vmul.f32 %v1660_v58, %v1353_v28 }
 0x1ac   :  { %v1388_v16 = vadd.f32 1e-05, %v1324_v47 }
 0x1ad   :  { %1850 = vperm.xlu0 %2997, %v1732_v5   ;;  %v3048_v19 = vpop.eup %3047  ;;  %v1585_v29 = vsub.f32 1.5, %v1584_v37 }
 0x1ae   :  { %3049 = vrsqrt.f32 %v1388_v16  ;;  %v1632_v20 = vmul.f32 %v3048_v19, %v1383_v51  ;;  %vm1638_vm13 = vweird.f32 %v3048_v19  ;;  %vm1687_vm1 = vweird.f32 %v1388_v16  ;;  %v1356_v51 = vld [vmem:[%s7683_s1 + $0xe8] sm:$0xff] }
 0x1af   :  { %v1586_v13 = vmul.f32 %v3046_v10, %v1585_v29  ;;  %vm1639_vm15 = vmor %vm1637_vm14, %vm1638_vm13  ;;  %v1349_v29 = vld [vmem:[%s7683_s1 + $0xb0] sm:$0xff] }
 0x1b0   :  { %v1213_v41 = vpop.xlane.xlu0 %1212  ;;  %v1633_v25 = vmul.f32 %v3048_v19, %v1632_v20 }
 0x1b1   :  { %v1317_v42 = vmul.f32 0.0012755102, %v1213_v41  ;;  %1875 = vperm.xlu1 %2996, %v1737_v9   ;;  %v1590_v59 = vsel %vm1589_vm12, %v3046_v10, %v1586_v13 }
 0x1b2   :  { %v1634_v53 = vmul.f32 0.5, %v1633_v25  ;;  %v1730_v26 = vmul.f32 %v1590_v59, %v1346_v0 }
 0x1b3   :  { %v1381_v40 = vadd.f32 1e-05, %v1317_v42 }
 0x1b4   :  { %v3050_v27 = vpop.eup %3049  ;;  %v1635_v15 = vsub.f32 1.5, %v1634_v53  ;;  %1840 = vperm.xlu2 %2998, %v1730_v26  }
 0x1b5   :  { %3051 = vrsqrt.f32 %v1381_v40  ;;  %v1682_v61 = vmul.f32 %v3050_v27, %v1388_v16  ;;  %vm1688_vm2 = vweird.f32 %v3050_v27  ;;  %vm1617_vm4 = vweird.f32 %v1381_v40 }
 0x1b6   :  { %v1636_v50 = vmul.f32 %v3048_v19, %v1635_v15  ;;  %vm1689_vm3 = vmor %vm1687_vm1, %vm1688_vm2  ;;  %v2133_v15 = vld [vmem:[%s7682_s2 + $0x30] sm:$0xff] }
 0x1b7   :  { %v1683_v45 = vmul.f32 %v3050_v27, %v1682_v61 }
 0x1b8   :  { %v1640_v2 = vsel %vm1639_vm15, %v3048_v19, %v1636_v50 }
 0x1b9   :  { %v1684_v35 = vmul.f32 0.5, %v1683_v45  ;;  %v1735_v12 = vmul.f32 %v1640_v2, %v1351_v54  ;;  %v1354_v54 = vld [vmem:[%s7683_s1 + $0xd8] sm:$0xff] }
 0x1ba   :  { %v1258_v60 = vpop.xlane.xlu2 %1257 }
 0x1bb   :  { %v1322_v55 = vmul.f32 0.0012755102, %v1258_v60  ;;  %v3052_v32 = vpop.eup %3051  ;;  %v1685_v23 = vsub.f32 1.5, %v1684_v35  ;;  %1865 = vperm.xlu0 %2997, %v1735_v12  }
 0x1bc   :  { %v1612_v10 = vmul.f32 %v3052_v32, %v1381_v40  ;;  %vm1618_vm5 = vweird.f32 %v3052_v32 }
 0x1bd   :  { %v1386_v62 = vadd.f32 1e-05, %v1322_v55  ;;  %v1686_v4 = vmul.f32 %v3050_v27, %v1685_v23  ;;  %vm1619_vm6 = vmor %vm1617_vm4, %vm1618_vm5 }
 0x1be   :  { %v1613_v47 = vmul.f32 %v3052_v32, %v1612_v10 }
 0x1bf   :  { %3053 = vrsqrt.f32 %v1386_v62  ;;  %v1240_v7 = vpop.xlane.xlu0 %1239  ;;  %v1690_v41 = vsel %vm1689_vm3, %v3050_v27, %v1686_v4  ;;  %vm1667_vm8 = vweird.f32 %v1386_v62 }
 0x1c0   :  { %v1320_v43 = vmul.f32 0.0012755102, %v1240_v7  ;;  %v1614_v8 = vmul.f32 0.5, %v1613_v47  ;;  %v1740_v42 = vmul.f32 %v1690_v41, %v1356_v51  ;;  %v1352_v51 = vld [vmem:[%s7683_s1 + $0xc8] sm:$0xff] }
 0x1c1   :  { %v2136_v41 = vld [vmem:[%s7682_s2 + $0x48] sm:$0xff] }
 0x1c2   :  { %v1384_v5 = vadd.f32 1e-05, %v1320_v43  ;;  %v1615_v19 = vsub.f32 1.5, %v1614_v8  ;;  %1890 = vperm.xlu1 %2996, %v1740_v42  }
 0x1c4   :  { %3055 = vrsqrt.f32 %v1384_v5  ;;  %v1616_v9 = vmul.f32 %v3052_v32, %v1615_v19  ;;  %vm1647_vm10 = vweird.f32 %v1384_v5 }
 0x1c5   :  { %v1285_v28 = vpop.xlane.xlu2 %1284  ;;  %v3054_v36 = vpop.eup %3053 }
 0x1c6   :  { %v1325_v37 = vmul.f32 0.0012755102, %v1285_v28  ;;  %v1662_v16 = vmul.f32 %v3054_v36, %v1386_v62  ;;  %v1620_v13 = vsel %vm1619_vm6, %v3052_v32, %v1616_v9  ;;  %vm1668_vm7 = vweird.f32 %v3054_v36  ;;  %v1357_v9 = vld [vmem:[%s7683_s1 + $0xf0] sm:$0xff] }
 0x1c7   :  { %v1733_v27 = vmul.f32 %v1620_v13, %v1349_v29  ;;  %v6348_v45 = vpop.permute.xlu1 %2161  ;;  %vm1669_vm9 = vmor %vm1667_vm8, %vm1668_vm7 }
 0x1c8   :  { %v1389_v58 = vadd.f32 1e-05, %v1325_v37  ;;  %v1663_v20 = vmul.f32 %v3054_v36, %v1662_v16 }
 0x1c9   :  { %1855 = vperm.xlu2 %2998, %v1733_v27  }
 0x1ca   :  { %3057 = vrsqrt.f32 %v1389_v58  ;;  %v3056_v40 = vpop.eup %3055  ;;  %v1664_v25 = vmul.f32 0.5, %v1663_v20  ;;  %2191 = vperm.xlu1 %2996, %v2133_v15   ;;  %vm1697_vm14 = vweird.f32 %v1389_v58 }
 0x1cb   :  { %v1642_v53 = vmul.f32 %v3056_v40, %v1384_v5  ;;  %vm1648_vm11 = vweird.f32 %v3056_v40 }
 0x1cc   :  { %v1267_v0 = vpop.xlane.xlu0 %1266  ;;  %v1665_v59 = vsub.f32 1.5, %v1664_v25  ;;  %vm6353_vm12 = vmor %vm1647_vm10, %vm1648_vm11 }
 0x1cd   :  { %v1323_v60 = vmul.f32 0.0012755102, %v1267_v0  ;;  %v6343_v61 = vpop.permute.xlu2 %2171  ;;  %v1643_v55 = vmul.f32 %v3056_v40, %v1642_v53 }
 0x1ce   :  { %v1666_v50 = vmul.f32 %v3054_v36, %v1665_v59 }
 0x1cf   :  { %v1387_v26 = vadd.f32 1e-05, %v1323_v60  ;;  %v1644_v35 = vmul.f32 0.5, %v1643_v55  ;;  %v6367_v16 = vpop.permute.xlu1 %2176 }
 0x1d0   :  { %v3058_v32 = vpop.eup %3057  ;;  %v1670_v10 = vsel %vm1669_vm9, %v3054_v36, %v1666_v50 }
 0x1d1   :  { %3059 = vrsqrt.f32 %v1387_v26  ;;  %v1692_v7 = vmul.f32 %v3058_v32, %v1389_v58  ;;  %v1645_v43 = vsub.f32 1.5, %v1644_v35  ;;  %v1738_v2 = vmul.f32 %v1670_v10, %v1354_v54  ;;  %v2139_v58 = vld [vmem:[%s7682_s2 + $0x60] sm:$0xff] }
 0x1d2   :  { %vm1698_vm13 = vweird.f32 %v3058_v32  ;;  %2206 = vperm.xlu1 %2996, %v2136_v41   ;;  %vm1677_vm1 = vweird.f32 %v1387_v26 }
 0x1d3   :  { %v1693_v23 = vmul.f32 %v3058_v32, %v1692_v7  ;;  %1880 = vperm.xlu0 %2997, %v1738_v2   ;;  %v1646_v5 = vmul.f32 %v3056_v40, %v1645_v43  ;;  %vm1699_vm15 = vmor %vm1697_vm14, %vm1698_vm13 }
 0x1d4   :  { %v1294_v62 = vpop.xlane.xlu0 %1293 }
 0x1d5   :  { %v1326_v47 = vmul.f32 0.0012755102, %v1294_v62  ;;  %v1694_v4 = vmul.f32 0.5, %v1693_v23  ;;  %v6360_v8 = vpop.permute.xlu2 %2186  ;;  %v1650_v37 = vsel %vm6353_vm12, %v3056_v40, %v1646_v5 }
 0x1d6   :  { %v1736_v20 = vmul.f32 %v1650_v37, %v1352_v51 }
 0x1d7   :  { %v3060_v28 = vpop.eup %3059  ;;  %v1390_v36 = vadd.f32 1e-05, %v1326_v47  ;;  %v1695_v19 = vsub.f32 1.5, %v1694_v4 }
 0x1d8   :  { %v1672_v42 = vmul.f32 %v3060_v28, %v1387_v26  ;;  %1870 = vperm.xlu2 %2998, %v1736_v20   ;;  %vm1678_vm2 = vweird.f32 %v3060_v28  ;;  %v1355_v26 = vld [vmem:[%s7683_s1 + $0xe0] sm:$0xff]  ;;  %v1358_v20 = vld [vmem:[%s7683_s1 + $0xf8] sm:$0xff] }
 0x1d9   :  { %3061 = vrsqrt.f32 %v1390_v36  ;;  %v1696_v25 = vmul.f32 %v3058_v32, %v1695_v19  ;;  %vm6372_vm3 = vmor %vm1677_vm1, %vm1678_vm2  ;;  %vm1707_vm4 = vweird.f32 %v1390_v36  ;;  %v8125_v19 = vld [vmem:[#allocation16_spill] sm:$0xff] }
 0x1da   :  { %v1673_v29 = vmul.f32 %v3060_v28, %v1672_v42  ;;  %2221 = vperm.xlu1 %2996, %v2139_v58  }
 0x1db   :  { %v1700_v0 = vsel %vm1699_vm15, %v3058_v32, %v1696_v25  ;;  %v6382_v54 = vpop.permute.xlu1 %1745 }
 0x1dc   :  { %v1674_v40 = vmul.f32 0.5, %v1673_v29  ;;  %v1741_v13 = vmul.f32 %v1700_v0, %v1357_v9  ;;  %v1903_v50 = vmul.f32 %v6382_v54, %v4130_v24  ;;  %v1904_v32 = vmul.f32 %v6382_v54, %v4133_v31  ;;  %v2134_v31 = vld [vmem:[%s7682_s2 + $0x38] sm:$0xff] }
 0x1dd   :  { %v1751_v60 = vpop.permute.xlu2 %1750  ;;  %v1905_v43 = vmul.f32 %v6382_v54, %v4136_v11 }
 0x1de   :  { %v1675_v53 = vsub.f32 1.5, %v1674_v40  ;;  %1895 = vperm.xlu0 %2997, %v1741_v13   ;;  %v1910_v10 = vmul.f32 %v1751_v60, %v4251_v52  ;;  %v1911_v23 = vmul.f32 %v1751_v60, %v4258_v22  ;;  %v1912_v12 = vmul.f32 %v1751_v60, %v4263_v48 }
 0x1df   :  { %v3062_v27 = vpop.eup %3061  ;;  %v2319_v62 = vadd.f32 %v6348_v45, %v1903_v50  ;;  %v2320_v47 = vadd.f32 %v6348_v45, %v1904_v32  ;;  %v2321_v52 = vadd.f32 %v6348_v45, %v1905_v43  ;;  %v1913_v11 = vmul.f32 %v1751_v60, %v4268_v34 }
 0x1e0   :  { %v1702_v55 = vmul.f32 %v3062_v27, %v1390_v36  ;;  %v1676_v15 = vmul.f32 %v3060_v28, %v1675_v53  ;;  %vm1708_vm5 = vweird.f32 %v3062_v27  ;;  %v1914_v51 = vmul.f32 %v1751_v60, %v4275_v49 }
 0x1e1   :  { %v1915_v22 = vmul.f32 %v1751_v60, %v4290_v6  ;;  %v1916_v48 = vmul.f32 %v1751_v60, %v4280_v1  ;;  %v2544_v37 = vmax.f32 %v2320_v47, 0.0  ;;  %v2545_v41 = vmax.f32 %v2321_v52, 0.0  ;;  %vm6407_vm6 = vmor %vm1707_vm4, %vm1708_vm5  ;;  %v2145_v52 = vld [vmem:[%s7682_s2 + $0x90] sm:$0xff] }
 0x1e2   :  { %v1703_v35 = vmul.f32 %v3062_v27, %v1702_v55  ;;  %v1680_v7 = vsel %vm6372_vm3, %v3060_v28, %v1676_v15  ;;  %v2543_v28 = vmax.f32 %v2319_v62, 0.0  ;;  %v2137_v55 = vld [vmem:[%s7682_s2 + $0x50] sm:$0xff]  ;;  %v1908_v47 = vmul.f32 %v6382_v54, %v4150_v17  ;;  %v2135_v17 = vld [vmem:[%s7682_s2 + $0x40] sm:$0xff] }
 0x1e3   :  { %v1739_v2 = vmul.f32 %v1680_v7, %v1355_v26  ;;  %2768 = vst [vmem:[%s7684_s3 + $0x8] sm:$0xff] %v2544_v37 }
 0x1e4   :  { %v1704_v24 = vmul.f32 0.5, %v1703_v35  ;;  %2767 = vst [vmem:[%s7684_s3] sm:$0xff] %v2543_v28 }
 0x1e5   :  { %1885 = vperm.xlu2 %2998, %v1739_v2   ;;  %v1761_v4 = vpop.permute.xlu2 %1760  ;;  %2769 = vst [vmem:[%s7684_s3 + $0x10] sm:$0xff] %v2545_v41 }
 0x1e6   :  { %v1705_v5 = vsub.f32 1.5, %v1704_v24  ;;  %2196 = vperm.xlu0 %2997, %v2134_v31   ;;  %v1924_v34 = vmul.f32 %v1761_v4, %v4207_v39  ;;  %v1925_v49 = vmul.f32 %v1761_v4, %v4212_v21  ;;  %v1926_v6 = vmul.f32 %v1761_v4, %v4215_v14  ;;  %v2142_v14 = vld [vmem:[%s7682_s2 + $0x78] sm:$0xff]  ;;  %v6461_v31 = vpop.permute.xlu1 %1765 }
 0x1e7   :  { %v2167_v42 = vpop.permute.xlu0 %2166  ;;  %v1927_v1 = vmul.f32 %v1761_v4, %v4218_v30  ;;  %2236 = vperm.xlu1 %2996, %v2142_v14   ;;  %v1929_v15 = vmul.f32 %v1761_v4, %v4235_v63  ;;  %v1930_v50 = vmul.f32 %v1761_v4, %v4230_v44  ;;  %v1906_v44 = vmul.f32 %v6382_v54, %v4141_v38 }
 0x1e8   :  { %v1706_v29 = vmul.f32 %v3062_v27, %v1705_v5  ;;  %v2326_v36 = vadd.f32 %v2167_v42, %v1910_v10  ;;  %v2327_v9 = vadd.f32 %v2167_v42, %v1911_v23  ;;  %v2328_v25 = vadd.f32 %v2167_v42, %v1912_v12 }
 0x1e9   :  { %v2329_v40 = vadd.f32 %v2167_v42, %v1913_v11  ;;  %v2330_v39 = vadd.f32 %v2167_v42, %v1914_v51  ;;  %v2331_v0 = vadd.f32 %v2167_v42, %v1915_v22  ;;  %v2332_v21 = vadd.f32 %v2167_v42, %v1916_v48 }
 0x1ea   :  { %v1710_v30 = vsel %vm6407_vm6, %v3062_v27, %v1706_v29  ;;  %v2550_v13 = vmax.f32 %v2326_v36, 0.0  ;;  %v2551_v53 = vmax.f32 %v2327_v9, 0.0  ;;  %v2552_v60 = vmax.f32 %v2328_v25, 0.0 }
 0x1eb   :  { %v1742_v59 = vmul.f32 %v1710_v30, %v1358_v20  ;;  %v2553_v58 = vmax.f32 %v2329_v40, 0.0  ;;  %v2554_v26 = vmax.f32 %v2330_v39, 0.0  ;;  %v1928_v27 = vmul.f32 %v1761_v4, %v4227_v3  ;;  %v8127_v20 = vld [vmem:[#allocation19_spill] sm:$0xff]  ;;  %v8128_v40 = vld [vmem:[#allocation18_spill] sm:$0xff] }
 0x1ec   :  { %2774 = vst [vmem:[%s7684_s3 + $0x38] sm:$0xff] %v2550_v13  ;;  %v2555_v32 = vmax.f32 %v2331_v0, 0.0  ;;  %v2340_v35 = vadd.f32 %v6367_v16, %v1924_v34  ;;  %v2341_v7 = vadd.f32 %v6367_v16, %v1925_v49  ;;  %v2342_v10 = vadd.f32 %v6367_v16, %v1926_v6  ;;  %v8126_v49 = vld [vmem:[#allocation17_spill] sm:$0xff]  ;;  %v8129_v30 = vld [vmem:[#allocation6_spill] sm:$0xff] }
 0x1ed   :  { %1900 = vperm.xlu2 %2998, %v1742_v59   ;;  %2775 = vst [vmem:[%s7684_s3 + $0x40] sm:$0xff] %v2551_v53  ;;  %v2556_v43 = vmax.f32 %v2332_v21, 0.0  ;;  %v2343_v3 = vadd.f32 %v6367_v16, %v1927_v1  ;;  %v1771_v63 = vpop.permute.xlu2 %1770  ;;  %v2344_v2 = vadd.f32 %v6367_v16, %v1928_v27  ;;  %v1907_v24 = vmul.f32 %v6382_v54, %v4144_v33  ;;  %v2138_v59 = vld [vmem:[%s7682_s2 + $0x58] sm:$0xff] }
 0x1ee   :  { %2776 = vst [vmem:[%s7684_s3 + $0x48] sm:$0xff] %v2552_v60  ;;  %2211 = vperm.xlu0 %2997, %v2137_v55   ;;  %v2564_v23 = vmax.f32 %v2340_v35, 0.0  ;;  %v2345_v38 = vadd.f32 %v6367_v16, %v1929_v15  ;;  %v2565_v62 = vmax.f32 %v2341_v7, 0.0  ;;  %v2346_v33 = vadd.f32 %v6367_v16, %v1930_v50  ;;  %v6515_v9 = vpop.permute.xlu1 %1775  ;;  %v2148_v60 = vld [vmem:[%s7682_s2 + $0xa8] sm:$0xff]  ;;  %v2143_v7 = vld [vmem:[%s7682_s2 + $0x80] sm:$0xff] }
 0x1ef   :  { %2777 = vst [vmem:[%s7684_s3 + $0x50] sm:$0xff] %v2553_v58  ;;  %v6457_v12 = vpop.permute.xlu0 %2181  ;;  %v2566_v11 = vmax.f32 %v2342_v10, 0.0  ;;  %v1909_v51 = vmul.f32 %v6382_v54, %v4153_v18  ;;  %v2567_v22 = vmax.f32 %v2343_v3, 0.0  ;;  %v2322_v48 = vadd.f32 %v6348_v45, %v1906_v44  ;;  %2251 = vperm.xlu1 %2996, %v2145_v52   ;;  %v2140_v54 = vld [vmem:[%s7682_s2 + $0x68] sm:$0xff]  ;;  %v8132_v3 = vld [vmem:[#allocation9_spill] sm:$0xff] }
 0x1f0   :  { %2778 = vst [vmem:[%s7684_s3 + $0x58] sm:$0xff] %v2554_v26  ;;  %v1938_v5 = vmul.f32 %v1771_v63, %v4167_v46  ;;  %v2568_v4 = vmax.f32 %v2344_v2, 0.0  ;;  %v2323_v18 = vadd.f32 %v6348_v45, %v1907_v24  ;;  %v1939_v16 = vmul.f32 %v1771_v63, %v4172_v56  ;;  %v8130_v26 = vld [vmem:[#allocation7_spill] sm:$0xff]  ;;  %v8133_v2 = vld [vmem:[#allocation10_spill] sm:$0xff] }
 0x1f1   :  { %2779 = vst [vmem:[%s7684_s3 + $0x60] sm:$0xff] %v2555_v32  ;;  %v2569_v28 = vmax.f32 %v2345_v38, 0.0  ;;  %v2324_v46 = vadd.f32 %v6348_v45, %v1908_v47  ;;  %v1940_v37 = vmul.f32 %v1771_v63, %v4175_v57  ;;  %v2570_v41 = vmax.f32 %v2346_v33, 0.0  ;;  %v8131_v32 = vld [vmem:[#allocation8_spill] sm:$0xff]  ;;  %v8135_v33 = vld [vmem:[#allocation11_spill] sm:$0xff] }
 0x1f2   :  { %2780 = vst.msk [vmem:[%s7684_s3 + $0x68] sm:$0xff] %vm243_vm0, %v2556_v43  ;;  %v2325_v56 = vadd.f32 %v6348_v45, %v1909_v51  ;;  %v1941_v42 = vmul.f32 %v1771_v63, %v8125_v19  ;;  %v2546_v34 = vmax.f32 %v2322_v48, 0.0  ;;  %v1942_v6 = vmul.f32 %v1771_v63, %v8126_v49 }
 0x1f3   :  { %2788 = vst [vmem:[%s7684_s3 + $0xa8] sm:$0xff] %v2564_v23  ;;  %v2354_v1 = vadd.f32 %v6360_v8, %v1938_v5  ;;  %v2547_v57 = vmax.f32 %v2323_v18, 0.0  ;;  %v1943_v29 = vmul.f32 %v1771_v63, %v8127_v20  ;;  %v2355_v45 = vadd.f32 %v6360_v8, %v1939_v16  ;;  %v8136_v5 = vld [vmem:[#allocation2_spill] sm:$0xff] }
 0x1f4   :  { %2789 = vst [vmem:[%s7684_s3 + $0xb0] sm:$0xff] %v2565_v62  ;;  %v2548_v25 = vmax.f32 %v2324_v46, 0.0  ;;  %v1944_v39 = vmul.f32 %v1771_v63, %v8128_v40  ;;  %v2356_v0 = vadd.f32 %v6360_v8, %v1940_v37  ;;  %v2549_v21 = vmax.f32 %v2325_v56, 0.0  ;;  %v8138_v56 = vld [vmem:[#allocation4_spill] sm:$0xff]  ;;  %v8141_v40 = vld [vmem:[#allocation13_spill] sm:$0xff] }
 0x1f5   :  { %2201 = vperm.xlu2 %2998, %v2135_v17   ;;  %2790 = vst [vmem:[%s7684_s3 + $0xb8] sm:$0xff] %v2566_v11  ;;  %v2357_v14 = vadd.f32 %v6360_v8, %v1941_v42  ;;  %v6528_v53 = vpop.permute.xlu2 %1780  ;;  %v2358_v58 = vadd.f32 %v6360_v8, %v1942_v6  ;;  %v2578_v55 = vmax.f32 %v2354_v1, 0.0  ;;  %v2359_v15 = vadd.f32 %v6360_v8, %v1943_v29  ;;  %v2151_v42 = vld [vmem:[%s7682_s2 + $0xc0] sm:$0xff]  ;;  %v8139_v6 = vld [vmem:[#allocation5_spill] sm:$0xff] }
 0x1f6   :  { %2791 = vst [vmem:[%s7684_s3 + $0xc0] sm:$0xff] %v2567_v22  ;;  %2226 = vperm.xlu0 %2997, %v2140_v54   ;;  %v2579_v50 = vmax.f32 %v2355_v45, 0.0  ;;  %v2360_v10 = vadd.f32 %v6360_v8, %v1944_v39  ;;  %v2580_v43 = vmax.f32 %v2356_v0, 0.0  ;;  %v8134_v8 = vld [vmem:[#allocation14_spill] sm:$0xff]  ;;  %v6570_v17 = vpop.permute.xlu1 %1785  ;;  %v8137_v54 = vld [vmem:[#allocation3_spill] sm:$0xff]  ;;  %v1933_v19 = vmul.f32 %v6461_v31, %v8138_v56  ;;  %v2146_v29 = vld [vmem:[%s7682_s2 + $0x98] sm:$0xff] }
 0x1f7   :  { %2792 = vst [vmem:[%s7684_s3 + $0xc8] sm:$0xff] %v2568_v4  ;;  %v1756_v36 = vpop.permute.xlu0 %1755  ;;  %2266 = vperm.xlu1 %2996, %v2148_v60   ;;  %v2581_v63 = vmax.f32 %v2357_v14, 0.0  ;;  %v2582_v38 = vmax.f32 %v2358_v58, 0.0  ;;  %v2583_v52 = vmax.f32 %v2359_v15, 0.0  ;;  %v1931_v4 = vmul.f32 %v6461_v31, %v8136_v5  ;;  %v8140_v45 = vld [vmem:[#allocation12_spill] sm:$0xff]  ;;  %v8142_v14 = vld [vmem:[#allocation15_spill] sm:$0xff] }
 0x1f8   :  { %2793 = vst [vmem:[%s7684_s3 + $0xd0] sm:$0xff] %v2569_v28  ;;  %v1917_v13 = vmul.f32 %v1756_v36, %v8129_v30  ;;  %v1918_v27 = vmul.f32 %v1756_v36, %v8130_v26  ;;  %v1919_v35 = vmul.f32 %v1756_v36, %v8131_v32  ;;  %v1920_v44 = vmul.f32 %v1756_v36, %v8132_v3  ;;  %v2144_v15 = vld [vmem:[%s7682_s2 + $0x88] sm:$0xff]  ;;  %v2158_v5 = vld [vmem:[%s7682_s2 + $0xf8] sm:$0xff] }
 0x1f9   :  { %2794 = vst.msk [vmem:[%s7684_s3 + $0xd8] sm:$0xff] %vm243_vm0, %v2570_v41  ;;  %v1921_v23 = vmul.f32 %v1756_v36, %v8133_v2  ;;  %v1922_v62 = vmul.f32 %v1756_v36, %v8134_v8  ;;  %v1923_v11 = vmul.f32 %v1756_v36, %v8135_v33  ;;  %v2584_v22 = vmax.f32 %v2360_v10, 0.0  ;;  %v2141_v41 = vld [vmem:[%s7682_s2 + $0x70] sm:$0xff]  ;;  %v2155_v33 = vld [vmem:[%s7682_s2 + $0xe0] sm:$0xff] }
 0x1fa   :  { %2770 = vst [vmem:[%s7684_s3 + $0x18] sm:$0xff] %v2546_v34  ;;  %v2333_v24 = vadd.f32 %v6343_v61, %v1917_v13  ;;  %v2334_v47 = vadd.f32 %v6343_v61, %v1918_v27  ;;  %v2335_v51 = vadd.f32 %v6343_v61, %v1919_v35  ;;  %v2336_v48 = vadd.f32 %v6343_v61, %v1920_v44  ;;  %v2154_v35 = vld [vmem:[%s7682_s2 + $0xd8] sm:$0xff] }
 0x1fb   :  { %2771 = vst [vmem:[%s7684_s3 + $0x20] sm:$0xff] %v2547_v57  ;;  %v2337_v18 = vadd.f32 %v6343_v61, %v1921_v23  ;;  %v1932_v28 = vmul.f32 %v6461_v31, %v8137_v54  ;;  %v2338_v46 = vadd.f32 %v6343_v61, %v1922_v62  ;;  %v2339_v34 = vadd.f32 %v6343_v61, %v1923_v11  ;;  %v2147_v23 = vld [vmem:[%s7682_s2 + $0xa0] sm:$0xff] }
 0x1fc   :  { %2772 = vst [vmem:[%s7684_s3 + $0x28] sm:$0xff] %v2548_v25  ;;  %v2557_v16 = vmax.f32 %v2333_v24, 0.0  ;;  %v2558_v37 = vmax.f32 %v2334_v47, 0.0  ;;  %v2559_v49 = vmax.f32 %v2335_v51, 0.0  ;;  %v1934_v1 = vmul.f32 %v6461_v31, %v8139_v6  ;;  %v2157_v24 = vld [vmem:[%s7682_s2 + $0xf0] sm:$0xff] }
 0x1fd   :  { %2216 = vperm.xlu2 %2998, %v2138_v59   ;;  %2773 = vst.msk [vmem:[%s7684_s3 + $0x30] sm:$0xff] %vm243_vm0, %v2549_v21  ;;  %v6602_v57 = vpop.permute.xlu2 %1795  ;;  %v2560_v20 = vmax.f32 %v2336_v48, 0.0  ;;  %v1935_v36 = vmul.f32 %v6461_v31, %v8140_v45  ;;  %v2347_v61 = vadd.f32 %v6457_v12, %v1931_v4  ;;  %v2561_v25 = vmax.f32 %v2337_v18, 0.0  ;;  %v2153_v48 = vld [vmem:[%s7682_s2 + $0xd0] sm:$0xff]  ;;  %v2156_v18 = vld [vmem:[%s7682_s2 + $0xe8] sm:$0xff] }
 0x1fe   :  { %2802 = vst [vmem:[%s7684_s3 + $0x118] sm:$0xff] %v2578_v55  ;;  %2241 = vperm.xlu0 %2997, %v2143_v7   ;;  %v1936_v39 = vmul.f32 %v6461_v31, %v8141_v40  ;;  %v2348_v0 = vadd.f32 %v6457_v12, %v1932_v28  ;;  %v2562_v21 = vmax.f32 %v2338_v46, 0.0  ;;  %v1937_v30 = vmul.f32 %v6461_v31, %v8142_v14  ;;  %v6630_v58 = vpop.permute.xlu1 %1800 }
 0x1ff   :  { %2803 = vst [vmem:[%s7684_s3 + $0x120] sm:$0xff] %v2579_v50  ;;  %2281 = vperm.xlu1 %2996, %v2151_v42   ;;  %v2349_v13 = vadd.f32 %v6457_v12, %v1933_v19  ;;  %v2563_v60 = vmax.f32 %v2339_v34, 0.0  ;;  %v2350_v59 = vadd.f32 %v6457_v12, %v1934_v1  ;;  %v2351_v55 = vadd.f32 %v6457_v12, %v1935_v36  ;;  %v6654_v10 = vpop.permute.xlu0 %1790  ;;  %v8144_v1 = vld [vmem:[#allocation28_spill] sm:$0xff]  ;;  %v8146_v36 = vld [vmem:[#allocation30_spill] sm:$0xff] }
 0x200   :  { %2804 = vst [vmem:[%s7684_s3 + $0x128] sm:$0xff] %v2580_v43  ;;  %v2571_v26 = vmax.f32 %v2347_v61, 0.0  ;;  %v2352_v31 = vadd.f32 %v6457_v12, %v1936_v39  ;;  %v2572_v27 = vmax.f32 %v2348_v0, 0.0  ;;  %v2353_v50 = vadd.f32 %v6457_v12, %v1937_v30  ;;  %v2149_v43 = vld [vmem:[%s7682_s2 + $0xb0] sm:$0xff] }
 0x201   :  { %2805 = vst [vmem:[%s7684_s3 + $0x130] sm:$0xff] %v2581_v63  ;;  %v2573_v32 = vmax.f32 %v2349_v13, 0.0  ;;  %v2574_v7 = vmax.f32 %v2350_v59, 0.0  ;;  %v2575_v3 = vmax.f32 %v2351_v55, 0.0  ;;  %v1948_v61 = vmul.f32 %v6515_v9, %v8146_v36  ;;  %v8148_v39 = vld [vmem:[#allocation32_spill] sm:$0xff] }
 0x202   :  { %2806 = vst [vmem:[%s7684_s3 + $0x138] sm:$0xff] %v2582_v38  ;;  %v2576_v12 = vmax.f32 %v2352_v31, 0.0  ;;  %v2577_v63 = vmax.f32 %v2353_v50, 0.0  ;;  %v2152_v38 = vld [vmem:[%s7682_s2 + $0xc8] sm:$0xff]  ;;  %v1950_v0 = vmul.f32 %v6515_v9, %v8148_v39 }
 0x203   :  { %2807 = vst [vmem:[%s7684_s3 + $0x140] sm:$0xff] %v2583_v52  ;;  %v2150_v52 = vld [vmem:[%s7682_s2 + $0xb8] sm:$0xff] }
 0x204   :  { %2808 = vst.msk [vmem:[%s7684_s3 + $0x148] sm:$0xff] %vm243_vm0, %v2584_v22 }
 0x205   :  { %2781 = vst [vmem:[%s7684_s3 + $0x70] sm:$0xff] %v2557_v16  ;;  %2231 = vperm.xlu2 %2998, %v2141_v41   ;;  %v6665_v44 = vpop.permute.xlu2 %1810 }
 0x206   :  { %2782 = vst [vmem:[%s7684_s3 + $0x78] sm:$0xff] %v2558_v37  ;;  %2256 = vperm.xlu0 %2997, %v2146_v29   ;;  %v6673_v2 = vpop.permute.xlu1 %1815  ;;  %v8145_v29 = vld [vmem:[#allocation29_spill] sm:$0xff] }
 0x207   :  { %2783 = vst [vmem:[%s7684_s3 + $0x80] sm:$0xff] %v2559_v49  ;;  %2296 = vperm.xlu1 %2996, %v2154_v35   ;;  %v6694_v8 = vpop.permute.xlu0 %1805  ;;  %v8143_v49 = vld [vmem:[#allocation27_spill] sm:$0xff]  ;;  %v1947_v45 = vmul.f32 %v6515_v9, %v8145_v29  ;;  %v8150_v35 = vld [vmem:[#allocation21_spill] sm:$0xff] }
 0x208   :  { %2784 = vst [vmem:[%s7684_s3 + $0x88] sm:$0xff] %v2560_v20  ;;  %v1945_v6 = vmul.f32 %v6515_v9, %v8143_v49  ;;  %v1946_v20 = vmul.f32 %v6515_v9, %v8144_v1 }
 0x209   :  { %2785 = vst [vmem:[%s7684_s3 + $0x90] sm:$0xff] %v2561_v25  ;;  %v8147_v25 = vld [vmem:[#allocation31_spill] sm:$0xff] }
 0x20a   :  { %2786 = vst [vmem:[%s7684_s3 + $0x98] sm:$0xff] %v2562_v21  ;;  %v1949_v40 = vmul.f32 %v6515_v9, %v8147_v25 }
 0x20b   :  { %2787 = vst.msk [vmem:[%s7684_s3 + $0xa0] sm:$0xff] %vm243_vm0, %v2563_v60 }
 0x20c   :  { %2795 = vst [vmem:[%s7684_s3 + $0xe0] sm:$0xff] %v2571_v26 }
 0x20d   :  { %2246 = vperm.xlu2 %2998, %v2144_v15   ;;  %2796 = vst [vmem:[%s7684_s3 + $0xe8] sm:$0xff] %v2572_v27  ;;  %v6696_v62 = vpop.permute.xlu2 %1825  ;;  %v8149_v15 = vld [vmem:[#allocation20_spill] sm:$0xff] }
 0x20e   :  { %2797 = vst [vmem:[%s7684_s3 + $0xf0] sm:$0xff] %v2573_v32  ;;  %2271 = vperm.xlu0 %2997, %v2149_v43   ;;  %v6698_v47 = vpop.permute.xlu1 %1830  ;;  %v1959_v50 = vmul.f32 %v6570_v17, %v8149_v15  ;;  %v8151_v43 = vld [vmem:[#allocation22_spill] sm:$0xff]  ;;  %v8160_v15 = vld [vmem:[#allocation37_spill] sm:$0xff] }
 0x20f   :  { %2798 = vst [vmem:[%s7684_s3 + $0xf8] sm:$0xff] %v2574_v7  ;;  %2311 = vperm.xlu1 %2996, %v2157_v24   ;;  %v6706_v11 = vpop.permute.xlu0 %1820  ;;  %v1960_v7 = vmul.f32 %v6570_v17, %v8150_v35  ;;  %v8153_v24 = vld [vmem:[#allocation24_spill] sm:$0xff]  ;;  %v8161_v35 = vld [vmem:[#allocation38_spill] sm:$0xff] }
 0x210   :  { %2799 = vst [vmem:[%s7684_s3 + $0x100] sm:$0xff] %v2575_v3  ;;  %v1961_v3 = vmul.f32 %v6570_v17, %v8151_v43  ;;  %v8162_v43 = vld [vmem:[#allocation40_spill] sm:$0xff] }
 0x211   :  { %2800 = vst [vmem:[%s7684_s3 + $0x108] sm:$0xff] %v2576_v12  ;;  %v8152_v12 = vld [vmem:[#allocation23_spill] sm:$0xff] }
 0x212   :  { %2801 = vst.msk [vmem:[%s7684_s3 + $0x110] sm:$0xff] %vm243_vm0, %v2577_v63  ;;  %v1962_v63 = vmul.f32 %v6570_v17, %v8152_v12  ;;  %v8163_v12 = vld [vmem:[#allocation39_spill] sm:$0xff] }
 0x215   :  { %2261 = vperm.xlu2 %2998, %v2147_v23   ;;  %v6708_v51 = vpop.permute.xlu2 %1840 }
 0x216   :  { %2286 = vperm.xlu0 %2997, %v2152_v38   ;;  %v6710_v22 = vpop.permute.xlu1 %1845  ;;  %v1963_v38 = vmul.f32 %v6570_v17, %v8153_v24 }
 0x217   :  { %v6718_v4 = vpop.permute.xlu0 %1835 }
 0x21d   :  { %2276 = vperm.xlu2 %2998, %v2150_v52   ;;  %v8154_v52 = vld [vmem:[#allocation25_spill] sm:$0xff] }
 0x21e   :  { %2301 = vperm.xlu0 %2997, %v2155_v33   ;;  %v6725_v54 = vpop.permute.xlu1 %1860  ;;  %v1964_v33 = vmul.f32 %v6570_v17, %v8154_v52 }
 0x21f   :  { %v6727_v28 = vpop.permute.xlu0 %1850 }
 0x223   :  { %v6723_v16 = vpop.permute.xlu2 %1855 }
 0x225   :  { %2291 = vperm.xlu2 %2998, %v2153_v48   ;;  %v8155_v48 = vld [vmem:[#allocation26_spill] sm:$0xff] }
 0x226   :  { %2316 = vperm.xlu0 %2997, %v2158_v5   ;;  %v6731_v37 = vpop.permute.xlu1 %1875  ;;  %v1965_v5 = vmul.f32 %v6570_v17, %v8155_v48 }
 0x22d   :  { %2306 = vperm.xlu2 %2998, %v2156_v18   ;;  %v6733_v41 = vpop.permute.xlu0 %1865 }
 0x232   :  { %v6729_v46 = vpop.permute.xlu2 %1870 }
 0x234   :  { %v6737_v19 = vpop.permute.xlu1 %1890 }
 0x23c   :  { %v2192_v21 = vpop.permute.xlu1 %2191 }
 0x23d   :  { %v2361_v14 = vadd.f32 %v2192_v21, %v1945_v6  ;;  %v2362_v30 = vadd.f32 %v2192_v21, %v1946_v20  ;;  %v2363_v13 = vadd.f32 %v2192_v21, %v1947_v45  ;;  %v2364_v60 = vadd.f32 %v2192_v21, %v1948_v61  ;;  %v8156_v45 = vld [vmem:[#allocation33_spill] sm:$0xff] }
 0x23e   :  { %v2365_v59 = vadd.f32 %v2192_v21, %v1949_v40  ;;  %v2366_v55 = vadd.f32 %v2192_v21, %v1950_v0  ;;  %v1951_v36 = vmul.f32 %v6515_v9, %v8156_v45 }
 0x23f   :  { %v6735_v56 = vpop.permute.xlu2 %1885  ;;  %v2585_v26 = vmax.f32 %v2361_v14, 0.0  ;;  %v2586_v31 = vmax.f32 %v2362_v30, 0.0  ;;  %v2587_v27 = vmax.f32 %v2363_v13, 0.0  ;;  %v2588_v32 = vmax.f32 %v2364_v60, 0.0  ;;  %v8157_v60 = vld [vmem:[#allocation34_spill] sm:$0xff] }
 0x240   :  { %v2589_v23 = vmax.f32 %v2365_v59, 0.0  ;;  %v2590_v49 = vmax.f32 %v2366_v55, 0.0  ;;  %v2367_v13 = vadd.f32 %v2192_v21, %v1951_v36  ;;  %v1980_v59 = vmul.f32 %v6630_v58, %v8157_v60  ;;  %v8168_v60 = vld [vmem:[#allocation59_spill] sm:$0xff] }
 0x241   :  { %2809 = vst [vmem:[%s7684_s3 + $0x150] sm:$0xff] %v2585_v26  ;;  %v8158_v26 = vld [vmem:[#allocation35_spill] sm:$0xff] }
 0x242   :  { %2810 = vst [vmem:[%s7684_s3 + $0x158] sm:$0xff] %v2586_v31  ;;  %v1981_v21 = vmul.f32 %v6630_v58, %v8158_v26  ;;  %v8159_v31 = vld [vmem:[#allocation36_spill] sm:$0xff]  ;;  %v2591_v24 = vmax.f32 %v2367_v13, 0.0 }
 0x243   :  { %2811 = vst [vmem:[%s7684_s3 + $0x160] sm:$0xff] %v2587_v27  ;;  %v1982_v27 = vmul.f32 %v6630_v58, %v8159_v31 }
 0x244   :  { %2812 = vst [vmem:[%s7684_s3 + $0x168] sm:$0xff] %v2588_v32 }
 0x245   :  { %v6741_v34 = vpop.permute.xlu0 %1880  ;;  %2813 = vst [vmem:[%s7684_s3 + $0x170] sm:$0xff] %v2589_v23 }
 0x246   :  { %2814 = vst [vmem:[%s7684_s3 + $0x178] sm:$0xff] %v2590_v49  ;;  %v8165_v49 = vld [vmem:[#allocation56_spill] sm:$0xff] }
 0x247   :  { %v6739_v42 = vpop.permute.xlu2 %1900  ;;  %2815 = vst.msk [vmem:[%s7684_s3 + $0x180] sm:$0xff] %vm243_vm0, %v2591_v24  ;;  %v8172_v24 = vld [vmem:[#allocation49_spill] sm:$0xff] }
 0x24f   :  { %v2202_v18 = vpop.permute.xlu2 %2201 }
 0x250   :  { %v2375_v6 = vadd.f32 %v2202_v18, %v1959_v50  ;;  %v2376_v1 = vadd.f32 %v2202_v18, %v1960_v7  ;;  %v2377_v20 = vadd.f32 %v2202_v18, %v1961_v3  ;;  %v2378_v29 = vadd.f32 %v2202_v18, %v1962_v63  ;;  %v6780_v17 = vpop.permute.xlu0 %1895 }
 0x251   :  { %v2379_v61 = vadd.f32 %v2202_v18, %v1963_v38  ;;  %v2380_v25 = vadd.f32 %v2202_v18, %v1964_v33  ;;  %v2381_v40 = vadd.f32 %v2202_v18, %v1965_v5  ;;  %v1983_v50 = vmul.f32 %v6630_v58, %v8160_v15  ;;  %v8164_v5 = vld [vmem:[#allocation55_spill] sm:$0xff] }
 0x252   :  { %v2599_v39 = vmax.f32 %v2375_v6, 0.0  ;;  %v2600_v0 = vmax.f32 %v2376_v1, 0.0  ;;  %v2601_v14 = vmax.f32 %v2377_v20, 0.0  ;;  %v2602_v30 = vmax.f32 %v2378_v29, 0.0 }
 0x253   :  { %v2603_v9 = vmax.f32 %v2379_v61, 0.0  ;;  %v2604_v55 = vmax.f32 %v2380_v25, 0.0  ;;  %v2605_v32 = vmax.f32 %v2381_v40, 0.0  ;;  %v1984_v7 = vmul.f32 %v6630_v58, %v8161_v35  ;;  %v8166_v25 = vld [vmem:[#allocation57_spill] sm:$0xff] }
 0x254   :  { %2823 = vst [vmem:[%s7684_s3 + $0x1c0] sm:$0xff] %v2599_v39  ;;  %v1985_v3 = vmul.f32 %v6630_v58, %v8162_v43  ;;  %v1986_v63 = vmul.f32 %v6630_v58, %v8163_v12  ;;  %v1952_v18 = vmul.f32 %v6528_v53, %v8164_v5  ;;  %v1953_v58 = vmul.f32 %v6528_v53, %v8165_v49  ;;  %v8174_v49 = vld [vmem:[#allocation51_spill] sm:$0xff] }
 0x255   :  { %2824 = vst [vmem:[%s7684_s3 + $0x1c8] sm:$0xff] %v2600_v0  ;;  %v1954_v40 = vmul.f32 %v6528_v53, %v8166_v25 }
 0x256   :  { %2825 = vst [vmem:[%s7684_s3 + $0x1d0] sm:$0xff] %v2601_v14  ;;  %v8167_v14 = vld [vmem:[#allocation58_spill] sm:$0xff] }
 0x257   :  { %2826 = vst [vmem:[%s7684_s3 + $0x1d8] sm:$0xff] %v2602_v30  ;;  %v2217_v23 = vpop.permute.xlu2 %2216  ;;  %v1955_v30 = vmul.f32 %v6528_v53, %v8167_v14 }
 0x258   :  { %2827 = vst [vmem:[%s7684_s3 + $0x1e0] sm:$0xff] %v2603_v9  ;;  %v2396_v38 = vadd.f32 %v2217_v23, %v1980_v59  ;;  %v2397_v52 = vadd.f32 %v2217_v23, %v1981_v21  ;;  %v2398_v33 = vadd.f32 %v2217_v23, %v1982_v27  ;;  %v2399_v48 = vadd.f32 %v2217_v23, %v1983_v50  ;;  %v2197_v20 = vpop.permute.xlu0 %2196  ;;  %v8169_v21 = vld [vmem:[#allocation61_spill] sm:$0xff]  ;;  %v8170_v50 = vld [vmem:[#allocation60_spill] sm:$0xff] }
 0x259   :  { %2828 = vst [vmem:[%s7684_s3 + $0x1e8] sm:$0xff] %v2604_v55  ;;  %v2400_v6 = vadd.f32 %v2217_v23, %v1984_v7  ;;  %v2401_v1 = vadd.f32 %v2217_v23, %v1985_v3  ;;  %v2402_v29 = vadd.f32 %v2217_v23, %v1986_v63  ;;  %v2368_v0 = vadd.f32 %v2197_v20, %v1952_v18  ;;  %v8171_v3 = vld [vmem:[#allocation48_spill] sm:$0xff] }
 0x25a   :  { %2829 = vst.msk [vmem:[%s7684_s3 + $0x1f0] sm:$0xff] %vm243_vm0, %v2605_v32  ;;  %v2620_v45 = vmax.f32 %v2396_v38, 0.0  ;;  %v2621_v36 = vmax.f32 %v2397_v52, 0.0  ;;  %v2622_v61 = vmax.f32 %v2398_v33, 0.0  ;;  %v2623_v39 = vmax.f32 %v2399_v48, 0.0  ;;  %v8173_v33 = vld [vmem:[#allocation50_spill] sm:$0xff] }
 0x25b   :  { %v2624_v13 = vmax.f32 %v2400_v6, 0.0  ;;  %v2369_v9 = vadd.f32 %v2197_v20, %v1953_v58  ;;  %v1956_v59 = vmul.f32 %v6528_v53, %v8168_v60  ;;  %v2625_v55 = vmax.f32 %v2401_v1, 0.0  ;;  %v8178_v60 = vld [vmem:[#allocation76_spill] sm:$0xff] }
 0x25c   :  { %2844 = vst [vmem:[%s7684_s3 + $0x268] sm:$0xff] %v2620_v45  ;;  %v2370_v26 = vadd.f32 %v2197_v20, %v1954_v40  ;;  %v1957_v31 = vmul.f32 %v6528_v53, %v8169_v21  ;;  %v2626_v27 = vmax.f32 %v2402_v29, 0.0  ;;  %v2371_v15 = vadd.f32 %v2197_v20, %v1955_v30  ;;  %v8179_v21 = vld [vmem:[#allocation77_spill] sm:$0xff] }
 0x25d   :  { %2845 = vst [vmem:[%s7684_s3 + $0x270] sm:$0xff] %v2621_v36  ;;  %v1958_v32 = vmul.f32 %v6528_v53, %v8170_v50  ;;  %v2372_v35 = vadd.f32 %v2197_v20, %v1956_v59  ;;  %v2592_v7 = vmax.f32 %v2368_v0, 0.0  ;;  %v2001_v12 = vmul.f32 %v6673_v2, %v8171_v3  ;;  %v8177_v0 = vld [vmem:[#allocation54_spill] sm:$0xff] }
 0x25e   :  { %2846 = vst [vmem:[%s7684_s3 + $0x278] sm:$0xff] %v2622_v61  ;;  %v2373_v63 = vadd.f32 %v2197_v20, %v1957_v31  ;;  %v2593_v23 = vmax.f32 %v2369_v9, 0.0  ;;  %v2002_v38 = vmul.f32 %v6673_v2, %v8172_v24  ;;  %v2594_v52 = vmax.f32 %v2370_v26, 0.0  ;;  %v8176_v61 = vld [vmem:[#allocation53_spill] sm:$0xff] }
 0x25f   :  { %2847 = vst [vmem:[%s7684_s3 + $0x280] sm:$0xff] %v2623_v39  ;;  %v2232_v43 = vpop.permute.xlu2 %2231  ;;  %v2374_v53 = vadd.f32 %v2197_v20, %v1958_v32  ;;  %v2003_v48 = vmul.f32 %v6673_v2, %v8173_v33  ;;  %v2595_v5 = vmax.f32 %v2371_v15, 0.0  ;;  %v2004_v58 = vmul.f32 %v6673_v2, %v8174_v49  ;;  %v8175_v20 = vld [vmem:[#allocation52_spill] sm:$0xff]  ;;  %v8180_v15 = vld [vmem:[#allocation78_spill] sm:$0xff] }
 0x260   :  { %2848 = vst [vmem:[%s7684_s3 + $0x288] sm:$0xff] %v2624_v13  ;;  %v2417_v18 = vadd.f32 %v2232_v43, %v2001_v12  ;;  %v2596_v6 = vmax.f32 %v2372_v35, 0.0  ;;  %v2418_v1 = vadd.f32 %v2232_v43, %v2002_v38  ;;  %v2005_v29 = vmul.f32 %v6673_v2, %v8175_v20  ;;  %v2212_v9 = vpop.permute.xlu0 %2211 }
 0x261   :  { %2849 = vst [vmem:[%s7684_s3 + $0x290] sm:$0xff] %v2625_v55  ;;  %v2597_v45 = vmax.f32 %v2373_v63, 0.0  ;;  %v2419_v36 = vadd.f32 %v2232_v43, %v2003_v48  ;;  %v2006_v25 = vmul.f32 %v6673_v2, %v8176_v61  ;;  %v2598_v40 = vmax.f32 %v2374_v53, 0.0  ;;  %v8182_v63 = vld [vmem:[#allocation80_spill] sm:$0xff]  ;;  %v8183_v53 = vld [vmem:[#allocation82_spill] sm:$0xff] }
 0x262   :  { %2850 = vst.msk [vmem:[%s7684_s3 + $0x298] sm:$0xff] %vm243_vm0, %v2626_v27  ;;  %v2420_v39 = vadd.f32 %v2232_v43, %v2004_v58  ;;  %v2007_v14 = vmul.f32 %v6673_v2, %v8177_v0  ;;  %v2421_v30 = vadd.f32 %v2232_v43, %v2005_v29  ;;  %v2641_v13 = vmax.f32 %v2417_v18, 0.0 }
 0x263   :  { %2816 = vst [vmem:[%s7684_s3 + $0x188] sm:$0xff] %v2592_v7  ;;  %v1973_v59 = vmul.f32 %v6602_v57, %v8178_v60  ;;  %v2422_v55 = vadd.f32 %v2232_v43, %v2006_v25  ;;  %v2642_v26 = vmax.f32 %v2418_v1, 0.0  ;;  %v1974_v31 = vmul.f32 %v6602_v57, %v8179_v21  ;;  %v8181_v7 = vld [vmem:[#allocation79_spill] sm:$0xff]  ;;  %v8185_v1 = vld [vmem:[#allocation41_spill] sm:$0xff] }
 0x264   :  { %2817 = vst [vmem:[%s7684_s3 + $0x190] sm:$0xff] %v2593_v23  ;;  %v2423_v2 = vadd.f32 %v2232_v43, %v2007_v14  ;;  %v2643_v27 = vmax.f32 %v2419_v36, 0.0  ;;  %v1975_v50 = vmul.f32 %v6602_v57, %v8180_v15  ;;  %v2644_v32 = vmax.f32 %v2420_v39, 0.0  ;;  %v8186_v36 = vld [vmem:[#allocation42_spill] sm:$0xff] }
 0x265   :  { %2818 = vst [vmem:[%s7684_s3 + $0x198] sm:$0xff] %v2594_v52  ;;  %v2389_v35 = vadd.f32 %v2212_v9, %v1973_v59  ;;  %v1976_v3 = vmul.f32 %v6602_v57, %v8181_v7  ;;  %v2645_v12 = vmax.f32 %v2421_v30, 0.0  ;;  %v2390_v43 = vadd.f32 %v2212_v9, %v1974_v31  ;;  %v8188_v30 = vld [vmem:[#allocation44_spill] sm:$0xff]  ;;  %v8189_v59 = vld [vmem:[#allocation45_spill] sm:$0xff]  ;;  %v8190_v31 = vld [vmem:[#allocation46_spill] sm:$0xff] }
 0x266   :  { %2819 = vst [vmem:[%s7684_s3 + $0x1a0] sm:$0xff] %v2595_v5  ;;  %v1977_v23 = vmul.f32 %v6602_v57, %v8182_v63  ;;  %v2646_v24 = vmax.f32 %v2422_v55, 0.0  ;;  %v2391_v38 = vadd.f32 %v2212_v9, %v1975_v50  ;;  %v1978_v52 = vmul.f32 %v6602_v57, %v8183_v53  ;;  %v8184_v5 = vld [vmem:[#allocation81_spill] sm:$0xff]  ;;  %v8191_v50 = vld [vmem:[#allocation47_spill] sm:$0xff] }
 0x267   :  { %2820 = vst [vmem:[%s7684_s3 + $0x1a8] sm:$0xff] %v2596_v6  ;;  %v2647_v33 = vmax.f32 %v2423_v2, 0.0  ;;  %v2392_v48 = vadd.f32 %v2212_v9, %v1976_v3  ;;  %v1979_v18 = vmul.f32 %v6602_v57, %v8184_v5  ;;  %v2613_v58 = vmax.f32 %v2389_v35, 0.0  ;;  %v2207_v6 = vpop.permute.xlu1 %2206  ;;  %v2247_v3 = vpop.permute.xlu2 %2246 }
 0x268   :  { %2821 = vst [vmem:[%s7684_s3 + $0x1b0] sm:$0xff] %v2597_v45  ;;  %v2393_v49 = vadd.f32 %v2212_v9, %v1977_v23  ;;  %v1966_v20 = vmul.f32 %v6654_v10, %v8185_v1  ;;  %v2394_v29 = vadd.f32 %v2212_v9, %v1978_v52  ;;  %v2614_v45 = vmax.f32 %v2390_v43, 0.0  ;;  %v8194_v52 = vld [vmem:[#allocation71_spill] sm:$0xff]  ;;  %v8196_v1 = vld [vmem:[#allocation73_spill] sm:$0xff] }
 0x269   :  { %2822 = vst.msk [vmem:[%s7684_s3 + $0x1b8] sm:$0xff] %vm243_vm0, %v2598_v40  ;;  %v1967_v61 = vmul.f32 %v6654_v10, %v8186_v36  ;;  %v2395_v57 = vadd.f32 %v2212_v9, %v1979_v18  ;;  %v2615_v25 = vmax.f32 %v2391_v38, 0.0  ;;  %v8187_v40 = vld [vmem:[#allocation43_spill] sm:$0xff]  ;;  %v2616_v0 = vmax.f32 %v2392_v48, 0.0  ;;  %v8195_v18 = vld [vmem:[#allocation72_spill] sm:$0xff]  ;;  %v8197_v36 = vld [vmem:[#allocation74_spill] sm:$0xff] }
 0x26a   :  { %2865 = vst [vmem:[%s7684_s3 + $0x310] sm:$0xff] %v2641_v13  ;;  %v1968_v39 = vmul.f32 %v6654_v10, %v8187_v40  ;;  %v2382_v14 = vadd.f32 %v2207_v6, %v1966_v20  ;;  %v1969_v13 = vmul.f32 %v6654_v10, %v8188_v30  ;;  %v2617_v60 = vmax.f32 %v2393_v49, 0.0  ;;  %v8198_v40 = vld [vmem:[#allocation75_spill] sm:$0xff]  ;;  %v2227_v30 = vpop.permute.xlu0 %2226 }
 0x26b   :  { %2866 = vst [vmem:[%s7684_s3 + $0x318] sm:$0xff] %v2642_v26  ;;  %v2383_v9 = vadd.f32 %v2207_v6, %v1967_v61  ;;  %v1970_v55 = vmul.f32 %v6654_v10, %v8189_v59  ;;  %v2618_v26 = vmax.f32 %v2394_v29, 0.0  ;;  %v1971_v2 = vmul.f32 %v6654_v10, %v8190_v31  ;;  %v8201_v31 = vld [vmem:[#allocation99_spill] sm:$0xff] }
 0x26c   :  { %2867 = vst [vmem:[%s7684_s3 + $0x320] sm:$0xff] %v2643_v27  ;;  %v2384_v21 = vadd.f32 %v2207_v6, %v1968_v39  ;;  %v2619_v27 = vmax.f32 %v2395_v57, 0.0  ;;  %v2385_v15 = vadd.f32 %v2207_v6, %v1969_v13  ;;  %v2606_v7 = vmax.f32 %v2382_v14, 0.0  ;;  %v8199_v13 = vld [vmem:[#allocation97_spill] sm:$0xff] }
 0x26d   :  { %2868 = vst [vmem:[%s7684_s3 + $0x328] sm:$0xff] %v2644_v32  ;;  %v1972_v32 = vmul.f32 %v6654_v10, %v8191_v50  ;;  %v2386_v35 = vadd.f32 %v2207_v6, %v1970_v55  ;;  %v2387_v63 = vadd.f32 %v2207_v6, %v1971_v2  ;;  %v2607_v23 = vmax.f32 %v2383_v9, 0.0  ;;  %v8200_v55 = vld [vmem:[#allocation98_spill] sm:$0xff]  ;;  %v8202_v50 = vld [vmem:[#allocation100_spill] sm:$0xff] }
 0x26e   :  { %2869 = vst [vmem:[%s7684_s3 + $0x330] sm:$0xff] %v2645_v12  ;;  %v8192_v12 = vld [vmem:[#allocation69_spill] sm:$0xff]  ;;  %v2608_v53 = vmax.f32 %v2384_v21, 0.0  ;;  %v2609_v48 = vmax.f32 %v2385_v15, 0.0  ;;  %v2025_v49 = vmul.f32 %v6698_v47, %v8195_v18  ;;  %v2026_v20 = vmul.f32 %v6698_v47, %v8196_v1  ;;  %v8206_v18 = vld [vmem:[#allocation62_spill] sm:$0xff]  ;;  %v8207_v1 = vld [vmem:[#allocation63_spill] sm:$0xff] }
 0x26f   :  { %2870 = vst [vmem:[%s7684_s3 + $0x338] sm:$0xff] %v2646_v24  ;;  %v2022_v43 = vmul.f32 %v6698_v47, %v8192_v12  ;;  %v8193_v24 = vld [vmem:[#allocation70_spill] sm:$0xff]  ;;  %v2388_v10 = vadd.f32 %v2207_v6, %v1972_v32  ;;  %v2611_v29 = vmax.f32 %v2387_v63, 0.0  ;;  %v2027_v61 = vmul.f32 %v6698_v47, %v8197_v36 }
 0x270   :  { %2871 = vst.msk [vmem:[%s7684_s3 + $0x340] sm:$0xff] %vm243_vm0, %v2647_v33  ;;  %v2023_v38 = vmul.f32 %v6698_v47, %v8193_v24  ;;  %v2024_v33 = vmul.f32 %v6698_v47, %v8194_v52  ;;  %v2028_v39 = vmul.f32 %v6698_v47, %v8198_v40  ;;  %v1996_v2 = vmul.f32 %v6665_v44, %v8201_v31 }
 0x271   :  { %2837 = vst [vmem:[%s7684_s3 + $0x230] sm:$0xff] %v2613_v58  ;;  %v2438_v5 = vadd.f32 %v2247_v3, %v2022_v43  ;;  %v2610_v58 = vmax.f32 %v2386_v35, 0.0  ;;  %v2612_v57 = vmax.f32 %v2388_v10, 0.0  ;;  %v2443_v9 = vadd.f32 %v2247_v3, %v2027_v61 }
 0x272   :  { %2838 = vst [vmem:[%s7684_s3 + $0x238] sm:$0xff] %v2614_v45  ;;  %v2439_v6 = vadd.f32 %v2247_v3, %v2023_v38  ;;  %v2440_v45 = vadd.f32 %v2247_v3, %v2024_v33  ;;  %v2444_v47 = vadd.f32 %v2247_v3, %v2028_v39  ;;  %v1997_v32 = vmul.f32 %v6665_v44, %v8202_v50 }
 0x273   :  { %2839 = vst [vmem:[%s7684_s3 + $0x240] sm:$0xff] %v2615_v25  ;;  %v2441_v25 = vadd.f32 %v2247_v3, %v2025_v49  ;;  %v2662_v14 = vmax.f32 %v2438_v5, 0.0  ;;  %v2667_v43 = vmax.f32 %v2443_v9, 0.0  ;;  %v2412_v63 = vadd.f32 %v2227_v30, %v1996_v2  ;;  %v2222_v5 = vpop.permute.xlu1 %2221  ;;  %v8211_v9 = vld [vmem:[#allocation67_spill] sm:$0xff] }
 0x274   :  { %2840 = vst [vmem:[%s7684_s3 + $0x248] sm:$0xff] %v2616_v0  ;;  %v2442_v0 = vadd.f32 %v2247_v3, %v2026_v20  ;;  %v2663_v59 = vmax.f32 %v2439_v6, 0.0  ;;  %v2664_v21 = vmax.f32 %v2440_v45, 0.0  ;;  %v8203_v3 = vld [vmem:[#allocation101_spill] sm:$0xff]  ;;  %v2668_v38 = vmax.f32 %v2444_v47, 0.0  ;;  %v8208_v45 = vld [vmem:[#allocation64_spill] sm:$0xff] }
 0x275   :  { %2841 = vst [vmem:[%s7684_s3 + $0x250] sm:$0xff] %v2617_v60  ;;  %v1994_v60 = vmul.f32 %v6665_v44, %v8199_v13  ;;  %v1998_v12 = vmul.f32 %v6665_v44, %v8203_v3  ;;  %v2413_v10 = vadd.f32 %v2227_v30, %v1997_v32  ;;  %v1987_v49 = vmul.f32 %v6694_v8, %v8206_v18  ;;  %v8212_v47 = vld [vmem:[#allocation68_spill] sm:$0xff] }
 0x276   :  { %2842 = vst [vmem:[%s7684_s3 + $0x258] sm:$0xff] %v2618_v26  ;;  %v1995_v26 = vmul.f32 %v6665_v44, %v8200_v55  ;;  %v2666_v35 = vmax.f32 %v2442_v0, 0.0  ;;  %v1988_v20 = vmul.f32 %v6694_v8, %v8207_v1  ;;  %v1989_v36 = vmul.f32 %v6694_v8, %v8208_v45 }
 0x277   :  { %2843 = vst.msk [vmem:[%s7684_s3 + $0x260] sm:$0xff] %vm243_vm0, %v2619_v27  ;;  %v2665_v27 = vmax.f32 %v2441_v25, 0.0  ;;  %v2410_v15 = vadd.f32 %v2227_v30, %v1994_v60  ;;  %v2414_v33 = vadd.f32 %v2227_v30, %v1998_v12  ;;  %v2637_v61 = vmax.f32 %v2413_v10, 0.0  ;;  %v8209_v25 = vld [vmem:[#allocation65_spill] sm:$0xff] }
 0x278   :  { %2830 = vst [vmem:[%s7684_s3 + $0x1f8] sm:$0xff] %v2606_v7  ;;  %v2411_v7 = vadd.f32 %v2227_v30, %v1995_v26  ;;  %v1990_v40 = vmul.f32 %v6694_v8, %v8209_v25  ;;  %v2404_v0 = vadd.f32 %v2222_v5, %v1988_v20  ;;  %v2405_v60 = vadd.f32 %v2222_v5, %v1989_v36  ;;  %v8219_v20 = vld [vmem:[#allocation96_spill] sm:$0xff]  ;;  %v2242_v36 = vpop.permute.xlu0 %2241 }
 0x279   :  { %2831 = vst [vmem:[%s7684_s3 + $0x200] sm:$0xff] %v2607_v23  ;;  %v8204_v23 = vld [vmem:[#allocation103_spill] sm:$0xff]  ;;  %v2638_v39 = vmax.f32 %v2414_v33, 0.0  ;;  %v8217_v33 = vld [vmem:[#allocation94_spill] sm:$0xff] }
 0x27a   :  { %2832 = vst [vmem:[%s7684_s3 + $0x208] sm:$0xff] %v2608_v53  ;;  %v1999_v24 = vmul.f32 %v6665_v44, %v8204_v23  ;;  %v8205_v53 = vld [vmem:[#allocation102_spill] sm:$0xff]  ;;  %v2635_v6 = vmax.f32 %v2411_v7, 0.0  ;;  %v2406_v26 = vadd.f32 %v2222_v5, %v1990_v40  ;;  %v8214_v7 = vld [vmem:[#allocation91_spill] sm:$0xff]  ;;  %v2629_v12 = vmax.f32 %v2405_v60, 0.0 }
 0x27b   :  { %2833 = vst [vmem:[%s7684_s3 + $0x210] sm:$0xff] %v2609_v48  ;;  %v2000_v52 = vmul.f32 %v6665_v44, %v8205_v53  ;;  %v2634_v48 = vmax.f32 %v2410_v15, 0.0  ;;  %v8213_v15 = vld [vmem:[#allocation90_spill] sm:$0xff]  ;;  %v2044_v3 = vmul.f32 %v6710_v22, %v8214_v7  ;;  %v8226_v7 = vld [vmem:[#allocation123_spill] sm:$0xff] }
 0x27c   :  { %2834 = vst [vmem:[%s7684_s3 + $0x218] sm:$0xff] %v2610_v58  ;;  %v2415_v58 = vadd.f32 %v2227_v30, %v1999_v24  ;;  %v2043_v50 = vmul.f32 %v6710_v22, %v8213_v15  ;;  %v2630_v23 = vmax.f32 %v2406_v26, 0.0  ;;  %v8225_v15 = vld [vmem:[#allocation124_spill] sm:$0xff] }
 0x27d   :  { %2835 = vst [vmem:[%s7684_s3 + $0x220] sm:$0xff] %v2611_v29  ;;  %v2416_v44 = vadd.f32 %v2227_v30, %v2000_v52  ;;  %v2636_v29 = vmax.f32 %v2412_v63, 0.0 }
 0x27e   :  { %2836 = vst.msk [vmem:[%s7684_s3 + $0x228] sm:$0xff] %vm243_vm0, %v2612_v57  ;;  %v2403_v57 = vadd.f32 %v2222_v5, %v1987_v49  ;;  %v2639_v13 = vmax.f32 %v2415_v58, 0.0  ;;  %v8218_v49 = vld [vmem:[#allocation95_spill] sm:$0xff] }
 0x27f   :  { %2886 = vst [vmem:[%s7684_s3 + $0x3b8] sm:$0xff] %v2662_v14  ;;  %v8210_v14 = vld [vmem:[#allocation66_spill] sm:$0xff]  ;;  %v2640_v55 = vmax.f32 %v2416_v44, 0.0  ;;  %v2048_v58 = vmul.f32 %v6710_v22, %v8218_v49  ;;  %v2049_v44 = vmul.f32 %v6710_v22, %v8219_v20  ;;  %v8231_v20 = vld [vmem:[#allocation87_spill] sm:$0xff] }
 0x280   :  { %2887 = vst [vmem:[%s7684_s3 + $0x3c0] sm:$0xff] %v2663_v59  ;;  %v1991_v30 = vmul.f32 %v6694_v8, %v8210_v14  ;;  %v1992_v59 = vmul.f32 %v6694_v8, %v8211_v9  ;;  %v2627_v2 = vmax.f32 %v2403_v57, 0.0  ;;  %v8230_v49 = vld [vmem:[#allocation86_spill] sm:$0xff] }
 0x281   :  { %2888 = vst [vmem:[%s7684_s3 + $0x3c8] sm:$0xff] %v2664_v21  ;;  %v1993_v21 = vmul.f32 %v6694_v8, %v8212_v47 }
 0x282   :  { %2889 = vst [vmem:[%s7684_s3 + $0x3d0] sm:$0xff] %v2665_v27  ;;  %v2407_v31 = vadd.f32 %v2222_v5, %v1991_v30  ;;  %v2262_v27 = vpop.permute.xlu2 %2261  ;;  %v2408_v32 = vadd.f32 %v2222_v5, %v1992_v59  ;;  %v8222_v30 = vld [vmem:[#allocation120_spill] sm:$0xff]  ;;  %v8223_v59 = vld [vmem:[#allocation121_spill] sm:$0xff] }
 0x283   :  { %2890 = vst [vmem:[%s7684_s3 + $0x3d8] sm:$0xff] %v2666_v35  ;;  %v2628_v35 = vmax.f32 %v2404_v0, 0.0  ;;  %v2409_v8 = vadd.f32 %v2222_v5, %v1993_v21  ;;  %v2459_v24 = vadd.f32 %v2262_v27, %v2043_v50  ;;  %v2460_v52 = vadd.f32 %v2262_v27, %v2044_v3  ;;  %v8224_v21 = vld [vmem:[#allocation122_spill] sm:$0xff] }
 0x284   :  { %2891 = vst [vmem:[%s7684_s3 + $0x3e0] sm:$0xff] %v2667_v43  ;;  %v8215_v43 = vld [vmem:[#allocation92_spill] sm:$0xff]  ;;  %v2631_v53 = vmax.f32 %v2407_v31, 0.0  ;;  %v2632_v5 = vmax.f32 %v2408_v32, 0.0  ;;  %v2464_v25 = vadd.f32 %v2262_v27, %v2048_v58  ;;  %v2019_v31 = vmul.f32 %v6696_v62, %v8224_v21 }
 0x285   :  { %2892 = vst.msk [vmem:[%s7684_s3 + $0x3e8] sm:$0xff] %vm243_vm0, %v2668_v38  ;;  %v2045_v63 = vmul.f32 %v6710_v22, %v8215_v43  ;;  %v8216_v38 = vld [vmem:[#allocation93_spill] sm:$0xff]  ;;  %v2683_v45 = vmax.f32 %v2459_v24, 0.0  ;;  %v2684_v40 = vmax.f32 %v2460_v52, 0.0  ;;  %v2020_v50 = vmul.f32 %v6696_v62, %v8225_v15  ;;  %v2237_v43 = vpop.permute.xlu1 %2236 }
 0x286   :  { %2858 = vst [vmem:[%s7684_s3 + $0x2d8] sm:$0xff] %v2634_v48  ;;  %v2046_v10 = vmul.f32 %v6710_v22, %v8216_v38  ;;  %v2047_v48 = vmul.f32 %v6710_v22, %v8217_v33  ;;  %v2465_v22 = vadd.f32 %v2262_v27, %v2049_v44  ;;  %v2021_v3 = vmul.f32 %v6696_v62, %v8226_v7  ;;  %v8229_v33 = vld [vmem:[#allocation85_spill] sm:$0xff] }
 0x287   :  { %2859 = vst [vmem:[%s7684_s3 + $0x2e0] sm:$0xff] %v2635_v6  ;;  %v2461_v18 = vadd.f32 %v2262_v27, %v2045_v63  ;;  %v2633_v6 = vmax.f32 %v2409_v8, 0.0  ;;  %v2435_v8 = vadd.f32 %v2242_v36, %v2019_v31  ;;  %v8227_v63 = vld [vmem:[#allocation83_spill] sm:$0xff]  ;;  %v2436_v24 = vadd.f32 %v2242_v36, %v2020_v50 }
 0x288   :  { %2860 = vst [vmem:[%s7684_s3 + $0x2e8] sm:$0xff] %v2636_v29  ;;  %v2462_v1 = vadd.f32 %v2262_v27, %v2046_v10  ;;  %v2463_v29 = vadd.f32 %v2262_v27, %v2047_v48  ;;  %v2689_v32 = vmax.f32 %v2465_v22, 0.0  ;;  %v8228_v10 = vld [vmem:[#allocation84_spill] sm:$0xff]  ;;  %v2010_v48 = vmul.f32 %v6706_v11, %v8229_v33 }
 0x289   :  { %2861 = vst [vmem:[%s7684_s3 + $0x2f0] sm:$0xff] %v2637_v61  ;;  %v8220_v61 = vld [vmem:[#allocation118_spill] sm:$0xff]  ;;  %v2685_v14 = vmax.f32 %v2461_v18, 0.0  ;;  %v2011_v58 = vmul.f32 %v6706_v11, %v8230_v49  ;;  %v2012_v44 = vmul.f32 %v6706_v11, %v8231_v20 }
 0x28a   :  { %2862 = vst [vmem:[%s7684_s3 + $0x2f8] sm:$0xff] %v2638_v39  ;;  %v2015_v57 = vmul.f32 %v6696_v62, %v8220_v61  ;;  %v8221_v39 = vld [vmem:[#allocation119_spill] sm:$0xff]  ;;  %v2686_v60 = vmax.f32 %v2462_v1, 0.0  ;;  %v2687_v26 = vmax.f32 %v2463_v29, 0.0  ;;  %v2660_v29 = vmax.f32 %v2436_v24, 0.0  ;;  %v8240_v24 = vld [vmem:[#allocation117_spill] sm:$0xff] }
 0x28b   :  { %2863 = vst [vmem:[%s7684_s3 + $0x300] sm:$0xff] %v2639_v13  ;;  %v2016_v0 = vmul.f32 %v6696_v62, %v8221_v39  ;;  %v2017_v13 = vmul.f32 %v6696_v62, %v8222_v30  ;;  %v8234_v30 = vld [vmem:[#allocation111_spill] sm:$0xff] }
 0x28c   :  { %2864 = vst.msk [vmem:[%s7684_s3 + $0x308] sm:$0xff] %vm243_vm0, %v2640_v55  ;;  %v2431_v9 = vadd.f32 %v2242_v36, %v2015_v57  ;;  %v2018_v55 = vmul.f32 %v6696_v62, %v8223_v59  ;;  %v2437_v62 = vadd.f32 %v2242_v36, %v2021_v3  ;;  %v8235_v59 = vld [vmem:[#allocation112_spill] sm:$0xff] }
 0x28d   :  { %2851 = vst [vmem:[%s7684_s3 + $0x2a0] sm:$0xff] %v2627_v2  ;;  %v2432_v47 = vadd.f32 %v2242_v36, %v2016_v0  ;;  %v2688_v2 = vmax.f32 %v2464_v25, 0.0  ;;  %v2433_v27 = vadd.f32 %v2242_v36, %v2017_v13  ;;  %v2427_v25 = vadd.f32 %v2237_v43, %v2011_v58 }
 0x28e   :  { %2852 = vst [vmem:[%s7684_s3 + $0x2a8] sm:$0xff] %v2628_v35  ;;  %v2434_v35 = vadd.f32 %v2242_v36, %v2018_v55  ;;  %v8232_v36 = vld [vmem:[#allocation88_spill] sm:$0xff]  ;;  %v2661_v57 = vmax.f32 %v2437_v62, 0.0  ;;  %v2428_v0 = vadd.f32 %v2237_v43, %v2012_v44  ;;  %v2064_v13 = vmul.f32 %v6725_v54, %v8234_v30  ;;  %v2257_v62 = vpop.permute.xlu0 %2256 }
 0x28f   :  { %2853 = vst [vmem:[%s7684_s3 + $0x2b0] sm:$0xff] %v2629_v12  ;;  %v2655_v12 = vmax.f32 %v2431_v9, 0.0  ;;  %v2656_v38 = vmax.f32 %v2432_v47, 0.0  ;;  %v2657_v52 = vmax.f32 %v2433_v27, 0.0  ;;  %v2013_v61 = vmul.f32 %v6706_v11, %v8232_v36  ;;  %v8236_v47 = vld [vmem:[#allocation113_spill] sm:$0xff]  ;;  %v8237_v27 = vld [vmem:[#allocation114_spill] sm:$0xff] }
 0x290   :  { %2854 = vst [vmem:[%s7684_s3 + $0x2b8] sm:$0xff] %v2630_v23  ;;  %v2008_v23 = vmul.f32 %v6706_v11, %v8227_v63  ;;  %v2065_v55 = vmul.f32 %v6725_v54, %v8235_v59  ;;  %v2066_v21 = vmul.f32 %v6725_v54, %v8236_v47  ;;  %v2651_v31 = vmax.f32 %v2427_v25, 0.0 }
 0x291   :  { %2855 = vst [vmem:[%s7684_s3 + $0x2c0] sm:$0xff] %v2631_v53  ;;  %v2009_v53 = vmul.f32 %v6706_v11, %v8228_v10  ;;  %v2067_v15 = vmul.f32 %v6725_v54, %v8237_v27  ;;  %v2652_v50 = vmax.f32 %v2428_v0, 0.0  ;;  %v8246_v0 = vld [vmem:[#allocation145_spill] sm:$0xff] }
 0x292   :  { %2856 = vst [vmem:[%s7684_s3 + $0x2c8] sm:$0xff] %v2632_v5  ;;  %v2658_v5 = vmax.f32 %v2434_v35, 0.0  ;;  %v2424_v18 = vadd.f32 %v2237_v43, %v2008_v23  ;;  %v8238_v35 = vld [vmem:[#allocation115_spill] sm:$0xff] }
 0x293   :  { %2857 = vst.msk [vmem:[%s7684_s3 + $0x2d0] sm:$0xff] %vm243_vm0, %v2633_v6  ;;  %v2659_v6 = vmax.f32 %v2435_v8, 0.0  ;;  %v2425_v1 = vadd.f32 %v2237_v43, %v2009_v53  ;;  %v2068_v7 = vmul.f32 %v6725_v54, %v8238_v35 }
 0x294   :  { %2907 = vst [vmem:[%s7684_s3 + $0x460] sm:$0xff] %v2683_v45  ;;  %v2426_v45 = vadd.f32 %v2237_v43, %v2010_v48  ;;  %v2648_v22 = vmax.f32 %v2424_v18, 0.0  ;;  %v8242_v18 = vld [vmem:[#allocation140_spill] sm:$0xff] }
 0x295   :  { %2908 = vst [vmem:[%s7684_s3 + $0x468] sm:$0xff] %v2684_v40  ;;  %v8233_v40 = vld [vmem:[#allocation89_spill] sm:$0xff]  ;;  %v2649_v9 = vmax.f32 %v2425_v1, 0.0  ;;  %v2037_v49 = vmul.f32 %v6708_v51, %v8242_v18 }
 0x296   :  { %2909 = vst [vmem:[%s7684_s3 + $0x470] sm:$0xff] %v2685_v14  ;;  %v2014_v39 = vmul.f32 %v6706_v11, %v8233_v40  ;;  %v2277_v14 = vpop.permute.xlu2 %2276 }
 0x297   :  { %2910 = vst [vmem:[%s7684_s3 + $0x478] sm:$0xff] %v2686_v60  ;;  %v2429_v60 = vadd.f32 %v2237_v43, %v2013_v61  ;;  %v2482_v8 = vadd.f32 %v2277_v14, %v2066_v21  ;;  %v2483_v23 = vadd.f32 %v2277_v14, %v2067_v15  ;;  %v2484_v10 = vadd.f32 %v2277_v14, %v2068_v7  ;;  %v8250_v15 = vld [vmem:[#allocation106_spill] sm:$0xff]  ;;  %v8251_v7 = vld [vmem:[#allocation107_spill] sm:$0xff] }
 0x298   :  { %2911 = vst [vmem:[%s7684_s3 + $0x480] sm:$0xff] %v2687_v26  ;;  %v2430_v11 = vadd.f32 %v2237_v43, %v2014_v39  ;;  %v2650_v26 = vmax.f32 %v2426_v45, 0.0  ;;  %v2453_v61 = vadd.f32 %v2257_v62, %v2037_v49  ;;  %v8255_v49 = vld [vmem:[#allocation132_spill] sm:$0xff] }
 0x299   :  { %2912 = vst [vmem:[%s7684_s3 + $0x488] sm:$0xff] %v2688_v2  ;;  %v2480_v2 = vadd.f32 %v2277_v14, %v2064_v13  ;;  %v2653_v3 = vmax.f32 %v2429_v60, 0.0  ;;  %v2706_v58 = vmax.f32 %v2482_v8, 0.0  ;;  %v2707_v20 = vmax.f32 %v2483_v23, 0.0  ;;  %v8247_v13 = vld [vmem:[#allocation144_spill] sm:$0xff] }
 0x29a   :  { %2913 = vst.msk [vmem:[%s7684_s3 + $0x490] sm:$0xff] %vm243_vm0, %v2689_v32  ;;  %v2481_v32 = vadd.f32 %v2277_v14, %v2065_v55  ;;  %v2654_v63 = vmax.f32 %v2430_v11, 0.0  ;;  %v2708_v36 = vmax.f32 %v2484_v10, 0.0  ;;  %v2042_v60 = vmul.f32 %v6708_v51, %v8247_v13  ;;  %v2252_v55 = vpop.permute.xlu1 %2251  ;;  %v8248_v11 = vld [vmem:[#allocation104_spill] sm:$0xff]  ;;  %v8260_v13 = vld [vmem:[#allocation138_spill] sm:$0xff] }
 0x29b   :  { %2879 = vst [vmem:[%s7684_s3 + $0x380] sm:$0xff] %v2655_v12  ;;  %v8239_v12 = vld [vmem:[#allocation116_spill] sm:$0xff]  ;;  %v2704_v53 = vmax.f32 %v2480_v2, 0.0  ;;  %v2677_v21 = vmax.f32 %v2453_v61, 0.0 }
 0x29c   :  { %2880 = vst [vmem:[%s7684_s3 + $0x388] sm:$0xff] %v2656_v38  ;;  %v2069_v43 = vmul.f32 %v6725_v54, %v8239_v12  ;;  %v2070_v38 = vmul.f32 %v6725_v54, %v8240_v24 }
 0x29d   :  { %2881 = vst [vmem:[%s7684_s3 + $0x390] sm:$0xff] %v2657_v52  ;;  %v8241_v52 = vld [vmem:[#allocation139_spill] sm:$0xff] }
 0x29e   :  { %2882 = vst [vmem:[%s7684_s3 + $0x398] sm:$0xff] %v2658_v5  ;;  %v2036_v33 = vmul.f32 %v6708_v51, %v8241_v52  ;;  %v2485_v48 = vadd.f32 %v2277_v14, %v2069_v43  ;;  %v2705_v5 = vmax.f32 %v2481_v32, 0.0  ;;  %v2486_v54 = vadd.f32 %v2277_v14, %v2070_v38  ;;  %v8252_v43 = vld [vmem:[#allocation108_spill] sm:$0xff]  ;;  %v8253_v38 = vld [vmem:[#allocation109_spill] sm:$0xff]  ;;  %v8254_v52 = vld [vmem:[#allocation110_spill] sm:$0xff]  ;;  %v2292_v18 = vpop.permute.xlu2 %2291 }
 0x29f   :  { %2883 = vst [vmem:[%s7684_s3 + $0x3a0] sm:$0xff] %v2659_v6  ;;  %v8243_v6 = vld [vmem:[#allocation141_spill] sm:$0xff]  ;;  %v2034_v10 = vmul.f32 %v6718_v4, %v8253_v38 }
 0x2a0   :  { %2884 = vst [vmem:[%s7684_s3 + $0x3a8] sm:$0xff] %v2660_v29  ;;  %v2038_v1 = vmul.f32 %v6708_v51, %v8243_v6  ;;  %v2452_v44 = vadd.f32 %v2257_v62, %v2036_v33  ;;  %v8244_v29 = vld [vmem:[#allocation142_spill] sm:$0xff]  ;;  %v2709_v40 = vmax.f32 %v2485_v48, 0.0  ;;  %v2710_v14 = vmax.f32 %v2486_v54, 0.0 }
 0x2a1   :  { %2885 = vst.msk [vmem:[%s7684_s3 + $0x3b0] sm:$0xff] %vm243_vm0, %v2661_v57  ;;  %v2039_v45 = vmul.f32 %v6708_v51, %v8244_v29  ;;  %v8245_v57 = vld [vmem:[#allocation143_spill] sm:$0xff]  ;;  %v2035_v33 = vmul.f32 %v6718_v4, %v8254_v52  ;;  %v2085_v54 = vmul.f32 %v6731_v37, %v8255_v49  ;;  %v8257_v29 = vld [vmem:[#allocation134_spill] sm:$0xff] }
 0x2a2   :  { %2872 = vst [vmem:[%s7684_s3 + $0x348] sm:$0xff] %v2648_v22  ;;  %v2040_v25 = vmul.f32 %v6708_v51, %v8245_v57  ;;  %v2454_v39 = vadd.f32 %v2257_v62, %v2038_v1  ;;  %v2041_v22 = vmul.f32 %v6708_v51, %v8246_v0  ;;  %v2676_v59 = vmax.f32 %v2452_v44, 0.0  ;;  %v8256_v1 = vld [vmem:[#allocation133_spill] sm:$0xff]  ;;  %v8258_v57 = vld [vmem:[#allocation135_spill] sm:$0xff]  ;;  %v8259_v0 = vld [vmem:[#allocation136_spill] sm:$0xff] }
 0x2a3   :  { %2873 = vst [vmem:[%s7684_s3 + $0x350] sm:$0xff] %v2649_v9  ;;  %v2455_v30 = vadd.f32 %v2257_v62, %v2039_v45  ;;  %v2458_v51 = vadd.f32 %v2257_v62, %v2042_v60  ;;  %v2087_v45 = vmul.f32 %v6731_v37, %v8257_v29  ;;  %v2501_v61 = vadd.f32 %v2292_v18, %v2085_v54 }
 0x2a4   :  { %2874 = vst [vmem:[%s7684_s3 + $0x358] sm:$0xff] %v2650_v26  ;;  %v2456_v9 = vadd.f32 %v2257_v62, %v2040_v25  ;;  %v2029_v26 = vmul.f32 %v6718_v4, %v8248_v11  ;;  %v2457_v47 = vadd.f32 %v2257_v62, %v2041_v22  ;;  %v2678_v27 = vmax.f32 %v2454_v39, 0.0 }
 0x2a5   :  { %2875 = vst [vmem:[%s7684_s3 + $0x360] sm:$0xff] %v2651_v31  ;;  %v8249_v31 = vld [vmem:[#allocation105_spill] sm:$0xff]  ;;  %v2679_v32 = vmax.f32 %v2455_v30, 0.0  ;;  %v2088_v25 = vmul.f32 %v6731_v37, %v8258_v57  ;;  %v2089_v22 = vmul.f32 %v6731_v37, %v8259_v0  ;;  %v2503_v30 = vadd.f32 %v2292_v18, %v2087_v45 }
 0x2a6   :  { %2876 = vst [vmem:[%s7684_s3 + $0x368] sm:$0xff] %v2652_v50  ;;  %v2030_v2 = vmul.f32 %v6718_v4, %v8249_v31  ;;  %v2031_v50 = vmul.f32 %v6718_v4, %v8250_v15  ;;  %v2445_v35 = vadd.f32 %v2252_v55, %v2029_v26  ;;  %v2680_v8 = vmax.f32 %v2456_v9, 0.0  ;;  %v8262_v31 = vld [vmem:[#allocation160_spill] sm:$0xff]  ;;  %v8263_v15 = vld [vmem:[#allocation161_spill] sm:$0xff] }
 0x2a7   :  { %2877 = vst [vmem:[%s7684_s3 + $0x370] sm:$0xff] %v2653_v3  ;;  %v2032_v3 = vmul.f32 %v6718_v4, %v8251_v7  ;;  %v2681_v23 = vmax.f32 %v2457_v47, 0.0  ;;  %v2090_v60 = vmul.f32 %v6731_v37, %v8260_v13  ;;  %v2505_v26 = vadd.f32 %v2292_v18, %v2089_v22 }
 0x2a8   :  { %2878 = vst.msk [vmem:[%s7684_s3 + $0x378] sm:$0xff] %vm243_vm0, %v2654_v63  ;;  %v2446_v12 = vadd.f32 %v2252_v55, %v2030_v2  ;;  %v2033_v63 = vmul.f32 %v6718_v4, %v8252_v43  ;;  %v2447_v24 = vadd.f32 %v2252_v55, %v2031_v50  ;;  %v2451_v4 = vadd.f32 %v2252_v55, %v2035_v33 }
 0x2a9   :  { %2928 = vst [vmem:[%s7684_s3 + $0x508] sm:$0xff] %v2704_v53  ;;  %v2682_v53 = vmax.f32 %v2458_v51, 0.0  ;;  %v2448_v62 = vadd.f32 %v2252_v55, %v2032_v3  ;;  %v2725_v47 = vmax.f32 %v2501_v61, 0.0  ;;  %v2057_v2 = vmul.f32 %v6723_v16, %v8262_v31 }
 0x2aa   :  { %2929 = vst [vmem:[%s7684_s3 + $0x510] sm:$0xff] %v2705_v5  ;;  %v2449_v48 = vadd.f32 %v2252_v55, %v2033_v63  ;;  %v2669_v5 = vmax.f32 %v2445_v35, 0.0  ;;  %v2670_v6 = vmax.f32 %v2446_v12, 0.0  ;;  %v2671_v44 = vmax.f32 %v2447_v24, 0.0  ;;  %v8264_v35 = vld [vmem:[#allocation162_spill] sm:$0xff]  ;;  %v8265_v12 = vld [vmem:[#allocation163_spill] sm:$0xff] }
 0x2ab   :  { %2930 = vst [vmem:[%s7684_s3 + $0x518] sm:$0xff] %v2706_v58  ;;  %v2450_v58 = vadd.f32 %v2252_v55, %v2034_v10  ;;  %v2675_v9 = vmax.f32 %v2451_v4, 0.0  ;;  %v8261_v55 = vld [vmem:[#allocation137_spill] sm:$0xff]  ;;  %v2506_v51 = vadd.f32 %v2292_v18, %v2090_v60  ;;  %v2058_v50 = vmul.f32 %v6723_v16, %v8263_v15  ;;  %v8266_v24 = vld [vmem:[#allocation164_spill] sm:$0xff] }
 0x2ac   :  { %2931 = vst [vmem:[%s7684_s3 + $0x520] sm:$0xff] %v2707_v20  ;;  %v2086_v20 = vmul.f32 %v6731_v37, %v8256_v1  ;;  %v2091_v11 = vmul.f32 %v6731_v37, %v8261_v55  ;;  %v2059_v7 = vmul.f32 %v6723_v16, %v8264_v35  ;;  %v2060_v43 = vmul.f32 %v6723_v16, %v8265_v12  ;;  %v8276_v15 = vld [vmem:[#allocation153_spill] sm:$0xff] }
 0x2ad   :  { %2932 = vst [vmem:[%s7684_s3 + $0x528] sm:$0xff] %v2708_v36  ;;  %v2672_v36 = vmax.f32 %v2448_v62, 0.0  ;;  %v2729_v63 = vmax.f32 %v2505_v26, 0.0  ;;  %v2061_v38 = vmul.f32 %v6723_v16, %v8266_v24  ;;  %v2730_v10 = vmax.f32 %v2506_v51, 0.0  ;;  %v8267_v62 = vld [vmem:[#allocation166_spill] sm:$0xff]  ;;  %v8275_v26 = vld [vmem:[#allocation131_spill] sm:$0xff] }
 0x2ae   :  { %2933 = vst [vmem:[%s7684_s3 + $0x530] sm:$0xff] %v2709_v40  ;;  %v2673_v40 = vmax.f32 %v2449_v48, 0.0  ;;  %v2502_v39 = vadd.f32 %v2292_v18, %v2086_v20  ;;  %v2507_v37 = vadd.f32 %v2292_v18, %v2091_v11  ;;  %v2062_v52 = vmul.f32 %v6723_v16, %v8267_v62 }
 0x2af   :  { %2934 = vst.msk [vmem:[%s7684_s3 + $0x538] sm:$0xff] %vm243_vm0, %v2710_v14  ;;  %v2674_v14 = vmax.f32 %v2450_v58, 0.0  ;;  %v2267_v58 = vpop.permute.xlu1 %2266 }
 0x2b0   :  { %2900 = vst [vmem:[%s7684_s3 + $0x428] sm:$0xff] %v2676_v59  ;;  %v2504_v59 = vadd.f32 %v2292_v18, %v2088_v25  ;;  %v2731_v33 = vmax.f32 %v2507_v37, 0.0 }
 0x2b1   :  { %2901 = vst [vmem:[%s7684_s3 + $0x430] sm:$0xff] %v2677_v21  ;;  %v2272_v21 = vpop.permute.xlu0 %2271 }
 0x2b2   :  { %2902 = vst [vmem:[%s7684_s3 + $0x438] sm:$0xff] %v2678_v27  ;;  %v2726_v27 = vmax.f32 %v2502_v39, 0.0  ;;  %v2728_v3 = vmax.f32 %v2504_v59, 0.0  ;;  %v2476_v48 = vadd.f32 %v2272_v21, %v2060_v43  ;;  %v2477_v49 = vadd.f32 %v2272_v21, %v2061_v38 }
 0x2b3   :  { %2903 = vst [vmem:[%s7684_s3 + $0x440] sm:$0xff] %v2679_v32  ;;  %v2727_v32 = vmax.f32 %v2503_v30, 0.0  ;;  %v2478_v20 = vadd.f32 %v2272_v21, %v2062_v52 }
 0x2b4   :  { %2904 = vst [vmem:[%s7684_s3 + $0x448] sm:$0xff] %v2680_v8  ;;  %v2473_v8 = vadd.f32 %v2272_v21, %v2057_v2  ;;  %v2700_v57 = vmax.f32 %v2476_v48, 0.0  ;;  %v2701_v0 = vmax.f32 %v2477_v49, 0.0  ;;  %v2307_v2 = vpop.permute.xlu2 %2306 }
 0x2b5   :  { %2905 = vst [vmem:[%s7684_s3 + $0x450] sm:$0xff] %v2681_v23  ;;  %v2474_v23 = vadd.f32 %v2272_v21, %v2058_v50  ;;  %v2702_v13 = vmax.f32 %v2478_v20, 0.0  ;;  %v2106_v50 = vmul.f32 %v6737_v19, %v8276_v15 }
 0x2b6   :  { %2906 = vst.msk [vmem:[%s7684_s3 + $0x458] sm:$0xff] %vm243_vm0, %v2682_v53  ;;  %v2475_v53 = vadd.f32 %v2272_v21, %v2059_v7  ;;  %v2697_v54 = vmax.f32 %v2473_v8, 0.0 }
 0x2b7   :  { %2893 = vst [vmem:[%s7684_s3 + $0x3f0] sm:$0xff] %v2669_v5  ;;  %v8268_v5 = vld [vmem:[#allocation165_spill] sm:$0xff]  ;;  %v2698_v4 = vmax.f32 %v2474_v23, 0.0  ;;  %v2522_v12 = vadd.f32 %v2307_v2, %v2106_v50 }
 0x2b8   :  { %2894 = vst [vmem:[%s7684_s3 + $0x3f8] sm:$0xff] %v2670_v6  ;;  %v2063_v18 = vmul.f32 %v6723_v16, %v8268_v5  ;;  %v8269_v6 = vld [vmem:[#allocation125_spill] sm:$0xff]  ;;  %v2699_v45 = vmax.f32 %v2475_v53, 0.0 }
 0x2b9   :  { %2895 = vst [vmem:[%s7684_s3 + $0x400] sm:$0xff] %v2671_v44  ;;  %v2050_v1 = vmul.f32 %v6727_v28, %v8269_v6  ;;  %v8270_v44 = vld [vmem:[#allocation126_spill] sm:$0xff]  ;;  %v2287_v6 = vpop.permute.xlu0 %2286 }
 0x2ba   :  { %2896 = vst [vmem:[%s7684_s3 + $0x408] sm:$0xff] %v2672_v36  ;;  %v2051_v29 = vmul.f32 %v6727_v28, %v8270_v44  ;;  %v2479_v16 = vadd.f32 %v2272_v21, %v2063_v18  ;;  %v8271_v36 = vld [vmem:[#allocation127_spill] sm:$0xff] }
 0x2bb   :  { %2897 = vst [vmem:[%s7684_s3 + $0x410] sm:$0xff] %v2673_v40  ;;  %v2052_v61 = vmul.f32 %v6727_v28, %v8271_v36  ;;  %v2466_v25 = vadd.f32 %v2267_v58, %v2050_v1  ;;  %v8272_v40 = vld [vmem:[#allocation128_spill] sm:$0xff]  ;;  %v8282_v18 = vld [vmem:[#allocation159_spill] sm:$0xff]  ;;  %v8283_v1 = vld [vmem:[#allocation174_spill] sm:$0xff] }
 0x2bc   :  { %2898 = vst [vmem:[%s7684_s3 + $0x418] sm:$0xff] %v2674_v14  ;;  %v2053_v39 = vmul.f32 %v6727_v28, %v8272_v40  ;;  %v2467_v22 = vadd.f32 %v2267_v58, %v2051_v29  ;;  %v8273_v14 = vld [vmem:[#allocation129_spill] sm:$0xff]  ;;  %v2703_v55 = vmax.f32 %v2479_v16, 0.0  ;;  %v2112_v49 = vmul.f32 %v6737_v19, %v8282_v18  ;;  %v8284_v29 = vld [vmem:[#allocation175_spill] sm:$0xff]  ;;  %v8285_v36 = vld [vmem:[#allocation176_spill] sm:$0xff] }
 0x2bd   :  { %2899 = vst.msk [vmem:[%s7684_s3 + $0x420] sm:$0xff] %vm243_vm0, %v2675_v9  ;;  %v2054_v30 = vmul.f32 %v6727_v28, %v8273_v14  ;;  %v2468_v60 = vadd.f32 %v2267_v58, %v2052_v61  ;;  %v8274_v9 = vld [vmem:[#allocation130_spill] sm:$0xff]  ;;  %v2690_v31 = vmax.f32 %v2466_v25, 0.0  ;;  %v2078_v20 = vmul.f32 %v6729_v46, %v8283_v1  ;;  %v8286_v40 = vld [vmem:[#allocation177_spill] sm:$0xff] }
 0x2be   :  { %2949 = vst [vmem:[%s7684_s3 + $0x5b0] sm:$0xff] %v2725_v47  ;;  %v2055_v59 = vmul.f32 %v6727_v28, %v8274_v9  ;;  %v2469_v11 = vadd.f32 %v2267_v58, %v2053_v39  ;;  %v2056_v47 = vmul.f32 %v6727_v28, %v8275_v26  ;;  %v2079_v16 = vmul.f32 %v6729_v46, %v8284_v29  ;;  %v8287_v14 = vld [vmem:[#allocation178_spill] sm:$0xff]  ;;  %v8288_v9 = vld [vmem:[#allocation180_spill] sm:$0xff]  ;;  %v8289_v26 = vld [vmem:[#allocation179_spill] sm:$0xff] }
 0x2bf   :  { %2950 = vst [vmem:[%s7684_s3 + $0x5b8] sm:$0xff] %v2726_v27  ;;  %v2470_v21 = vadd.f32 %v2267_v58, %v2054_v30  ;;  %v2691_v27 = vmax.f32 %v2467_v22, 0.0  ;;  %v2692_v37 = vmax.f32 %v2468_v60, 0.0  ;;  %v2080_v61 = vmul.f32 %v6729_v46, %v8285_v36 }
 0x2c0   :  { %2951 = vst [vmem:[%s7684_s3 + $0x5c0] sm:$0xff] %v2727_v32  ;;  %v2471_v51 = vadd.f32 %v2267_v58, %v2055_v59  ;;  %v2472_v28 = vadd.f32 %v2267_v58, %v2056_v47  ;;  %v8277_v32 = vld [vmem:[#allocation154_spill] sm:$0xff]  ;;  %v2693_v7 = vmax.f32 %v2469_v11, 0.0  ;;  %v2746_v58 = vmax.f32 %v2522_v12, 0.0  ;;  %v8293_v12 = vld [vmem:[#allocation149_spill] sm:$0xff] }
 0x2c1   :  { %2952 = vst [vmem:[%s7684_s3 + $0x5c8] sm:$0xff] %v2728_v3  ;;  %v2107_v35 = vmul.f32 %v6737_v19, %v8277_v32  ;;  %v8278_v3 = vld [vmem:[#allocation155_spill] sm:$0xff]  ;;  %v2694_v43 = vmax.f32 %v2470_v21, 0.0  ;;  %v2494_v25 = vadd.f32 %v2287_v6, %v2078_v20  ;;  %v2081_v39 = vmul.f32 %v6729_v46, %v8286_v40 }
 0x2c2   :  { %2953 = vst [vmem:[%s7684_s3 + $0x5d0] sm:$0xff] %v2729_v63  ;;  %v2108_v8 = vmul.f32 %v6737_v19, %v8278_v3  ;;  %v8279_v63 = vld [vmem:[#allocation156_spill] sm:$0xff]  ;;  %v2695_v38 = vmax.f32 %v2471_v51, 0.0  ;;  %v2696_v52 = vmax.f32 %v2472_v28, 0.0  ;;  %v2495_v22 = vadd.f32 %v2287_v6, %v2079_v16  ;;  %v8290_v51 = vld [vmem:[#allocation146_spill] sm:$0xff]  ;;  %v8291_v28 = vld [vmem:[#allocation147_spill] sm:$0xff] }
 0x2c3   :  { %2954 = vst [vmem:[%s7684_s3 + $0x5d8] sm:$0xff] %v2730_v10  ;;  %v2109_v23 = vmul.f32 %v6737_v19, %v8279_v63  ;;  %v2523_v24 = vadd.f32 %v2307_v2, %v2107_v35  ;;  %v8280_v10 = vld [vmem:[#allocation157_spill] sm:$0xff]  ;;  %v2082_v30 = vmul.f32 %v6729_v46, %v8287_v14  ;;  %v2496_v60 = vadd.f32 %v2287_v6, %v2080_v61  ;;  %v8292_v35 = vld [vmem:[#allocation148_spill] sm:$0xff] }
 0x2c4   :  { %2955 = vst.msk [vmem:[%s7684_s3 + $0x5e0] sm:$0xff] %vm243_vm0, %v2731_v33  ;;  %v2110_v53 = vmul.f32 %v6737_v19, %v8280_v10  ;;  %v2524_v62 = vadd.f32 %v2307_v2, %v2108_v8  ;;  %v8281_v33 = vld [vmem:[#allocation158_spill] sm:$0xff]  ;;  %v2083_v59 = vmul.f32 %v6729_v46, %v8288_v9  ;;  %v2497_v11 = vadd.f32 %v2287_v6, %v2081_v39 }
 0x2c5   :  { %2921 = vst [vmem:[%s7684_s3 + $0x4d0] sm:$0xff] %v2697_v54  ;;  %v2111_v48 = vmul.f32 %v6737_v19, %v8281_v33  ;;  %v2525_v5 = vadd.f32 %v2307_v2, %v2109_v23  ;;  %v2747_v44 = vmax.f32 %v2523_v24, 0.0  ;;  %v2528_v19 = vadd.f32 %v2307_v2, %v2112_v49  ;;  %v8294_v24 = vld [vmem:[#allocation150_spill] sm:$0xff] }
 0x2c6   :  { %2922 = vst [vmem:[%s7684_s3 + $0x4d8] sm:$0xff] %v2698_v4  ;;  %v2526_v54 = vadd.f32 %v2307_v2, %v2110_v53  ;;  %v2084_v47 = vmul.f32 %v6729_v46, %v8289_v26  ;;  %v2498_v21 = vadd.f32 %v2287_v6, %v2082_v30  ;;  %v2499_v15 = vadd.f32 %v2287_v6, %v2083_v59 }
 0x2c7   :  { %2923 = vst [vmem:[%s7684_s3 + $0x4e0] sm:$0xff] %v2699_v45  ;;  %v2527_v4 = vadd.f32 %v2307_v2, %v2111_v48  ;;  %v2748_v45 = vmax.f32 %v2524_v62, 0.0  ;;  %v2282_v2 = vpop.permute.xlu1 %2281  ;;  %v2719_v50 = vmax.f32 %v2495_v22, 0.0  ;;  %v2720_v32 = vmax.f32 %v2496_v60, 0.0  ;;  %v8295_v62 = vld [vmem:[#allocation152_spill] sm:$0xff] }
 0x2c8   :  { %2924 = vst [vmem:[%s7684_s3 + $0x4e8] sm:$0xff] %v2700_v57  ;;  %v2749_v57 = vmax.f32 %v2525_v5, 0.0  ;;  %v2500_v46 = vadd.f32 %v2287_v6, %v2084_v47  ;;  %v2721_v3 = vmax.f32 %v2497_v11, 0.0  ;;  %v2722_v63 = vmax.f32 %v2498_v21, 0.0  ;;  %v8296_v5 = vld [vmem:[#allocation151_spill] sm:$0xff]  ;;  %v8297_v6 = vld [vmem:[#allocation188_spill] sm:$0xff] }
 0x2c9   :  { %2925 = vst [vmem:[%s7684_s3 + $0x4f0] sm:$0xff] %v2701_v0  ;;  %v2750_v0 = vmax.f32 %v2526_v54, 0.0  ;;  %v2723_v10 = vmax.f32 %v2499_v15, 0.0  ;;  %v2077_v18 = vmul.f32 %v6733_v41, %v8296_v5  ;;  %v2099_v1 = vmul.f32 %v6735_v56, %v8297_v6  ;;  %v8305_v15 = vld [vmem:[#allocation168_spill] sm:$0xff] }
 0x2ca   :  { %2926 = vst [vmem:[%s7684_s3 + $0x4f8] sm:$0xff] %v2702_v13  ;;  %v2751_v13 = vmax.f32 %v2527_v4, 0.0  ;;  %v2724_v33 = vmax.f32 %v2500_v46, 0.0 }
 0x2cb   :  { %2927 = vst.msk [vmem:[%s7684_s3 + $0x500] sm:$0xff] %vm243_vm0, %v2703_v55  ;;  %v2752_v55 = vmax.f32 %v2528_v19, 0.0  ;;  %v8299_v19 = vld [vmem:[#allocation190_spill] sm:$0xff] }
 0x2cc   :  { %2914 = vst [vmem:[%s7684_s3 + $0x498] sm:$0xff] %v2690_v31  ;;  %v2718_v31 = vmax.f32 %v2494_v25, 0.0 }
 0x2cd   :  { %2915 = vst [vmem:[%s7684_s3 + $0x4a0] sm:$0xff] %v2691_v27  ;;  %v2071_v27 = vmul.f32 %v6733_v41, %v8290_v51 }
 0x2ce   :  { %2916 = vst [vmem:[%s7684_s3 + $0x4a8] sm:$0xff] %v2692_v37  ;;  %v2072_v37 = vmul.f32 %v6733_v41, %v8291_v28 }
 0x2cf   :  { %2917 = vst [vmem:[%s7684_s3 + $0x4b0] sm:$0xff] %v2693_v7  ;;  %v2073_v7 = vmul.f32 %v6733_v41, %v8292_v35  ;;  %v2487_v8 = vadd.f32 %v2282_v2, %v2071_v27  ;;  %v2297_v21 = vpop.permute.xlu1 %2296 }
 0x2d0   :  { %2918 = vst [vmem:[%s7684_s3 + $0x4b8] sm:$0xff] %v2694_v43  ;;  %v2074_v43 = vmul.f32 %v6733_v41, %v8293_v12  ;;  %v2488_v23 = vadd.f32 %v2282_v2, %v2072_v37  ;;  %v8306_v37 = vld [vmem:[#allocation169_spill] sm:$0xff] }
 0x2d1   :  { %2919 = vst [vmem:[%s7684_s3 + $0x4c0] sm:$0xff] %v2695_v38  ;;  %v2075_v38 = vmul.f32 %v6733_v41, %v8294_v24  ;;  %v2489_v53 = vadd.f32 %v2282_v2, %v2073_v7  ;;  %v2711_v54 = vmax.f32 %v2487_v8, 0.0  ;;  %v2094_v46 = vmul.f32 %v6741_v34, %v8306_v37  ;;  %v8307_v7 = vld [vmem:[#allocation170_spill] sm:$0xff]  ;;  %v8321_v37 = vld [vmem:[#allocation184_spill] sm:$0xff] }
 0x2d2   :  { %2920 = vst.msk [vmem:[%s7684_s3 + $0x4c8] sm:$0xff] %vm243_vm0, %v2696_v52  ;;  %v2076_v52 = vmul.f32 %v6733_v41, %v8295_v62  ;;  %v2490_v48 = vadd.f32 %v2282_v2, %v2074_v43  ;;  %v2712_v4 = vmax.f32 %v2488_v23, 0.0  ;;  %v2493_v41 = vadd.f32 %v2282_v2, %v2077_v18  ;;  %v8308_v43 = vld [vmem:[#allocation171_spill] sm:$0xff] }
 0x2d3   :  { %2970 = vst [vmem:[%s7684_s3 + $0x658] sm:$0xff] %v2746_v58  ;;  %v2491_v49 = vadd.f32 %v2282_v2, %v2075_v38  ;;  %v2302_v58 = vpop.permute.xlu0 %2301  ;;  %v2713_v16 = vmax.f32 %v2489_v53, 0.0  ;;  %v2510_v24 = vadd.f32 %v2297_v21, %v2094_v46  ;;  %v8309_v38 = vld [vmem:[#allocation172_spill] sm:$0xff]  ;;  %v2116_v46 = vmul.f32 %v6780_v17, %v8321_v37 }
 0x2d4   :  { %2971 = vst [vmem:[%s7684_s3 + $0x660] sm:$0xff] %v2747_v44  ;;  %v2492_v20 = vadd.f32 %v2282_v2, %v2076_v52  ;;  %v8298_v44 = vld [vmem:[#allocation189_spill] sm:$0xff]  ;;  %v2714_v36 = vmax.f32 %v2490_v48, 0.0  ;;  %v2515_v61 = vadd.f32 %v2302_v58, %v2099_v1  ;;  %v2717_v9 = vmax.f32 %v2493_v41, 0.0 }
 0x2d5   :  { %2972 = vst [vmem:[%s7684_s3 + $0x668] sm:$0xff] %v2748_v45  ;;  %v2100_v29 = vmul.f32 %v6735_v56, %v8298_v44  ;;  %v2101_v45 = vmul.f32 %v6735_v56, %v8299_v19  ;;  %v2715_v40 = vmax.f32 %v2491_v49, 0.0  ;;  %v8310_v52 = vld [vmem:[#allocation173_spill] sm:$0xff]  ;;  %v2734_v1 = vmax.f32 %v2510_v24, 0.0  ;;  %v8324_v24 = vld [vmem:[#allocation187_spill] sm:$0xff] }
 0x2d6   :  { %2973 = vst [vmem:[%s7684_s3 + $0x670] sm:$0xff] %v2749_v57  ;;  %v8300_v57 = vld [vmem:[#allocation191_spill] sm:$0xff]  ;;  %v2716_v14 = vmax.f32 %v2492_v20, 0.0  ;;  %v2739_v47 = vmax.f32 %v2515_v61, 0.0  ;;  %v8312_v20 = vld [vmem:[#allocation196_spill] sm:$0xff] }
 0x2d7   :  { %2974 = vst [vmem:[%s7684_s3 + $0x678] sm:$0xff] %v2750_v0  ;;  %v2102_v25 = vmul.f32 %v6735_v56, %v8300_v57  ;;  %v2516_v39 = vadd.f32 %v2302_v58, %v2100_v29  ;;  %v8301_v0 = vld [vmem:[#allocation192_spill] sm:$0xff]  ;;  %v2517_v30 = vadd.f32 %v2302_v58, %v2101_v45  ;;  %v8313_v29 = vld [vmem:[#allocation197_spill] sm:$0xff]  ;;  %v8314_v45 = vld [vmem:[#allocation198_spill] sm:$0xff] }
 0x2d8   :  { %2975 = vst [vmem:[%s7684_s3 + $0x680] sm:$0xff] %v2751_v13  ;;  %v2103_v22 = vmul.f32 %v6735_v56, %v8301_v0  ;;  %v8302_v13 = vld [vmem:[#allocation194_spill] sm:$0xff]  ;;  %v2122_v41 = vmul.f32 %v6739_v42, %v8313_v29 }
 0x2d9   :  { %2976 = vst.msk [vmem:[%s7684_s3 + $0x688] sm:$0xff] %vm243_vm0, %v2752_v55  ;;  %v2104_v60 = vmul.f32 %v6735_v56, %v8302_v13  ;;  %v2518_v59 = vadd.f32 %v2302_v58, %v2102_v25  ;;  %v8303_v55 = vld [vmem:[#allocation193_spill] sm:$0xff]  ;;  %v2740_v27 = vmax.f32 %v2516_v39, 0.0  ;;  %v2741_v28 = vmax.f32 %v2517_v30, 0.0  ;;  %v8315_v25 = vld [vmem:[#allocation199_spill] sm:$0xff] }
 0x2da   :  { %2942 = vst [vmem:[%s7684_s3 + $0x578] sm:$0xff] %v2718_v31  ;;  %v2105_v11 = vmul.f32 %v6735_v56, %v8303_v55  ;;  %v2519_v26 = vadd.f32 %v2302_v58, %v2103_v22  ;;  %v8304_v31 = vld [vmem:[#allocation167_spill] sm:$0xff]  ;;  %v8316_v22 = vld [vmem:[#allocation200_spill] sm:$0xff]  ;;  %v8317_v13 = vld [vmem:[#allocation201_spill] sm:$0xff]  ;;  %v2312_v55 = vpop.permute.xlu1 %2311 }
 0x2db   :  { %2943 = vst [vmem:[%s7684_s3 + $0x580] sm:$0xff] %v2719_v50  ;;  %v2092_v2 = vmul.f32 %v6741_v34, %v8304_v31  ;;  %v2520_v51 = vadd.f32 %v2302_v58, %v2104_v60  ;;  %v2093_v50 = vmul.f32 %v6741_v34, %v8305_v15  ;;  %v2317_v18 = vpop.permute.xlu0 %2316  ;;  %v2126_v60 = vmul.f32 %v6739_v42, %v8317_v13  ;;  %v8320_v15 = vld [vmem:[#allocation183_spill] sm:$0xff] }
 0x2dc   :  { %2944 = vst [vmem:[%s7684_s3 + $0x588] sm:$0xff] %v2720_v32  ;;  %v2521_v56 = vadd.f32 %v2302_v58, %v2105_v11  ;;  %v2742_v32 = vmax.f32 %v2518_v59, 0.0  ;;  %v2743_v8 = vmax.f32 %v2519_v26, 0.0  ;;  %v8311_v58 = vld [vmem:[#allocation195_spill] sm:$0xff]  ;;  %v2538_v39 = vadd.f32 %v2317_v18, %v2122_v41 }
 0x2dd   :  { %2945 = vst [vmem:[%s7684_s3 + $0x590] sm:$0xff] %v2721_v3  ;;  %v2508_v35 = vadd.f32 %v2297_v21, %v2092_v2  ;;  %v2095_v3 = vmul.f32 %v6741_v34, %v8307_v7  ;;  %v2509_v12 = vadd.f32 %v2297_v21, %v2093_v50  ;;  %v2744_v23 = vmax.f32 %v2520_v51, 0.0  ;;  %v8319_v51 = vld [vmem:[#allocation182_spill] sm:$0xff]  ;;  %v8322_v7 = vld [vmem:[#allocation185_spill] sm:$0xff] }
 0x2de   :  { %2946 = vst [vmem:[%s7684_s3 + $0x598] sm:$0xff] %v2722_v63  ;;  %v2096_v63 = vmul.f32 %v6741_v34, %v8308_v43  ;;  %v2745_v53 = vmax.f32 %v2521_v56, 0.0  ;;  %v2120_v6 = vmul.f32 %v6739_v42, %v8311_v58  ;;  %v2542_v31 = vadd.f32 %v2317_v18, %v2126_v60  ;;  %v8323_v43 = vld [vmem:[#allocation186_spill] sm:$0xff] }
 0x2df   :  { %2947 = vst [vmem:[%s7684_s3 + $0x5a0] sm:$0xff] %v2723_v10  ;;  %v2097_v10 = vmul.f32 %v6741_v34, %v8309_v38  ;;  %v2511_v62 = vadd.f32 %v2297_v21, %v2095_v3  ;;  %v2732_v5 = vmax.f32 %v2508_v35, 0.0  ;;  %v2762_v2 = vmax.f32 %v2538_v39, 0.0 }
 0x2e0   :  { %2948 = vst.msk [vmem:[%s7684_s3 + $0x5a8] sm:$0xff] %vm243_vm0, %v2724_v33  ;;  %v2098_v33 = vmul.f32 %v6741_v34, %v8310_v52  ;;  %v2512_v48 = vadd.f32 %v2297_v21, %v2096_v63  ;;  %v2115_v50 = vmul.f32 %v6780_v17, %v8320_v15  ;;  %v2117_v3 = vmul.f32 %v6780_v17, %v8322_v7 }
 0x2e1   :  { %2935 = vst [vmem:[%s7684_s3 + $0x540] sm:$0xff] %v2711_v54  ;;  %v2513_v49 = vadd.f32 %v2297_v21, %v2097_v10  ;;  %v2733_v54 = vmax.f32 %v2509_v12, 0.0  ;;  %v2735_v44 = vmax.f32 %v2511_v62, 0.0  ;;  %v2766_v12 = vmax.f32 %v2542_v31, 0.0 }
 0x2e2   :  { %2936 = vst [vmem:[%s7684_s3 + $0x548] sm:$0xff] %v2712_v4  ;;  %v2514_v34 = vadd.f32 %v2297_v21, %v2098_v33  ;;  %v2121_v4 = vmul.f32 %v6739_v42, %v8312_v20  ;;  %v2736_v19 = vmax.f32 %v2512_v48, 0.0  ;;  %v2118_v63 = vmul.f32 %v6780_v17, %v8323_v43 }
 0x2e3   :  { %2937 = vst [vmem:[%s7684_s3 + $0x550] sm:$0xff] %v2713_v16  ;;  %v2536_v16 = vadd.f32 %v2317_v18, %v2120_v6  ;;  %v2737_v57 = vmax.f32 %v2513_v49, 0.0  ;;  %v2119_v38 = vmul.f32 %v6780_v17, %v8324_v24  ;;  %v2533_v10 = vadd.f32 %v2312_v55, %v2117_v3 }
 0x2e4   :  { %2938 = vst [vmem:[%s7684_s3 + $0x558] sm:$0xff] %v2714_v36  ;;  %v2123_v36 = vmul.f32 %v6739_v42, %v8314_v45  ;;  %v2537_v61 = vadd.f32 %v2317_v18, %v2121_v4  ;;  %v2738_v0 = vmax.f32 %v2514_v34, 0.0  ;;  %v2534_v62 = vadd.f32 %v2312_v55, %v2118_v63 }
 0x2e5   :  { %2939 = vst [vmem:[%s7684_s3 + $0x560] sm:$0xff] %v2715_v40  ;;  %v2124_v40 = vmul.f32 %v6739_v42, %v8315_v25  ;;  %v2760_v59 = vmax.f32 %v2536_v16, 0.0  ;;  %v2535_v33 = vadd.f32 %v2312_v55, %v2119_v38 }
 0x2e6   :  { %2940 = vst [vmem:[%s7684_s3 + $0x568] sm:$0xff] %v2716_v14  ;;  %v2125_v14 = vmul.f32 %v6739_v42, %v8316_v22  ;;  %v2539_v30 = vadd.f32 %v2317_v18, %v2123_v36  ;;  %v2761_v26 = vmax.f32 %v2537_v61, 0.0  ;;  %v2114_v42 = vmul.f32 %v6780_v17, %v8319_v51 }
 0x2e7   :  { %2941 = vst.msk [vmem:[%s7684_s3 + $0x570] sm:$0xff] %vm243_vm0, %v2717_v9  ;;  %v2540_v9 = vadd.f32 %v2317_v18, %v2124_v40  ;;  %v2759_v49 = vmax.f32 %v2535_v33, 0.0 }
 0x2e8   :  { %2963 = vst [vmem:[%s7684_s3 + $0x620] sm:$0xff] %v2739_v47  ;;  %v2541_v11 = vadd.f32 %v2317_v18, %v2125_v14  ;;  %v8318_v47 = vld [vmem:[#allocation181_spill] sm:$0xff]  ;;  %v2758_v18 = vmax.f32 %v2534_v62, 0.0 }
 0x2e9   :  { %2964 = vst [vmem:[%s7684_s3 + $0x628] sm:$0xff] %v2740_v27  ;;  %v2113_v21 = vmul.f32 %v6780_v17, %v8318_v47  ;;  %v2763_v27 = vmax.f32 %v2539_v30, 0.0 }
 0x2ea   :  { %2965 = vst [vmem:[%s7684_s3 + $0x630] sm:$0xff] %v2741_v28  ;;  %v2764_v28 = vmax.f32 %v2540_v9, 0.0  ;;  %v2765_v35 = vmax.f32 %v2541_v11, 0.0 }
 0x2eb   :  { %2966 = vst [vmem:[%s7684_s3 + $0x638] sm:$0xff] %v2742_v32  ;;  %v2529_v56 = vadd.f32 %v2312_v55, %v2113_v21  ;;  %v2530_v32 = vadd.f32 %v2312_v55, %v2114_v42 }
 0x2ec   :  { %2967 = vst [vmem:[%s7684_s3 + $0x640] sm:$0xff] %v2743_v8  ;;  %v2531_v8 = vadd.f32 %v2312_v55, %v2115_v50 }
 0x2ed   :  { %2968 = vst [vmem:[%s7684_s3 + $0x648] sm:$0xff] %v2744_v23  ;;  %v2532_v23 = vadd.f32 %v2312_v55, %v2116_v46  ;;  %v2754_v52 = vmax.f32 %v2530_v32, 0.0 }
 0x2ee   :  { %2969 = vst.msk [vmem:[%s7684_s3 + $0x650] sm:$0xff] %vm243_vm0, %v2745_v53  ;;  %v2753_v53 = vmax.f32 %v2529_v56, 0.0  ;;  %v2755_v48 = vmax.f32 %v2531_v8, 0.0 }
 0x2ef   :  { %2956 = vst [vmem:[%s7684_s3 + $0x5e8] sm:$0xff] %v2732_v5  ;;  %v2756_v17 = vmax.f32 %v2532_v23, 0.0  ;;  %v2757_v5 = vmax.f32 %v2533_v10, 0.0 }
 0x2f0   :  { %2957 = vst [vmem:[%s7684_s3 + $0x5f0] sm:$0xff] %v2733_v54 }
 0x2f1   :  { %2958 = vst [vmem:[%s7684_s3 + $0x5f8] sm:$0xff] %v2734_v1 }
 0x2f2   :  { %2959 = vst [vmem:[%s7684_s3 + $0x600] sm:$0xff] %v2735_v44 }
 0x2f3   :  { %2960 = vst [vmem:[%s7684_s3 + $0x608] sm:$0xff] %v2736_v19 }
 0x2f4   :  { %2961 = vst [vmem:[%s7684_s3 + $0x610] sm:$0xff] %v2737_v57 }
 0x2f5   :  { %2962 = vst.msk [vmem:[%s7684_s3 + $0x618] sm:$0xff] %vm243_vm0, %v2738_v0 }
 0x2f6   :  { %2984 = vst [vmem:[%s7684_s3 + $0x6c8] sm:$0xff] %v2760_v59 }
 0x2f7   :  { %2985 = vst [vmem:[%s7684_s3 + $0x6d0] sm:$0xff] %v2761_v26 }
 0x2f8   :  { %2986 = vst [vmem:[%s7684_s3 + $0x6d8] sm:$0xff] %v2762_v2 }
 0x2f9   :  { %2987 = vst [vmem:[%s7684_s3 + $0x6e0] sm:$0xff] %v2763_v27 }
 0x2fa   :  { %2988 = vst [vmem:[%s7684_s3 + $0x6e8] sm:$0xff] %v2764_v28 }
 0x2fb   :  { %2989 = vst [vmem:[%s7684_s3 + $0x6f0] sm:$0xff] %v2765_v35 }
 0x2fc   :  { %2990 = vst.msk [vmem:[%s7684_s3 + $0x6f8] sm:$0xff] %vm243_vm0, %v2766_v12 }
 0x2fd   :  { %2977 = vst [vmem:[%s7684_s3 + $0x690] sm:$0xff] %v2753_v53 }
 0x2fe   :  { %2978 = vst [vmem:[%s7684_s3 + $0x698] sm:$0xff] %v2754_v52 }
 0x2ff   :  { %2979 = vst [vmem:[%s7684_s3 + $0x6a0] sm:$0xff] %v2755_v48 }
 0x300   :  { %2980 = vst [vmem:[%s7684_s3 + $0x6a8] sm:$0xff] %v2756_v17 }
 0x301   :  { %2981 = vst [vmem:[%s7684_s3 + $0x6b0] sm:$0xff] %v2757_v5 }
 0x302   :  { %2982 = vst [vmem:[%s7684_s3 + $0x6b8] sm:$0xff] %v2758_v18 }
 0x303   :  { %2983 = vst.msk [vmem:[%s7684_s3 + $0x6c0] sm:$0xff] %vm243_vm0, %v2759_v49 }

</bundles_post_ra>
